<compile_context>
chip_gen: v7x
topology: tpu7x:2x2x1
jax: 0.10.0
libtpu: 0.0.40
codegen_flags: <defaults>
</compile_context>

<pallas_src>
import jax
import jax.numpy as jnp
import numpy as np
from jax.experimental import pallas as pl
from jax.experimental.pallas import tpu as pltpu


def _round_up(x: int, m: int) -> int:
    return ((x + m - 1) // m) * m


# ----------------------------------------------------------------------------
# Pallas kernel
# ----------------------------------------------------------------------------
def _make_kernel(beta: float, chunk: int, W: int, H: int, O: int,
                 offs, off_b: int):
    beta = float(beta)
    off_s1, off_s2, off_s3, off_s4 = offs

    def kernel(
        x_ref,                                   # (C, BP, LANES) packed input + bias lane
        w1_ref, w2_ref, w3_ref, w4_ref,          # (LANES, LANES) bf16 packed weights
        spk_ref,                                 # (C, BP, LANES) packed spikes out
        mem_out_ref,                             # (BP, LANES) final membranes (resident)
        mem_sc, st_sc,                           # VMEM scratch: membranes / prev state
    ):
        c = pl.program_id(0)

        @pl.when(c == 0)
        def _init():
            mem_sc[...] = jnp.zeros_like(mem_sc)
            st_sc[...] = jnp.zeros_like(st_sc)

        BP, LANES = mem_sc.shape
        lane = jax.lax.broadcasted_iota(jnp.int32, (BP, LANES), 1)
        # lanes refreshed from the input every step: x slot + constant-1 bias lane
        mask_in = (lane < W) | (lane == off_b)
        layer_masks = (
            (lane >= off_s1) & (lane < off_s1 + H),
            (lane >= off_s2) & (lane < off_s2 + H),
            (lane >= off_s3) & (lane < off_s3 + H),
            (lane >= off_s4) & (lane < off_s4 + O),
        )
        w_refs = (w1_ref, w2_ref, w3_ref, w4_ref)

        def step(i, carry):
            mem, state = carry
            # refresh x lanes + bias lane; keep previous-step spikes in place
            state = jnp.where(mask_in, x_ref[i], state)
            for w_ref, m_l in zip(w_refs, layer_masks):
                # one MXU push per layer; bias rides the constant-1 lane (last row)
                cur = jnp.dot(state.astype(jnp.bfloat16), w_ref[...],
                              preferred_element_type=jnp.float32)
                reset = (mem > 1.0).astype(jnp.float32)
                mem_new = beta * mem + cur - reset
                spk = (mem_new > 1.0).astype(jnp.float32)
                mem = jnp.where(m_l, mem_new, mem)     # update only this layer's lanes
                state = jnp.where(m_l, spk, state)      # spike lands at its shared slot
            spk_ref[i] = state                          # one lane-dense 128-wide store
            return mem, state

        unroll = chunk if chunk <= 8 else 4
        mem_f, st_f = jax.lax.fori_loop(
            0, chunk, step, (mem_sc[...], st_sc[...]), unroll=unroll)

        mem_sc[...] = mem_f
        st_sc[...] = st_f
        mem_out_ref[...] = mem_f        # written every chunk (cheap, flush-independent)

    return kernel


# ----------------------------------------------------------------------------
# Wrapper
# ----------------------------------------------------------------------------
def neuron_soup_forward(x, params, *, beta, num_steps, batch_size,
                        input_width, num_hidden, num_outputs, max_chunk=128):
    """x: (in_size, num_steps, input_width) float32."""
    w1, b1, w2, b2, w3, b3, w4, b4 = params
    T, W, H, O = num_steps, input_width, num_hidden, num_outputs
    in_size = x.shape[0]

    # Shared lane layout: [ x | spk1 | spk2 | spk3 | spk4 | bias ]
    off_x, off_s1, off_s2, off_s3, off_s4 = 0, W, W + H, W + 2 * H, W + 3 * H
    off_b = off_s4 + O
    LANES = _round_up(off_b + 1, 128)
    BP = _round_up(max(batch_size, 8), 8)

    # Largest chunk size <= max_chunk that divides T (amortizes grid-step cost).
    C = 1
    for cand in range(min(T, max_chunk), 0, -1):
        if T % cand == 0:
            C = cand
            break
    n_chunks = T // C

    # Torch semantics: zero-pad batch up to batch_size; additionally pad to BP
    # sublanes.  Bias lane is a constant 1.0 for every row / step.
    n_rows = min(in_size, batch_size)
    x_tm = jnp.transpose(x[:batch_size, :, :W], (1, 0, 2)).astype(jnp.float32)
    x_pad = jnp.zeros((T, BP, LANES), jnp.float32)
    x_pad = x_pad.at[:, :n_rows, :W].set(x_tm)
    x_pad = x_pad.at[:, :, off_b].set(1.0)

    # Pack each layer's weight (+ bias as the last nonzero row) into a single
    # (LANES, LANES) bf16 matrix aligned to the shared lane layout.
    def pack_layer(w, b, in_slots, out_off, out_size):
        w = jnp.asarray(w, jnp.float32)
        wp = jnp.zeros((LANES, LANES), jnp.float32)
        r = 0
        for off, sz in in_slots:
            wp = wp.at[off:off + sz, out_off:out_off + out_size].set(
                w[r:r + sz, :out_size])
            r += sz
        bvec = jnp.reshape(jnp.asarray(b, jnp.float32), (-1,))[:out_size]
        wp = wp.at[off_b, out_off:out_off + out_size].set(bvec)
        return wp.astype(jnp.bfloat16)

    w1p = pack_layer(w1, b1, [(off_x, W), (off_s2, H), (off_s3, H), (off_s4, O)], off_s1, H)
    w2p = pack_layer(w2, b2, [(off_s1, H), (off_s3, H), (off_s4, O)], off_s2, H)
    w3p = pack_layer(w3, b3, [(off_s1, H), (off_s2, H), (off_s4, O)], off_s3, H)
    w4p = pack_layer(w4, b4, [(off_s1, H), (off_s2, H), (off_s3, H)], off_s4, O)

    # Weights: resident in VMEM, no double-buffering of constant-index blocks.
    vmem_spec = pl.BlockSpec(memory_space=pltpu.MemorySpace.VMEM)
    in_specs = [pl.BlockSpec((C, BP, LANES), lambda t: (t, 0, 0))] + [vmem_spec] * 4

    out_specs = [
        pl.BlockSpec((C, BP, LANES), lambda t: (t, 0, 0)),   # packed spikes, lane-dense
        pl.BlockSpec((BP, LANES), lambda t: (0, 0)),         # final membranes (resident)
    ]
    out_shape = (
        jax.ShapeDtypeStruct((T, BP, LANES), jnp.float32),
        jax.ShapeDtypeStruct((BP, LANES), jnp.float32),
    )
    scratch_shapes = [
        pltpu.VMEM((BP, LANES), jnp.float32),   # membranes of all 4 layers (lane slots)
        pltpu.VMEM((BP, LANES), jnp.float32),   # previous-step packed state (spikes)
    ]

    grid_spec = pltpu.PrefetchScalarGridSpec(
        num_scalar_prefetch=0,
        grid=(n_chunks,),
        in_specs=in_specs,
        out_specs=out_specs,
        scratch_shapes=scratch_shapes,
    )

    spk_slab, mem_slab = pl.pallas_call(
        _make_kernel(beta, C, W, H, O, (off_s1, off_s2, off_s3, off_s4), off_b),
        out_shape=out_shape,
        grid_spec=grid_spec,
        compiler_params=pltpu.CompilerParams(
            dimension_semantics=("arbitrary",)),   # time recurrence is sequential
    )(x_pad, w1p, w2p, w3p, w4p)

    # Slice the shared-layout slab back into the four recordings (torch keeps
    # batch_size rows, including zero-padded batch rows).
    spk1 = spk_slab[:, :batch_size, off_s1:off_s1 + H]
    spk2 = spk_slab[:, :batch_size, off_s2:off_s2 + H]
    spk3 = spk_slab[:, :batch_size, off_s3:off_s3 + H]
    spk4 = spk_slab[:, :batch_size, off_s4:off_s4 + O]

    rows = in_size if in_size < batch_size else batch_size
    mem4 = mem_slab[:rows, off_s4:off_s4 + O]

    # TODO(synk): the PyTorch module also stores prev_spk2/3/4 on `self` for the
    # next call; that cross-call statefulness is not carried by this function.
    return [spk1, spk2, spk3, spk4], mem4


# ----------------------------------------------------------------------------
# Pure-JAX reference (PyTorch-faithful math; matmuls mirror the kernel's
# bf16-input / f32-accumulate MXU precision so the comparison is apples-to-apples)
# ----------------------------------------------------------------------------
def reference_forward(x, params, *, beta, num_steps, batch_size,
                      input_width, num_hidden, num_outputs):
    w1, b1, w2, b2, w3, b3, w4, b4 = params
    B, H, O, W = batch_size, num_hidden, num_outputs, input_width
    in_size = x.shape[0]
    if in_size < B:
        x = jnp.concatenate(
            [x, jnp.zeros((B - in_size, num_steps, W), x.dtype)], axis=0)
    x = x[:B]

    def bdot(a, w):
        return jnp.dot(a.astype(jnp.bfloat16), jnp.asarray(w).astype(jnp.bfloat16),
                       preferred_element_type=jnp.float32)

    def lif(cur, mem):
        reset = (mem > 1.0).astype(jnp.float32)
        mem_new = beta * mem + cur - reset
        spk = (mem_new > 1.0).astype(jnp.float32)
        return spk, mem_new

    mem1 = jnp.zeros((B, H)); mem2 = jnp.zeros((B, H))
    mem3 = jnp.zeros((B, H)); mem4 = jnp.zeros((B, O))
    ps2 = jnp.zeros((B, H)); ps3 = jnp.zeros((B, H)); ps4 = jnp.zeros((B, O))
    r1, r2, r3, r4 = [], [], [], []
    for step in range(num_steps):
        xt = x[:, step, :W]
        spk1, mem1 = lif(bdot(jnp.concatenate([xt, ps2, ps3, ps4], 1), w1) + b1, mem1)
        spk2, mem2 = lif(bdot(jnp.concatenate([spk1, ps3, ps4], 1), w2) + b2, mem2)
        spk3, mem3 = lif(bdot(jnp.concatenate([spk1, spk2, ps4], 1), w3) + b3, mem3)
        spk4, mem4 = lif(bdot(jnp.concatenate([spk1, spk2, spk3], 1), w4) + b4, mem4)
        r1.append(spk1); r2.append(spk2); r3.append(spk3); r4.append(spk4)
        ps2, ps3, ps4 = spk2, spk3, spk4
    mem4_out = mem4[:in_size] if in_size < B else mem4
    return ([jnp.stack(r1), jnp.stack(r2), jnp.stack(r3), jnp.stack(r4)],
            mem4_out)


# ----------------------------------------------------------------------------
# Parameter init (deterministic, PyTorch nn.Linear-style uniform)
# ----------------------------------------------------------------------------
def init_params(key, *, input_width, num_hidden, num_outputs):
    W, H, O = input_width, num_hidden, num_outputs

    def linear(k, fan_in, fan_out):
        kw, kb = jax.random.split(k)
        bound = 1.0 / np.sqrt(fan_in)
        w = jax.random.uniform(kw, (fan_in, fan_out), jnp.float32, -bound, bound)
        b = jax.random.uniform(kb, (fan_out,), jnp.float32, -bound, bound)
        return w, b

    k1, k2, k3, k4 = jax.random.split(key, 4)
    w1, b1 = linear(k1, W + 2 * H + O, H)   # fc1: [x | spk2 | spk3 | spk4]
    w2, b2 = linear(k2, 2 * H + O, H)       # fc2: [spk1 | spk3 | spk4]
    w3, b3 = linear(k3, 2 * H + O, H)       # fc3: [spk1 | spk2 | spk4]
    w4, b4 = linear(k4, 3 * H, O)           # fc4: [spk1 | spk2 | spk3]
    return (w1, b1, w2, b2, w3, b3, w4, b4)


# ----------------------------------------------------------------------------
if __name__ == "__main__":
    batch_size = 2
    num_steps = 8
    input_width = 16          # num_inputs == input_width
    num_hidden = 32
    num_outputs = 4
    beta = 0.9

    key = jax.random.PRNGKey(0)
    kx, kp = jax.random.split(key)

    params = init_params(kp, input_width=input_width,
                         num_hidden=num_hidden, num_outputs=num_outputs)
    # Scale so membrane potentials actually cross threshold and spike.
    x = 4.0 * jax.random.normal(kx, (batch_size, num_steps, input_width),
                                jnp.float32)

    # Pre-round x / params to bf16 values (kept in f32) so the kernel's bf16
    # MXU casts are lossless and the reference sees the same quantized values.
    rb = lambda a: a.astype(jnp.bfloat16).astype(jnp.float32)
    params_q = tuple(rb(p) for p in params)
    x_q = rb(x)

    cfg = dict(beta=beta, num_steps=num_steps, batch_size=batch_size,
               input_width=input_width, num_hidden=num_hidden,
               num_outputs=num_outputs)

    spk_recs, mem4 = neuron_soup_forward(x_q, params_q, **cfg)
    spk_recs = [jax.block_until_ready(s) for s in spk_recs]
    mem4 = jax.block_until_ready(mem4)

    ref_spk_recs, ref_mem4 = reference_forward(x_q, params_q, **cfg)

    for got, want in zip(spk_recs, ref_spk_recs):
        np.testing.assert_allclose(np.asarray(got), np.asarray(want),
                                   rtol=1e-5, atol=1e-5)
    np.testing.assert_allclose(np.asarray(mem4), np.asarray(ref_mem4),
                               rtol=2e-3, atol=2e-3)

    print("KERNEL_OK")
</pallas_src>

<mosaic_0001>
module attributes {stable_mosaic.version = 11 : i64} {
  func.func @kernel(%arg0: i32, %arg1: memref<8x8x128xf32, #tpu.memory_space<vmem>>, %arg2: memref<128x128xbf16, #tpu.memory_space<vmem>>, %arg3: memref<128x128xbf16, #tpu.memory_space<vmem>>, %arg4: memref<128x128xbf16, #tpu.memory_space<vmem>>, %arg5: memref<128x128xbf16, #tpu.memory_space<vmem>>, %arg6: memref<8x8x128xf32, #tpu.memory_space<vmem>>, %arg7: memref<8x128xf32, #tpu.memory_space<vmem>>, %arg8: memref<8x128xf32, #tpu.memory_space<vmem>>, %arg9: memref<8x128xf32, #tpu.memory_space<vmem>>) attributes {dimension_semantics = [#tpu.dimension_semantics<arbitrary>], iteration_bounds = array<i64: 1>, scalar_prefetch = 0 : i64, scratch_operands = 2 : i64, tpu.core_type = #tpu.core_type<tc>, window_params = [{transform_indices = @transform_0, window_bounds = array<i64: 8, 8, 128>}, {pipeline_mode = #tpu.pipeline_mode<synchronous>, transform_indices = @transform_1, window_bounds = array<i64: 128, 128>}, {pipeline_mode = #tpu.pipeline_mode<synchronous>, transform_indices = @transform_2, window_bounds = array<i64: 128, 128>}, {pipeline_mode = #tpu.pipeline_mode<synchronous>, transform_indices = @transform_3, window_bounds = array<i64: 128, 128>}, {pipeline_mode = #tpu.pipeline_mode<synchronous>, transform_indices = @transform_4, window_bounds = array<i64: 128, 128>}, {transform_indices = @transform_5, window_bounds = array<i64: 8, 8, 128>}, {pipeline_mode = #tpu.pipeline_mode<synchronous>, transform_indices = @transform_6, window_bounds = array<i64: 8, 128>}]} {
    %c0_i32 = arith.constant 0 : i32
    %0 = arith.cmpi eq, %arg0, %c0_i32 : i32
    %1 = arith.extui %0 : i1 to i32
    %c0_i32_0 = arith.constant 0 : i32
    %2 = arith.cmpi ne, %1, %c0_i32_0 : i32
    scf.if %2 {
      %cst_239 = arith.constant 0.000000e+00 : f32
      %642 = vector.broadcast %cst_239 : f32 to vector<8x128xf32>
      %c0_240 = arith.constant 0 : index
      %c0_241 = arith.constant 0 : index
      %643 = vector.load %arg8[%c0_240, %c0_241] : memref<8x128xf32, #tpu.memory_space<vmem>>, vector<8x128xf32>
      tpu.vector_store %arg8[%c0_240, %c0_241], %642 {strides = array<i32>} : memref<8x128xf32, #tpu.memory_space<vmem>>, vector<8x128xf32>,
      %cst_242 = arith.constant 0.000000e+00 : f32
      %644 = vector.broadcast %cst_242 : f32 to vector<8x128xf32>
      %c0_243 = arith.constant 0 : index
      %c0_244 = arith.constant 0 : index
      %645 = vector.load %arg9[%c0_243, %c0_244] : memref<8x128xf32, #tpu.memory_space<vmem>>, vector<8x128xf32>
      tpu.vector_store %arg9[%c0_243, %c0_244], %644 {strides = array<i32>} : memref<8x128xf32, #tpu.memory_space<vmem>>, vector<8x128xf32>,
    } else {
    }
    %3 = tpu.iota {dimensions = array<i32: 1>} : vector<8x128xi32>
    %c16_i32 = arith.constant 16 : i32
    %4 = vector.broadcast %c16_i32 : i32 to vector<8x128xi32>
    %5 = arith.cmpi slt, %3, %4 : vector<8x128xi32>
    %c116_i32 = arith.constant 116 : i32
    %6 = vector.broadcast %c116_i32 : i32 to vector<8x128xi32>
    %7 = arith.cmpi eq, %3, %6 : vector<8x128xi32>
    %8 = arith.ori %5, %7 : vector<8x128xi1>
    %c16_i32_1 = arith.constant 16 : i32
    %9 = vector.broadcast %c16_i32_1 : i32 to vector<8x128xi32>
    %10 = arith.cmpi sge, %3, %9 : vector<8x128xi32>
    %c48_i32 = arith.constant 48 : i32
    %11 = vector.broadcast %c48_i32 : i32 to vector<8x128xi32>
    %12 = arith.cmpi slt, %3, %11 : vector<8x128xi32>
    %13 = arith.andi %10, %12 : vector<8x128xi1>
    %c48_i32_2 = arith.constant 48 : i32
    %14 = vector.broadcast %c48_i32_2 : i32 to vector<8x128xi32>
    %15 = arith.cmpi sge, %3, %14 : vector<8x128xi32>
    %c80_i32 = arith.constant 80 : i32
    %16 = vector.broadcast %c80_i32 : i32 to vector<8x128xi32>
    %17 = arith.cmpi slt, %3, %16 : vector<8x128xi32>
    %18 = arith.andi %15, %17 : vector<8x128xi1>
    %c80_i32_3 = arith.constant 80 : i32
    %19 = vector.broadcast %c80_i32_3 : i32 to vector<8x128xi32>
    %20 = arith.cmpi sge, %3, %19 : vector<8x128xi32>
    %c112_i32 = arith.constant 112 : i32
    %21 = vector.broadcast %c112_i32 : i32 to vector<8x128xi32>
    %22 = arith.cmpi slt, %3, %21 : vector<8x128xi32>
    %23 = arith.andi %20, %22 : vector<8x128xi1>
    %c112_i32_4 = arith.constant 112 : i32
    %24 = vector.broadcast %c112_i32_4 : i32 to vector<8x128xi32>
    %25 = arith.cmpi sge, %3, %24 : vector<8x128xi32>
    %c116_i32_5 = arith.constant 116 : i32
    %26 = vector.broadcast %c116_i32_5 : i32 to vector<8x128xi32>
    %27 = arith.cmpi slt, %3, %26 : vector<8x128xi32>
    %28 = arith.andi %25, %27 : vector<8x128xi1>
    %c0 = arith.constant 0 : index
    %c0_6 = arith.constant 0 : index
    %29 = vector.load %arg8[%c0, %c0_6] : memref<8x128xf32, #tpu.memory_space<vmem>>, vector<8x128xf32>
    %c0_7 = arith.constant 0 : index
    %c0_8 = arith.constant 0 : index
    %30 = vector.load %arg9[%c0_7, %c0_8] : memref<8x128xf32, #tpu.memory_space<vmem>>, vector<8x128xf32>
    %c0_i32_9 = arith.constant 0 : i32
    %31 = arith.index_cast %c0_i32_9 : i32 to index
    %c0_10 = arith.constant 0 : index
    %c0_11 = arith.constant 0 : index
    %32 = vector.load %arg1[%31, %c0_10, %c0_11] : memref<8x8x128xf32, #tpu.memory_space<vmem>>, vector<1x8x128xf32>
    %33 = vector.shape_cast %32 : vector<1x8x128xf32> to vector<8x128xf32>
    %34 = arith.select %8, %33, %30 : vector<8x128xi1>, vector<8x128xf32>
    %35 = arith.truncf %34 : vector<8x128xf32> to vector<8x128xbf16>
    %c0_12 = arith.constant 0 : index
    %c0_13 = arith.constant 0 : index
    %36 = vector.load %arg2[%c0_12, %c0_13] : memref<128x128xbf16, #tpu.memory_space<vmem>>, vector<128x128xbf16>
    %cst = arith.constant dense<0.000000e+00> : vector<8x128xf32>
    %37 = tpu.matmul %35, %36, %cst {dimension_numbers = #tpu.dot_dimension_numbers<[1], [0], [0], [1], [0, 0, 1, 1], [], []>} : vector<8x128xbf16>, vector<128x128xbf16>, vector<8x128xf32> -> vector<8x128xf32>
    %cst_14 = arith.constant 1.000000e+00 : f32
    %38 = vector.broadcast %cst_14 : f32 to vector<8x128xf32>
    %39 = arith.cmpf ogt, %29, %38 : vector<8x128xf32>
    %40 = arith.extui %39 : vector<8x128xi1> to vector<8x128xi32>
    %41 = arith.sitofp %40 : vector<8x128xi32> to vector<8x128xf32>
    %cst_15 = arith.constant 0.899999976 : f32
    %42 = vector.broadcast %cst_15 : f32 to vector<8x128xf32>
    %43 = arith.mulf %42, %29 : vector<8x128xf32>
    %44 = arith.addf %43, %37 : vector<8x128xf32>
    %45 = arith.subf %44, %41 : vector<8x128xf32>
    %cst_16 = arith.constant 1.000000e+00 : f32
    %46 = vector.broadcast %cst_16 : f32 to vector<8x128xf32>
    %47 = arith.cmpf ogt, %45, %46 : vector<8x128xf32>
    %48 = arith.extui %47 : vector<8x128xi1> to vector<8x128xi32>
    %49 = arith.sitofp %48 : vector<8x128xi32> to vector<8x128xf32>
    %50 = arith.select %13, %45, %29 : vector<8x128xi1>, vector<8x128xf32>
    %51 = arith.select %13, %49, %34 : vector<8x128xi1>, vector<8x128xf32>
    %52 = arith.truncf %51 : vector<8x128xf32> to vector<8x128xbf16>
    %c0_17 = arith.constant 0 : index
    %c0_18 = arith.constant 0 : index
    %53 = vector.load %arg3[%c0_17, %c0_18] : memref<128x128xbf16, #tpu.memory_space<vmem>>, vector<128x128xbf16>
    %cst_19 = arith.constant dense<0.000000e+00> : vector<8x128xf32>
    %54 = tpu.matmul %52, %53, %cst_19 {dimension_numbers = #tpu.dot_dimension_numbers<[1], [0], [0], [1], [0, 0, 1, 1], [], []>} : vector<8x128xbf16>, vector<128x128xbf16>, vector<8x128xf32> -> vector<8x128xf32>
    %cst_20 = arith.constant 1.000000e+00 : f32
    %55 = vector.broadcast %cst_20 : f32 to vector<8x128xf32>
    %56 = arith.cmpf ogt, %50, %55 : vector<8x128xf32>
    %57 = arith.extui %56 : vector<8x128xi1> to vector<8x128xi32>
    %58 = arith.sitofp %57 : vector<8x128xi32> to vector<8x128xf32>
    %cst_21 = arith.constant 0.899999976 : f32
    %59 = vector.broadcast %cst_21 : f32 to vector<8x128xf32>
    %60 = arith.mulf %59, %50 : vector<8x128xf32>
    %61 = arith.addf %60, %54 : vector<8x128xf32>
    %62 = arith.subf %61, %58 : vector<8x128xf32>
    %cst_22 = arith.constant 1.000000e+00 : f32
    %63 = vector.broadcast %cst_22 : f32 to vector<8x128xf32>
    %64 = arith.cmpf ogt, %62, %63 : vector<8x128xf32>
    %65 = arith.extui %64 : vector<8x128xi1> to vector<8x128xi32>
    %66 = arith.sitofp %65 : vector<8x128xi32> to vector<8x128xf32>
    %67 = arith.select %18, %62, %50 : vector<8x128xi1>, vector<8x128xf32>
    %68 = arith.select %18, %66, %51 : vector<8x128xi1>, vector<8x128xf32>
    %69 = arith.truncf %68 : vector<8x128xf32> to vector<8x128xbf16>
    %c0_23 = arith.constant 0 : index
    %c0_24 = arith.constant 0 : index
    %70 = vector.load %arg4[%c0_23, %c0_24] : memref<128x128xbf16, #tpu.memory_space<vmem>>, vector<128x128xbf16>
    %cst_25 = arith.constant dense<0.000000e+00> : vector<8x128xf32>
    %71 = tpu.matmul %69, %70, %cst_25 {dimension_numbers = #tpu.dot_dimension_numbers<[1], [0], [0], [1], [0, 0, 1, 1], [], []>} : vector<8x128xbf16>, vector<128x128xbf16>, vector<8x128xf32> -> vector<8x128xf32>
    %cst_26 = arith.constant 1.000000e+00 : f32
    %72 = vector.broadcast %cst_26 : f32 to vector<8x128xf32>
    %73 = arith.cmpf ogt, %67, %72 : vector<8x128xf32>
    %74 = arith.extui %73 : vector<8x128xi1> to vector<8x128xi32>
    %75 = arith.sitofp %74 : vector<8x128xi32> to vector<8x128xf32>
    %cst_27 = arith.constant 0.899999976 : f32
    %76 = vector.broadcast %cst_27 : f32 to vector<8x128xf32>
    %77 = arith.mulf %76, %67 : vector<8x128xf32>
    %78 = arith.addf %77, %71 : vector<8x128xf32>
    %79 = arith.subf %78, %75 : vector<8x128xf32>
    %cst_28 = arith.constant 1.000000e+00 : f32
    %80 = vector.broadcast %cst_28 : f32 to vector<8x128xf32>
    %81 = arith.cmpf ogt, %79, %80 : vector<8x128xf32>
    %82 = arith.extui %81 : vector<8x128xi1> to vector<8x128xi32>
    %83 = arith.sitofp %82 : vector<8x128xi32> to vector<8x128xf32>
    %84 = arith.select %23, %79, %67 : vector<8x128xi1>, vector<8x128xf32>
    %85 = arith.select %23, %83, %68 : vector<8x128xi1>, vector<8x128xf32>
    %86 = arith.truncf %85 : vector<8x128xf32> to vector<8x128xbf16>
    %c0_29 = arith.constant 0 : index
    %c0_30 = arith.constant 0 : index
    %87 = vector.load %arg5[%c0_29, %c0_30] : memref<128x128xbf16, #tpu.memory_space<vmem>>, vector<128x128xbf16>
    %cst_31 = arith.constant dense<0.000000e+00> : vector<8x128xf32>
    %88 = tpu.matmul %86, %87, %cst_31 {dimension_numbers = #tpu.dot_dimension_numbers<[1], [0], [0], [1], [0, 0, 1, 1], [], []>} : vector<8x128xbf16>, vector<128x128xbf16>, vector<8x128xf32> -> vector<8x128xf32>
    %cst_32 = arith.constant 1.000000e+00 : f32
    %89 = vector.broadcast %cst_32 : f32 to vector<8x128xf32>
    %90 = arith.cmpf ogt, %84, %89 : vector<8x128xf32>
    %91 = arith.extui %90 : vector<8x128xi1> to vector<8x128xi32>
    %92 = arith.sitofp %91 : vector<8x128xi32> to vector<8x128xf32>
    %cst_33 = arith.constant 0.899999976 : f32
    %93 = vector.broadcast %cst_33 : f32 to vector<8x128xf32>
    %94 = arith.mulf %93, %84 : vector<8x128xf32>
    %95 = arith.addf %94, %88 : vector<8x128xf32>
    %96 = arith.subf %95, %92 : vector<8x128xf32>
    %cst_34 = arith.constant 1.000000e+00 : f32
    %97 = vector.broadcast %cst_34 : f32 to vector<8x128xf32>
    %98 = arith.cmpf ogt, %96, %97 : vector<8x128xf32>
    %99 = arith.extui %98 : vector<8x128xi1> to vector<8x128xi32>
    %100 = arith.sitofp %99 : vector<8x128xi32> to vector<8x128xf32>
    %101 = arith.select %28, %96, %84 : vector<8x128xi1>, vector<8x128xf32>
    %102 = arith.select %28, %100, %85 : vector<8x128xi1>, vector<8x128xf32>
    %103 = arith.index_cast %c0_i32_9 : i32 to index
    %c0_35 = arith.constant 0 : index
    %c0_36 = arith.constant 0 : index
    %104 = vector.load %arg6[%103, %c0_35, %c0_36] : memref<8x8x128xf32, #tpu.memory_space<vmem>>, vector<1x8x128xf32>
    %105 = vector.shape_cast %104 : vector<1x8x128xf32> to vector<8x128xf32>
    %106 = vector.shape_cast %102 : vector<8x128xf32> to vector<1x8x128xf32>
    tpu.vector_store %arg6[%103, %c0_35, %c0_36], %106 {strides = array<i32>} : memref<8x8x128xf32, #tpu.memory_space<vmem>>, vector<1x8x128xf32>,
    %c1_i32 = arith.constant 1 : i32
    %107 = arith.index_cast %c1_i32 : i32 to index
    %c0_37 = arith.constant 0 : index
    %c0_38 = arith.constant 0 : index
    %108 = vector.load %arg1[%107, %c0_37, %c0_38] : memref<8x8x128xf32, #tpu.memory_space<vmem>>, vector<1x8x128xf32>
    %109 = vector.shape_cast %108 : vector<1x8x128xf32> to vector<8x128xf32>
    %110 = arith.select %8, %109, %102 : vector<8x128xi1>, vector<8x128xf32>
    %111 = arith.truncf %110 : vector<8x128xf32> to vector<8x128xbf16>
    %c0_39 = arith.constant 0 : index
    %c0_40 = arith.constant 0 : index
    %112 = vector.load %arg2[%c0_39, %c0_40] : memref<128x128xbf16, #tpu.memory_space<vmem>>, vector<128x128xbf16>
    %cst_41 = arith.constant dense<0.000000e+00> : vector<8x128xf32>
    %113 = tpu.matmul %111, %112, %cst_41 {dimension_numbers = #tpu.dot_dimension_numbers<[1], [0], [0], [1], [0, 0, 1, 1], [], []>} : vector<8x128xbf16>, vector<128x128xbf16>, vector<8x128xf32> -> vector<8x128xf32>
    %cst_42 = arith.constant 1.000000e+00 : f32
    %114 = vector.broadcast %cst_42 : f32 to vector<8x128xf32>
    %115 = arith.cmpf ogt, %101, %114 : vector<8x128xf32>
    %116 = arith.extui %115 : vector<8x128xi1> to vector<8x128xi32>
    %117 = arith.sitofp %116 : vector<8x128xi32> to vector<8x128xf32>
    %cst_43 = arith.constant 0.899999976 : f32
    %118 = vector.broadcast %cst_43 : f32 to vector<8x128xf32>
    %119 = arith.mulf %118, %101 : vector<8x128xf32>
    %120 = arith.addf %119, %113 : vector<8x128xf32>
    %121 = arith.subf %120, %117 : vector<8x128xf32>
    %cst_44 = arith.constant 1.000000e+00 : f32
    %122 = vector.broadcast %cst_44 : f32 to vector<8x128xf32>
    %123 = arith.cmpf ogt, %121, %122 : vector<8x128xf32>
    %124 = arith.extui %123 : vector<8x128xi1> to vector<8x128xi32>
    %125 = arith.sitofp %124 : vector<8x128xi32> to vector<8x128xf32>
    %126 = arith.select %13, %121, %101 : vector<8x128xi1>, vector<8x128xf32>
    %127 = arith.select %13, %125, %110 : vector<8x128xi1>, vector<8x128xf32>
    %128 = arith.truncf %127 : vector<8x128xf32> to vector<8x128xbf16>
    %c0_45 = arith.constant 0 : index
    %c0_46 = arith.constant 0 : index
    %129 = vector.load %arg3[%c0_45, %c0_46] : memref<128x128xbf16, #tpu.memory_space<vmem>>, vector<128x128xbf16>
    %cst_47 = arith.constant dense<0.000000e+00> : vector<8x128xf32>
    %130 = tpu.matmul %128, %129, %cst_47 {dimension_numbers = #tpu.dot_dimension_numbers<[1], [0], [0], [1], [0, 0, 1, 1], [], []>} : vector<8x128xbf16>, vector<128x128xbf16>, vector<8x128xf32> -> vector<8x128xf32>
    %cst_48 = arith.constant 1.000000e+00 : f32
    %131 = vector.broadcast %cst_48 : f32 to vector<8x128xf32>
    %132 = arith.cmpf ogt, %126, %131 : vector<8x128xf32>
    %133 = arith.extui %132 : vector<8x128xi1> to vector<8x128xi32>
    %134 = arith.sitofp %133 : vector<8x128xi32> to vector<8x128xf32>
    %cst_49 = arith.constant 0.899999976 : f32
    %135 = vector.broadcast %cst_49 : f32 to vector<8x128xf32>
    %136 = arith.mulf %135, %126 : vector<8x128xf32>
    %137 = arith.addf %136, %130 : vector<8x128xf32>
    %138 = arith.subf %137, %134 : vector<8x128xf32>
    %cst_50 = arith.constant 1.000000e+00 : f32
    %139 = vector.broadcast %cst_50 : f32 to vector<8x128xf32>
    %140 = arith.cmpf ogt, %138, %139 : vector<8x128xf32>
    %141 = arith.extui %140 : vector<8x128xi1> to vector<8x128xi32>
    %142 = arith.sitofp %141 : vector<8x128xi32> to vector<8x128xf32>
    %143 = arith.select %18, %138, %126 : vector<8x128xi1>, vector<8x128xf32>
    %144 = arith.select %18, %142, %127 : vector<8x128xi1>, vector<8x128xf32>
    %145 = arith.truncf %144 : vector<8x128xf32> to vector<8x128xbf16>
    %c0_51 = arith.constant 0 : index
    %c0_52 = arith.constant 0 : index
    %146 = vector.load %arg4[%c0_51, %c0_52] : memref<128x128xbf16, #tpu.memory_space<vmem>>, vector<128x128xbf16>
    %cst_53 = arith.constant dense<0.000000e+00> : vector<8x128xf32>
    %147 = tpu.matmul %145, %146, %cst_53 {dimension_numbers = #tpu.dot_dimension_numbers<[1], [0], [0], [1], [0, 0, 1, 1], [], []>} : vector<8x128xbf16>, vector<128x128xbf16>, vector<8x128xf32> -> vector<8x128xf32>
    %cst_54 = arith.constant 1.000000e+00 : f32
    %148 = vector.broadcast %cst_54 : f32 to vector<8x128xf32>
    %149 = arith.cmpf ogt, %143, %148 : vector<8x128xf32>
    %150 = arith.extui %149 : vector<8x128xi1> to vector<8x128xi32>
    %151 = arith.sitofp %150 : vector<8x128xi32> to vector<8x128xf32>
    %cst_55 = arith.constant 0.899999976 : f32
    %152 = vector.broadcast %cst_55 : f32 to vector<8x128xf32>
    %153 = arith.mulf %152, %143 : vector<8x128xf32>
    %154 = arith.addf %153, %147 : vector<8x128xf32>
    %155 = arith.subf %154, %151 : vector<8x128xf32>
    %cst_56 = arith.constant 1.000000e+00 : f32
    %156 = vector.broadcast %cst_56 : f32 to vector<8x128xf32>
    %157 = arith.cmpf ogt, %155, %156 : vector<8x128xf32>
    %158 = arith.extui %157 : vector<8x128xi1> to vector<8x128xi32>
    %159 = arith.sitofp %158 : vector<8x128xi32> to vector<8x128xf32>
    %160 = arith.select %23, %155, %143 : vector<8x128xi1>, vector<8x128xf32>
    %161 = arith.select %23, %159, %144 : vector<8x128xi1>, vector<8x128xf32>
    %162 = arith.truncf %161 : vector<8x128xf32> to vector<8x128xbf16>
    %c0_57 = arith.constant 0 : index
    %c0_58 = arith.constant 0 : index
    %163 = vector.load %arg5[%c0_57, %c0_58] : memref<128x128xbf16, #tpu.memory_space<vmem>>, vector<128x128xbf16>
    %cst_59 = arith.constant dense<0.000000e+00> : vector<8x128xf32>
    %164 = tpu.matmul %162, %163, %cst_59 {dimension_numbers = #tpu.dot_dimension_numbers<[1], [0], [0], [1], [0, 0, 1, 1], [], []>} : vector<8x128xbf16>, vector<128x128xbf16>, vector<8x128xf32> -> vector<8x128xf32>
    %cst_60 = arith.constant 1.000000e+00 : f32
    %165 = vector.broadcast %cst_60 : f32 to vector<8x128xf32>
    %166 = arith.cmpf ogt, %160, %165 : vector<8x128xf32>
    %167 = arith.extui %166 : vector<8x128xi1> to vector<8x128xi32>
    %168 = arith.sitofp %167 : vector<8x128xi32> to vector<8x128xf32>
    %cst_61 = arith.constant 0.899999976 : f32
    %169 = vector.broadcast %cst_61 : f32 to vector<8x128xf32>
    %170 = arith.mulf %169, %160 : vector<8x128xf32>
    %171 = arith.addf %170, %164 : vector<8x128xf32>
    %172 = arith.subf %171, %168 : vector<8x128xf32>
    %cst_62 = arith.constant 1.000000e+00 : f32
    %173 = vector.broadcast %cst_62 : f32 to vector<8x128xf32>
    %174 = arith.cmpf ogt, %172, %173 : vector<8x128xf32>
    %175 = arith.extui %174 : vector<8x128xi1> to vector<8x128xi32>
    %176 = arith.sitofp %175 : vector<8x128xi32> to vector<8x128xf32>
    %177 = arith.select %28, %172, %160 : vector<8x128xi1>, vector<8x128xf32>
    %178 = arith.select %28, %176, %161 : vector<8x128xi1>, vector<8x128xf32>
    %179 = arith.index_cast %c1_i32 : i32 to index
    %c0_63 = arith.constant 0 : index
    %c0_64 = arith.constant 0 : index
    %180 = vector.load %arg6[%179, %c0_63, %c0_64] : memref<8x8x128xf32, #tpu.memory_space<vmem>>, vector<1x8x128xf32>
    %181 = vector.shape_cast %180 : vector<1x8x128xf32> to vector<8x128xf32>
    %182 = vector.shape_cast %178 : vector<8x128xf32> to vector<1x8x128xf32>
    tpu.vector_store %arg6[%179, %c0_63, %c0_64], %182 {strides = array<i32>} : memref<8x8x128xf32, #tpu.memory_space<vmem>>, vector<1x8x128xf32>,
    %c2_i32 = arith.constant 2 : i32
    %183 = arith.index_cast %c2_i32 : i32 to index
    %c0_65 = arith.constant 0 : index
    %c0_66 = arith.constant 0 : index
    %184 = vector.load %arg1[%183, %c0_65, %c0_66] : memref<8x8x128xf32, #tpu.memory_space<vmem>>, vector<1x8x128xf32>
    %185 = vector.shape_cast %184 : vector<1x8x128xf32> to vector<8x128xf32>
    %186 = arith.select %8, %185, %178 : vector<8x128xi1>, vector<8x128xf32>
    %187 = arith.truncf %186 : vector<8x128xf32> to vector<8x128xbf16>
    %c0_67 = arith.constant 0 : index
    %c0_68 = arith.constant 0 : index
    %188 = vector.load %arg2[%c0_67, %c0_68] : memref<128x128xbf16, #tpu.memory_space<vmem>>, vector<128x128xbf16>
    %cst_69 = arith.constant dense<0.000000e+00> : vector<8x128xf32>
    %189 = tpu.matmul %187, %188, %cst_69 {dimension_numbers = #tpu.dot_dimension_numbers<[1], [0], [0], [1], [0, 0, 1, 1], [], []>} : vector<8x128xbf16>, vector<128x128xbf16>, vector<8x128xf32> -> vector<8x128xf32>
    %cst_70 = arith.constant 1.000000e+00 : f32
    %190 = vector.broadcast %cst_70 : f32 to vector<8x128xf32>
    %191 = arith.cmpf ogt, %177, %190 : vector<8x128xf32>
    %192 = arith.extui %191 : vector<8x128xi1> to vector<8x128xi32>
    %193 = arith.sitofp %192 : vector<8x128xi32> to vector<8x128xf32>
    %cst_71 = arith.constant 0.899999976 : f32
    %194 = vector.broadcast %cst_71 : f32 to vector<8x128xf32>
    %195 = arith.mulf %194, %177 : vector<8x128xf32>
    %196 = arith.addf %195, %189 : vector<8x128xf32>
    %197 = arith.subf %196, %193 : vector<8x128xf32>
    %cst_72 = arith.constant 1.000000e+00 : f32
    %198 = vector.broadcast %cst_72 : f32 to vector<8x128xf32>
    %199 = arith.cmpf ogt, %197, %198 : vector<8x128xf32>
    %200 = arith.extui %199 : vector<8x128xi1> to vector<8x128xi32>
    %201 = arith.sitofp %200 : vector<8x128xi32> to vector<8x128xf32>
    %202 = arith.select %13, %197, %177 : vector<8x128xi1>, vector<8x128xf32>
    %203 = arith.select %13, %201, %186 : vector<8x128xi1>, vector<8x128xf32>
    %204 = arith.truncf %203 : vector<8x128xf32> to vector<8x128xbf16>
    %c0_73 = arith.constant 0 : index
    %c0_74 = arith.constant 0 : index
    %205 = vector.load %arg3[%c0_73, %c0_74] : memref<128x128xbf16, #tpu.memory_space<vmem>>, vector<128x128xbf16>
    %cst_75 = arith.constant dense<0.000000e+00> : vector<8x128xf32>
    %206 = tpu.matmul %204, %205, %cst_75 {dimension_numbers = #tpu.dot_dimension_numbers<[1], [0], [0], [1], [0, 0, 1, 1], [], []>} : vector<8x128xbf16>, vector<128x128xbf16>, vector<8x128xf32> -> vector<8x128xf32>
    %cst_76 = arith.constant 1.000000e+00 : f32
    %207 = vector.broadcast %cst_76 : f32 to vector<8x128xf32>
    %208 = arith.cmpf ogt, %202, %207 : vector<8x128xf32>
    %209 = arith.extui %208 : vector<8x128xi1> to vector<8x128xi32>
    %210 = arith.sitofp %209 : vector<8x128xi32> to vector<8x128xf32>
    %cst_77 = arith.constant 0.899999976 : f32
    %211 = vector.broadcast %cst_77 : f32 to vector<8x128xf32>
    %212 = arith.mulf %211, %202 : vector<8x128xf32>
    %213 = arith.addf %212, %206 : vector<8x128xf32>
    %214 = arith.subf %213, %210 : vector<8x128xf32>
    %cst_78 = arith.constant 1.000000e+00 : f32
    %215 = vector.broadcast %cst_78 : f32 to vector<8x128xf32>
    %216 = arith.cmpf ogt, %214, %215 : vector<8x128xf32>
    %217 = arith.extui %216 : vector<8x128xi1> to vector<8x128xi32>
    %218 = arith.sitofp %217 : vector<8x128xi32> to vector<8x128xf32>
    %219 = arith.select %18, %214, %202 : vector<8x128xi1>, vector<8x128xf32>
    %220 = arith.select %18, %218, %203 : vector<8x128xi1>, vector<8x128xf32>
    %221 = arith.truncf %220 : vector<8x128xf32> to vector<8x128xbf16>
    %c0_79 = arith.constant 0 : index
    %c0_80 = arith.constant 0 : index
    %222 = vector.load %arg4[%c0_79, %c0_80] : memref<128x128xbf16, #tpu.memory_space<vmem>>, vector<128x128xbf16>
    %cst_81 = arith.constant dense<0.000000e+00> : vector<8x128xf32>
    %223 = tpu.matmul %221, %222, %cst_81 {dimension_numbers = #tpu.dot_dimension_numbers<[1], [0], [0], [1], [0, 0, 1, 1], [], []>} : vector<8x128xbf16>, vector<128x128xbf16>, vector<8x128xf32> -> vector<8x128xf32>
    %cst_82 = arith.constant 1.000000e+00 : f32
    %224 = vector.broadcast %cst_82 : f32 to vector<8x128xf32>
    %225 = arith.cmpf ogt, %219, %224 : vector<8x128xf32>
    %226 = arith.extui %225 : vector<8x128xi1> to vector<8x128xi32>
    %227 = arith.sitofp %226 : vector<8x128xi32> to vector<8x128xf32>
    %cst_83 = arith.constant 0.899999976 : f32
    %228 = vector.broadcast %cst_83 : f32 to vector<8x128xf32>
    %229 = arith.mulf %228, %219 : vector<8x128xf32>
    %230 = arith.addf %229, %223 : vector<8x128xf32>
    %231 = arith.subf %230, %227 : vector<8x128xf32>
    %cst_84 = arith.constant 1.000000e+00 : f32
    %232 = vector.broadcast %cst_84 : f32 to vector<8x128xf32>
    %233 = arith.cmpf ogt, %231, %232 : vector<8x128xf32>
    %234 = arith.extui %233 : vector<8x128xi1> to vector<8x128xi32>
    %235 = arith.sitofp %234 : vector<8x128xi32> to vector<8x128xf32>
    %236 = arith.select %23, %231, %219 : vector<8x128xi1>, vector<8x128xf32>
    %237 = arith.select %23, %235, %220 : vector<8x128xi1>, vector<8x128xf32>
    %238 = arith.truncf %237 : vector<8x128xf32> to vector<8x128xbf16>
    %c0_85 = arith.constant 0 : index
    %c0_86 = arith.constant 0 : index
    %239 = vector.load %arg5[%c0_85, %c0_86] : memref<128x128xbf16, #tpu.memory_space<vmem>>, vector<128x128xbf16>
    %cst_87 = arith.constant dense<0.000000e+00> : vector<8x128xf32>
    %240 = tpu.matmul %238, %239, %cst_87 {dimension_numbers = #tpu.dot_dimension_numbers<[1], [0], [0], [1], [0, 0, 1, 1], [], []>} : vector<8x128xbf16>, vector<128x128xbf16>, vector<8x128xf32> -> vector<8x128xf32>
    %cst_88 = arith.constant 1.000000e+00 : f32
    %241 = vector.broadcast %cst_88 : f32 to vector<8x128xf32>
    %242 = arith.cmpf ogt, %236, %241 : vector<8x128xf32>
    %243 = arith.extui %242 : vector<8x128xi1> to vector<8x128xi32>
    %244 = arith.sitofp %243 : vector<8x128xi32> to vector<8x128xf32>
    %cst_89 = arith.constant 0.899999976 : f32
    %245 = vector.broadcast %cst_89 : f32 to vector<8x128xf32>
    %246 = arith.mulf %245, %236 : vector<8x128xf32>
    %247 = arith.addf %246, %240 : vector<8x128xf32>
    %248 = arith.subf %247, %244 : vector<8x128xf32>
    %cst_90 = arith.constant 1.000000e+00 : f32
    %249 = vector.broadcast %cst_90 : f32 to vector<8x128xf32>
    %250 = arith.cmpf ogt, %248, %249 : vector<8x128xf32>
    %251 = arith.extui %250 : vector<8x128xi1> to vector<8x128xi32>
    %252 = arith.sitofp %251 : vector<8x128xi32> to vector<8x128xf32>
    %253 = arith.select %28, %248, %236 : vector<8x128xi1>, vector<8x128xf32>
    %254 = arith.select %28, %252, %237 : vector<8x128xi1>, vector<8x128xf32>
    %255 = arith.index_cast %c2_i32 : i32 to index
    %c0_91 = arith.constant 0 : index
    %c0_92 = arith.constant 0 : index
    %256 = vector.load %arg6[%255, %c0_91, %c0_92] : memref<8x8x128xf32, #tpu.memory_space<vmem>>, vector<1x8x128xf32>
    %257 = vector.shape_cast %256 : vector<1x8x128xf32> to vector<8x128xf32>
    %258 = vector.shape_cast %254 : vector<8x128xf32> to vector<1x8x128xf32>
    tpu.vector_store %arg6[%255, %c0_91, %c0_92], %258 {strides = array<i32>} : memref<8x8x128xf32, #tpu.memory_space<vmem>>, vector<1x8x128xf32>,
    %c3_i32 = arith.constant 3 : i32
    %259 = arith.index_cast %c3_i32 : i32 to index
    %c0_93 = arith.constant 0 : index
    %c0_94 = arith.constant 0 : index
    %260 = vector.load %arg1[%259, %c0_93, %c0_94] : memref<8x8x128xf32, #tpu.memory_space<vmem>>, vector<1x8x128xf32>
    %261 = vector.shape_cast %260 : vector<1x8x128xf32> to vector<8x128xf32>
    %262 = arith.select %8, %261, %254 : vector<8x128xi1>, vector<8x128xf32>
    %263 = arith.truncf %262 : vector<8x128xf32> to vector<8x128xbf16>
    %c0_95 = arith.constant 0 : index
    %c0_96 = arith.constant 0 : index
    %264 = vector.load %arg2[%c0_95, %c0_96] : memref<128x128xbf16, #tpu.memory_space<vmem>>, vector<128x128xbf16>
    %cst_97 = arith.constant dense<0.000000e+00> : vector<8x128xf32>
    %265 = tpu.matmul %263, %264, %cst_97 {dimension_numbers = #tpu.dot_dimension_numbers<[1], [0], [0], [1], [0, 0, 1, 1], [], []>} : vector<8x128xbf16>, vector<128x128xbf16>, vector<8x128xf32> -> vector<8x128xf32>
    %cst_98 = arith.constant 1.000000e+00 : f32
    %266 = vector.broadcast %cst_98 : f32 to vector<8x128xf32>
    %267 = arith.cmpf ogt, %253, %266 : vector<8x128xf32>
    %268 = arith.extui %267 : vector<8x128xi1> to vector<8x128xi32>
    %269 = arith.sitofp %268 : vector<8x128xi32> to vector<8x128xf32>
    %cst_99 = arith.constant 0.899999976 : f32
    %270 = vector.broadcast %cst_99 : f32 to vector<8x128xf32>
    %271 = arith.mulf %270, %253 : vector<8x128xf32>
    %272 = arith.addf %271, %265 : vector<8x128xf32>
    %273 = arith.subf %272, %269 : vector<8x128xf32>
    %cst_100 = arith.constant 1.000000e+00 : f32
    %274 = vector.broadcast %cst_100 : f32 to vector<8x128xf32>
    %275 = arith.cmpf ogt, %273, %274 : vector<8x128xf32>
    %276 = arith.extui %275 : vector<8x128xi1> to vector<8x128xi32>
    %277 = arith.sitofp %276 : vector<8x128xi32> to vector<8x128xf32>
    %278 = arith.select %13, %273, %253 : vector<8x128xi1>, vector<8x128xf32>
    %279 = arith.select %13, %277, %262 : vector<8x128xi1>, vector<8x128xf32>
    %280 = arith.truncf %279 : vector<8x128xf32> to vector<8x128xbf16>
    %c0_101 = arith.constant 0 : index
    %c0_102 = arith.constant 0 : index
    %281 = vector.load %arg3[%c0_101, %c0_102] : memref<128x128xbf16, #tpu.memory_space<vmem>>, vector<128x128xbf16>
    %cst_103 = arith.constant dense<0.000000e+00> : vector<8x128xf32>
    %282 = tpu.matmul %280, %281, %cst_103 {dimension_numbers = #tpu.dot_dimension_numbers<[1], [0], [0], [1], [0, 0, 1, 1], [], []>} : vector<8x128xbf16>, vector<128x128xbf16>, vector<8x128xf32> -> vector<8x128xf32>
    %cst_104 = arith.constant 1.000000e+00 : f32
    %283 = vector.broadcast %cst_104 : f32 to vector<8x128xf32>
    %284 = arith.cmpf ogt, %278, %283 : vector<8x128xf32>
    %285 = arith.extui %284 : vector<8x128xi1> to vector<8x128xi32>
    %286 = arith.sitofp %285 : vector<8x128xi32> to vector<8x128xf32>
    %cst_105 = arith.constant 0.899999976 : f32
    %287 = vector.broadcast %cst_105 : f32 to vector<8x128xf32>
    %288 = arith.mulf %287, %278 : vector<8x128xf32>
    %289 = arith.addf %288, %282 : vector<8x128xf32>
    %290 = arith.subf %289, %286 : vector<8x128xf32>
    %cst_106 = arith.constant 1.000000e+00 : f32
    %291 = vector.broadcast %cst_106 : f32 to vector<8x128xf32>
    %292 = arith.cmpf ogt, %290, %291 : vector<8x128xf32>
    %293 = arith.extui %292 : vector<8x128xi1> to vector<8x128xi32>
    %294 = arith.sitofp %293 : vector<8x128xi32> to vector<8x128xf32>
    %295 = arith.select %18, %290, %278 : vector<8x128xi1>, vector<8x128xf32>
    %296 = arith.select %18, %294, %279 : vector<8x128xi1>, vector<8x128xf32>
    %297 = arith.truncf %296 : vector<8x128xf32> to vector<8x128xbf16>
    %c0_107 = arith.constant 0 : index
    %c0_108 = arith.constant 0 : index
    %298 = vector.load %arg4[%c0_107, %c0_108] : memref<128x128xbf16, #tpu.memory_space<vmem>>, vector<128x128xbf16>
    %cst_109 = arith.constant dense<0.000000e+00> : vector<8x128xf32>
    %299 = tpu.matmul %297, %298, %cst_109 {dimension_numbers = #tpu.dot_dimension_numbers<[1], [0], [0], [1], [0, 0, 1, 1], [], []>} : vector<8x128xbf16>, vector<128x128xbf16>, vector<8x128xf32> -> vector<8x128xf32>
    %cst_110 = arith.constant 1.000000e+00 : f32
    %300 = vector.broadcast %cst_110 : f32 to vector<8x128xf32>
    %301 = arith.cmpf ogt, %295, %300 : vector<8x128xf32>
    %302 = arith.extui %301 : vector<8x128xi1> to vector<8x128xi32>
    %303 = arith.sitofp %302 : vector<8x128xi32> to vector<8x128xf32>
    %cst_111 = arith.constant 0.899999976 : f32
    %304 = vector.broadcast %cst_111 : f32 to vector<8x128xf32>
    %305 = arith.mulf %304, %295 : vector<8x128xf32>
    %306 = arith.addf %305, %299 : vector<8x128xf32>
    %307 = arith.subf %306, %303 : vector<8x128xf32>
    %cst_112 = arith.constant 1.000000e+00 : f32
    %308 = vector.broadcast %cst_112 : f32 to vector<8x128xf32>
    %309 = arith.cmpf ogt, %307, %308 : vector<8x128xf32>
    %310 = arith.extui %309 : vector<8x128xi1> to vector<8x128xi32>
    %311 = arith.sitofp %310 : vector<8x128xi32> to vector<8x128xf32>
    %312 = arith.select %23, %307, %295 : vector<8x128xi1>, vector<8x128xf32>
    %313 = arith.select %23, %311, %296 : vector<8x128xi1>, vector<8x128xf32>
    %314 = arith.truncf %313 : vector<8x128xf32> to vector<8x128xbf16>
    %c0_113 = arith.constant 0 : index
    %c0_114 = arith.constant 0 : index
    %315 = vector.load %arg5[%c0_113, %c0_114] : memref<128x128xbf16, #tpu.memory_space<vmem>>, vector<128x128xbf16>
    %cst_115 = arith.constant dense<0.000000e+00> : vector<8x128xf32>
    %316 = tpu.matmul %314, %315, %cst_115 {dimension_numbers = #tpu.dot_dimension_numbers<[1], [0], [0], [1], [0, 0, 1, 1], [], []>} : vector<8x128xbf16>, vector<128x128xbf16>, vector<8x128xf32> -> vector<8x128xf32>
    %cst_116 = arith.constant 1.000000e+00 : f32
    %317 = vector.broadcast %cst_116 : f32 to vector<8x128xf32>
    %318 = arith.cmpf ogt, %312, %317 : vector<8x128xf32>
    %319 = arith.extui %318 : vector<8x128xi1> to vector<8x128xi32>
    %320 = arith.sitofp %319 : vector<8x128xi32> to vector<8x128xf32>
    %cst_117 = arith.constant 0.899999976 : f32
    %321 = vector.broadcast %cst_117 : f32 to vector<8x128xf32>
    %322 = arith.mulf %321, %312 : vector<8x128xf32>
    %323 = arith.addf %322, %316 : vector<8x128xf32>
    %324 = arith.subf %323, %320 : vector<8x128xf32>
    %cst_118 = arith.constant 1.000000e+00 : f32
    %325 = vector.broadcast %cst_118 : f32 to vector<8x128xf32>
    %326 = arith.cmpf ogt, %324, %325 : vector<8x128xf32>
    %327 = arith.extui %326 : vector<8x128xi1> to vector<8x128xi32>
    %328 = arith.sitofp %327 : vector<8x128xi32> to vector<8x128xf32>
    %329 = arith.select %28, %324, %312 : vector<8x128xi1>, vector<8x128xf32>
    %330 = arith.select %28, %328, %313 : vector<8x128xi1>, vector<8x128xf32>
    %331 = arith.index_cast %c3_i32 : i32 to index
    %c0_119 = arith.constant 0 : index
    %c0_120 = arith.constant 0 : index
    %332 = vector.load %arg6[%331, %c0_119, %c0_120] : memref<8x8x128xf32, #tpu.memory_space<vmem>>, vector<1x8x128xf32>
    %333 = vector.shape_cast %332 : vector<1x8x128xf32> to vector<8x128xf32>
    %334 = vector.shape_cast %330 : vector<8x128xf32> to vector<1x8x128xf32>
    tpu.vector_store %arg6[%331, %c0_119, %c0_120], %334 {strides = array<i32>} : memref<8x8x128xf32, #tpu.memory_space<vmem>>, vector<1x8x128xf32>,
    %c4_i32 = arith.constant 4 : i32
    %335 = arith.index_cast %c4_i32 : i32 to index
    %c0_121 = arith.constant 0 : index
    %c0_122 = arith.constant 0 : index
    %336 = vector.load %arg1[%335, %c0_121, %c0_122] : memref<8x8x128xf32, #tpu.memory_space<vmem>>, vector<1x8x128xf32>
    %337 = vector.shape_cast %336 : vector<1x8x128xf32> to vector<8x128xf32>
    %338 = arith.select %8, %337, %330 : vector<8x128xi1>, vector<8x128xf32>
    %339 = arith.truncf %338 : vector<8x128xf32> to vector<8x128xbf16>
    %c0_123 = arith.constant 0 : index
    %c0_124 = arith.constant 0 : index
    %340 = vector.load %arg2[%c0_123, %c0_124] : memref<128x128xbf16, #tpu.memory_space<vmem>>, vector<128x128xbf16>
    %cst_125 = arith.constant dense<0.000000e+00> : vector<8x128xf32>
    %341 = tpu.matmul %339, %340, %cst_125 {dimension_numbers = #tpu.dot_dimension_numbers<[1], [0], [0], [1], [0, 0, 1, 1], [], []>} : vector<8x128xbf16>, vector<128x128xbf16>, vector<8x128xf32> -> vector<8x128xf32>
    %cst_126 = arith.constant 1.000000e+00 : f32
    %342 = vector.broadcast %cst_126 : f32 to vector<8x128xf32>
    %343 = arith.cmpf ogt, %329, %342 : vector<8x128xf32>
    %344 = arith.extui %343 : vector<8x128xi1> to vector<8x128xi32>
    %345 = arith.sitofp %344 : vector<8x128xi32> to vector<8x128xf32>
    %cst_127 = arith.constant 0.899999976 : f32
    %346 = vector.broadcast %cst_127 : f32 to vector<8x128xf32>
    %347 = arith.mulf %346, %329 : vector<8x128xf32>
    %348 = arith.addf %347, %341 : vector<8x128xf32>
    %349 = arith.subf %348, %345 : vector<8x128xf32>
    %cst_128 = arith.constant 1.000000e+00 : f32
    %350 = vector.broadcast %cst_128 : f32 to vector<8x128xf32>
    %351 = arith.cmpf ogt, %349, %350 : vector<8x128xf32>
    %352 = arith.extui %351 : vector<8x128xi1> to vector<8x128xi32>
    %353 = arith.sitofp %352 : vector<8x128xi32> to vector<8x128xf32>
    %354 = arith.select %13, %349, %329 : vector<8x128xi1>, vector<8x128xf32>
    %355 = arith.select %13, %353, %338 : vector<8x128xi1>, vector<8x128xf32>
    %356 = arith.truncf %355 : vector<8x128xf32> to vector<8x128xbf16>
    %c0_129 = arith.constant 0 : index
    %c0_130 = arith.constant 0 : index
    %357 = vector.load %arg3[%c0_129, %c0_130] : memref<128x128xbf16, #tpu.memory_space<vmem>>, vector<128x128xbf16>
    %cst_131 = arith.constant dense<0.000000e+00> : vector<8x128xf32>
    %358 = tpu.matmul %356, %357, %cst_131 {dimension_numbers = #tpu.dot_dimension_numbers<[1], [0], [0], [1], [0, 0, 1, 1], [], []>} : vector<8x128xbf16>, vector<128x128xbf16>, vector<8x128xf32> -> vector<8x128xf32>
    %cst_132 = arith.constant 1.000000e+00 : f32
    %359 = vector.broadcast %cst_132 : f32 to vector<8x128xf32>
    %360 = arith.cmpf ogt, %354, %359 : vector<8x128xf32>
    %361 = arith.extui %360 : vector<8x128xi1> to vector<8x128xi32>
    %362 = arith.sitofp %361 : vector<8x128xi32> to vector<8x128xf32>
    %cst_133 = arith.constant 0.899999976 : f32
    %363 = vector.broadcast %cst_133 : f32 to vector<8x128xf32>
    %364 = arith.mulf %363, %354 : vector<8x128xf32>
    %365 = arith.addf %364, %358 : vector<8x128xf32>
    %366 = arith.subf %365, %362 : vector<8x128xf32>
    %cst_134 = arith.constant 1.000000e+00 : f32
    %367 = vector.broadcast %cst_134 : f32 to vector<8x128xf32>
    %368 = arith.cmpf ogt, %366, %367 : vector<8x128xf32>
    %369 = arith.extui %368 : vector<8x128xi1> to vector<8x128xi32>
    %370 = arith.sitofp %369 : vector<8x128xi32> to vector<8x128xf32>
    %371 = arith.select %18, %366, %354 : vector<8x128xi1>, vector<8x128xf32>
    %372 = arith.select %18, %370, %355 : vector<8x128xi1>, vector<8x128xf32>
    %373 = arith.truncf %372 : vector<8x128xf32> to vector<8x128xbf16>
    %c0_135 = arith.constant 0 : index
    %c0_136 = arith.constant 0 : index
    %374 = vector.load %arg4[%c0_135, %c0_136] : memref<128x128xbf16, #tpu.memory_space<vmem>>, vector<128x128xbf16>
    %cst_137 = arith.constant dense<0.000000e+00> : vector<8x128xf32>
    %375 = tpu.matmul %373, %374, %cst_137 {dimension_numbers = #tpu.dot_dimension_numbers<[1], [0], [0], [1], [0, 0, 1, 1], [], []>} : vector<8x128xbf16>, vector<128x128xbf16>, vector<8x128xf32> -> vector<8x128xf32>
    %cst_138 = arith.constant 1.000000e+00 : f32
    %376 = vector.broadcast %cst_138 : f32 to vector<8x128xf32>
    %377 = arith.cmpf ogt, %371, %376 : vector<8x128xf32>
    %378 = arith.extui %377 : vector<8x128xi1> to vector<8x128xi32>
    %379 = arith.sitofp %378 : vector<8x128xi32> to vector<8x128xf32>
    %cst_139 = arith.constant 0.899999976 : f32
    %380 = vector.broadcast %cst_139 : f32 to vector<8x128xf32>
    %381 = arith.mulf %380, %371 : vector<8x128xf32>
    %382 = arith.addf %381, %375 : vector<8x128xf32>
    %383 = arith.subf %382, %379 : vector<8x128xf32>
    %cst_140 = arith.constant 1.000000e+00 : f32
    %384 = vector.broadcast %cst_140 : f32 to vector<8x128xf32>
    %385 = arith.cmpf ogt, %383, %384 : vector<8x128xf32>
    %386 = arith.extui %385 : vector<8x128xi1> to vector<8x128xi32>
    %387 = arith.sitofp %386 : vector<8x128xi32> to vector<8x128xf32>
    %388 = arith.select %23, %383, %371 : vector<8x128xi1>, vector<8x128xf32>
    %389 = arith.select %23, %387, %372 : vector<8x128xi1>, vector<8x128xf32>
    %390 = arith.truncf %389 : vector<8x128xf32> to vector<8x128xbf16>
    %c0_141 = arith.constant 0 : index
    %c0_142 = arith.constant 0 : index
    %391 = vector.load %arg5[%c0_141, %c0_142] : memref<128x128xbf16, #tpu.memory_space<vmem>>, vector<128x128xbf16>
    %cst_143 = arith.constant dense<0.000000e+00> : vector<8x128xf32>
    %392 = tpu.matmul %390, %391, %cst_143 {dimension_numbers = #tpu.dot_dimension_numbers<[1], [0], [0], [1], [0, 0, 1, 1], [], []>} : vector<8x128xbf16>, vector<128x128xbf16>, vector<8x128xf32> -> vector<8x128xf32>
    %cst_144 = arith.constant 1.000000e+00 : f32
    %393 = vector.broadcast %cst_144 : f32 to vector<8x128xf32>
    %394 = arith.cmpf ogt, %388, %393 : vector<8x128xf32>
    %395 = arith.extui %394 : vector<8x128xi1> to vector<8x128xi32>
    %396 = arith.sitofp %395 : vector<8x128xi32> to vector<8x128xf32>
    %cst_145 = arith.constant 0.899999976 : f32
    %397 = vector.broadcast %cst_145 : f32 to vector<8x128xf32>
    %398 = arith.mulf %397, %388 : vector<8x128xf32>
    %399 = arith.addf %398, %392 : vector<8x128xf32>
    %400 = arith.subf %399, %396 : vector<8x128xf32>
    %cst_146 = arith.constant 1.000000e+00 : f32
    %401 = vector.broadcast %cst_146 : f32 to vector<8x128xf32>
    %402 = arith.cmpf ogt, %400, %401 : vector<8x128xf32>
    %403 = arith.extui %402 : vector<8x128xi1> to vector<8x128xi32>
    %404 = arith.sitofp %403 : vector<8x128xi32> to vector<8x128xf32>
    %405 = arith.select %28, %400, %388 : vector<8x128xi1>, vector<8x128xf32>
    %406 = arith.select %28, %404, %389 : vector<8x128xi1>, vector<8x128xf32>
    %407 = arith.index_cast %c4_i32 : i32 to index
    %c0_147 = arith.constant 0 : index
    %c0_148 = arith.constant 0 : index
    %408 = vector.load %arg6[%407, %c0_147, %c0_148] : memref<8x8x128xf32, #tpu.memory_space<vmem>>, vector<1x8x128xf32>
    %409 = vector.shape_cast %408 : vector<1x8x128xf32> to vector<8x128xf32>
    %410 = vector.shape_cast %406 : vector<8x128xf32> to vector<1x8x128xf32>
    tpu.vector_store %arg6[%407, %c0_147, %c0_148], %410 {strides = array<i32>} : memref<8x8x128xf32, #tpu.memory_space<vmem>>, vector<1x8x128xf32>,
    %c5_i32 = arith.constant 5 : i32
    %411 = arith.index_cast %c5_i32 : i32 to index
    %c0_149 = arith.constant 0 : index
    %c0_150 = arith.constant 0 : index
    %412 = vector.load %arg1[%411, %c0_149, %c0_150] : memref<8x8x128xf32, #tpu.memory_space<vmem>>, vector<1x8x128xf32>
    %413 = vector.shape_cast %412 : vector<1x8x128xf32> to vector<8x128xf32>
    %414 = arith.select %8, %413, %406 : vector<8x128xi1>, vector<8x128xf32>
    %415 = arith.truncf %414 : vector<8x128xf32> to vector<8x128xbf16>
    %c0_151 = arith.constant 0 : index
    %c0_152 = arith.constant 0 : index
    %416 = vector.load %arg2[%c0_151, %c0_152] : memref<128x128xbf16, #tpu.memory_space<vmem>>, vector<128x128xbf16>
    %cst_153 = arith.constant dense<0.000000e+00> : vector<8x128xf32>
    %417 = tpu.matmul %415, %416, %cst_153 {dimension_numbers = #tpu.dot_dimension_numbers<[1], [0], [0], [1], [0, 0, 1, 1], [], []>} : vector<8x128xbf16>, vector<128x128xbf16>, vector<8x128xf32> -> vector<8x128xf32>
    %cst_154 = arith.constant 1.000000e+00 : f32
    %418 = vector.broadcast %cst_154 : f32 to vector<8x128xf32>
    %419 = arith.cmpf ogt, %405, %418 : vector<8x128xf32>
    %420 = arith.extui %419 : vector<8x128xi1> to vector<8x128xi32>
    %421 = arith.sitofp %420 : vector<8x128xi32> to vector<8x128xf32>
    %cst_155 = arith.constant 0.899999976 : f32
    %422 = vector.broadcast %cst_155 : f32 to vector<8x128xf32>
    %423 = arith.mulf %422, %405 : vector<8x128xf32>
    %424 = arith.addf %423, %417 : vector<8x128xf32>
    %425 = arith.subf %424, %421 : vector<8x128xf32>
    %cst_156 = arith.constant 1.000000e+00 : f32
    %426 = vector.broadcast %cst_156 : f32 to vector<8x128xf32>
    %427 = arith.cmpf ogt, %425, %426 : vector<8x128xf32>
    %428 = arith.extui %427 : vector<8x128xi1> to vector<8x128xi32>
    %429 = arith.sitofp %428 : vector<8x128xi32> to vector<8x128xf32>
    %430 = arith.select %13, %425, %405 : vector<8x128xi1>, vector<8x128xf32>
    %431 = arith.select %13, %429, %414 : vector<8x128xi1>, vector<8x128xf32>
    %432 = arith.truncf %431 : vector<8x128xf32> to vector<8x128xbf16>
    %c0_157 = arith.constant 0 : index
    %c0_158 = arith.constant 0 : index
    %433 = vector.load %arg3[%c0_157, %c0_158] : memref<128x128xbf16, #tpu.memory_space<vmem>>, vector<128x128xbf16>
    %cst_159 = arith.constant dense<0.000000e+00> : vector<8x128xf32>
    %434 = tpu.matmul %432, %433, %cst_159 {dimension_numbers = #tpu.dot_dimension_numbers<[1], [0], [0], [1], [0, 0, 1, 1], [], []>} : vector<8x128xbf16>, vector<128x128xbf16>, vector<8x128xf32> -> vector<8x128xf32>
    %cst_160 = arith.constant 1.000000e+00 : f32
    %435 = vector.broadcast %cst_160 : f32 to vector<8x128xf32>
    %436 = arith.cmpf ogt, %430, %435 : vector<8x128xf32>
    %437 = arith.extui %436 : vector<8x128xi1> to vector<8x128xi32>
    %438 = arith.sitofp %437 : vector<8x128xi32> to vector<8x128xf32>
    %cst_161 = arith.constant 0.899999976 : f32
    %439 = vector.broadcast %cst_161 : f32 to vector<8x128xf32>
    %440 = arith.mulf %439, %430 : vector<8x128xf32>
    %441 = arith.addf %440, %434 : vector<8x128xf32>
    %442 = arith.subf %441, %438 : vector<8x128xf32>
    %cst_162 = arith.constant 1.000000e+00 : f32
    %443 = vector.broadcast %cst_162 : f32 to vector<8x128xf32>
    %444 = arith.cmpf ogt, %442, %443 : vector<8x128xf32>
    %445 = arith.extui %444 : vector<8x128xi1> to vector<8x128xi32>
    %446 = arith.sitofp %445 : vector<8x128xi32> to vector<8x128xf32>
    %447 = arith.select %18, %442, %430 : vector<8x128xi1>, vector<8x128xf32>
    %448 = arith.select %18, %446, %431 : vector<8x128xi1>, vector<8x128xf32>
    %449 = arith.truncf %448 : vector<8x128xf32> to vector<8x128xbf16>
    %c0_163 = arith.constant 0 : index
    %c0_164 = arith.constant 0 : index
    %450 = vector.load %arg4[%c0_163, %c0_164] : memref<128x128xbf16, #tpu.memory_space<vmem>>, vector<128x128xbf16>
    %cst_165 = arith.constant dense<0.000000e+00> : vector<8x128xf32>
    %451 = tpu.matmul %449, %450, %cst_165 {dimension_numbers = #tpu.dot_dimension_numbers<[1], [0], [0], [1], [0, 0, 1, 1], [], []>} : vector<8x128xbf16>, vector<128x128xbf16>, vector<8x128xf32> -> vector<8x128xf32>
    %cst_166 = arith.constant 1.000000e+00 : f32
    %452 = vector.broadcast %cst_166 : f32 to vector<8x128xf32>
    %453 = arith.cmpf ogt, %447, %452 : vector<8x128xf32>
    %454 = arith.extui %453 : vector<8x128xi1> to vector<8x128xi32>
    %455 = arith.sitofp %454 : vector<8x128xi32> to vector<8x128xf32>
    %cst_167 = arith.constant 0.899999976 : f32
    %456 = vector.broadcast %cst_167 : f32 to vector<8x128xf32>
    %457 = arith.mulf %456, %447 : vector<8x128xf32>
    %458 = arith.addf %457, %451 : vector<8x128xf32>
    %459 = arith.subf %458, %455 : vector<8x128xf32>
    %cst_168 = arith.constant 1.000000e+00 : f32
    %460 = vector.broadcast %cst_168 : f32 to vector<8x128xf32>
    %461 = arith.cmpf ogt, %459, %460 : vector<8x128xf32>
    %462 = arith.extui %461 : vector<8x128xi1> to vector<8x128xi32>
    %463 = arith.sitofp %462 : vector<8x128xi32> to vector<8x128xf32>
    %464 = arith.select %23, %459, %447 : vector<8x128xi1>, vector<8x128xf32>
    %465 = arith.select %23, %463, %448 : vector<8x128xi1>, vector<8x128xf32>
    %466 = arith.truncf %465 : vector<8x128xf32> to vector<8x128xbf16>
    %c0_169 = arith.constant 0 : index
    %c0_170 = arith.constant 0 : index
    %467 = vector.load %arg5[%c0_169, %c0_170] : memref<128x128xbf16, #tpu.memory_space<vmem>>, vector<128x128xbf16>
    %cst_171 = arith.constant dense<0.000000e+00> : vector<8x128xf32>
    %468 = tpu.matmul %466, %467, %cst_171 {dimension_numbers = #tpu.dot_dimension_numbers<[1], [0], [0], [1], [0, 0, 1, 1], [], []>} : vector<8x128xbf16>, vector<128x128xbf16>, vector<8x128xf32> -> vector<8x128xf32>
    %cst_172 = arith.constant 1.000000e+00 : f32
    %469 = vector.broadcast %cst_172 : f32 to vector<8x128xf32>
    %470 = arith.cmpf ogt, %464, %469 : vector<8x128xf32>
    %471 = arith.extui %470 : vector<8x128xi1> to vector<8x128xi32>
    %472 = arith.sitofp %471 : vector<8x128xi32> to vector<8x128xf32>
    %cst_173 = arith.constant 0.899999976 : f32
    %473 = vector.broadcast %cst_173 : f32 to vector<8x128xf32>
    %474 = arith.mulf %473, %464 : vector<8x128xf32>
    %475 = arith.addf %474, %468 : vector<8x128xf32>
    %476 = arith.subf %475, %472 : vector<8x128xf32>
    %cst_174 = arith.constant 1.000000e+00 : f32
    %477 = vector.broadcast %cst_174 : f32 to vector<8x128xf32>
    %478 = arith.cmpf ogt, %476, %477 : vector<8x128xf32>
    %479 = arith.extui %478 : vector<8x128xi1> to vector<8x128xi32>
    %480 = arith.sitofp %479 : vector<8x128xi32> to vector<8x128xf32>
    %481 = arith.select %28, %476, %464 : vector<8x128xi1>, vector<8x128xf32>
    %482 = arith.select %28, %480, %465 : vector<8x128xi1>, vector<8x128xf32>
    %483 = arith.index_cast %c5_i32 : i32 to index
    %c0_175 = arith.constant 0 : index
    %c0_176 = arith.constant 0 : index
    %484 = vector.load %arg6[%483, %c0_175, %c0_176] : memref<8x8x128xf32, #tpu.memory_space<vmem>>, vector<1x8x128xf32>
    %485 = vector.shape_cast %484 : vector<1x8x128xf32> to vector<8x128xf32>
    %486 = vector.shape_cast %482 : vector<8x128xf32> to vector<1x8x128xf32>
    tpu.vector_store %arg6[%483, %c0_175, %c0_176], %486 {strides = array<i32>} : memref<8x8x128xf32, #tpu.memory_space<vmem>>, vector<1x8x128xf32>,
    %c6_i32 = arith.constant 6 : i32
    %487 = arith.index_cast %c6_i32 : i32 to index
    %c0_177 = arith.constant 0 : index
    %c0_178 = arith.constant 0 : index
    %488 = vector.load %arg1[%487, %c0_177, %c0_178] : memref<8x8x128xf32, #tpu.memory_space<vmem>>, vector<1x8x128xf32>
    %489 = vector.shape_cast %488 : vector<1x8x128xf32> to vector<8x128xf32>
    %490 = arith.select %8, %489, %482 : vector<8x128xi1>, vector<8x128xf32>
    %491 = arith.truncf %490 : vector<8x128xf32> to vector<8x128xbf16>
    %c0_179 = arith.constant 0 : index
    %c0_180 = arith.constant 0 : index
    %492 = vector.load %arg2[%c0_179, %c0_180] : memref<128x128xbf16, #tpu.memory_space<vmem>>, vector<128x128xbf16>
    %cst_181 = arith.constant dense<0.000000e+00> : vector<8x128xf32>
    %493 = tpu.matmul %491, %492, %cst_181 {dimension_numbers = #tpu.dot_dimension_numbers<[1], [0], [0], [1], [0, 0, 1, 1], [], []>} : vector<8x128xbf16>, vector<128x128xbf16>, vector<8x128xf32> -> vector<8x128xf32>
    %cst_182 = arith.constant 1.000000e+00 : f32
    %494 = vector.broadcast %cst_182 : f32 to vector<8x128xf32>
    %495 = arith.cmpf ogt, %481, %494 : vector<8x128xf32>
    %496 = arith.extui %495 : vector<8x128xi1> to vector<8x128xi32>
    %497 = arith.sitofp %496 : vector<8x128xi32> to vector<8x128xf32>
    %cst_183 = arith.constant 0.899999976 : f32
    %498 = vector.broadcast %cst_183 : f32 to vector<8x128xf32>
    %499 = arith.mulf %498, %481 : vector<8x128xf32>
    %500 = arith.addf %499, %493 : vector<8x128xf32>
    %501 = arith.subf %500, %497 : vector<8x128xf32>
    %cst_184 = arith.constant 1.000000e+00 : f32
    %502 = vector.broadcast %cst_184 : f32 to vector<8x128xf32>
    %503 = arith.cmpf ogt, %501, %502 : vector<8x128xf32>
    %504 = arith.extui %503 : vector<8x128xi1> to vector<8x128xi32>
    %505 = arith.sitofp %504 : vector<8x128xi32> to vector<8x128xf32>
    %506 = arith.select %13, %501, %481 : vector<8x128xi1>, vector<8x128xf32>
    %507 = arith.select %13, %505, %490 : vector<8x128xi1>, vector<8x128xf32>
    %508 = arith.truncf %507 : vector<8x128xf32> to vector<8x128xbf16>
    %c0_185 = arith.constant 0 : index
    %c0_186 = arith.constant 0 : index
    %509 = vector.load %arg3[%c0_185, %c0_186] : memref<128x128xbf16, #tpu.memory_space<vmem>>, vector<128x128xbf16>
    %cst_187 = arith.constant dense<0.000000e+00> : vector<8x128xf32>
    %510 = tpu.matmul %508, %509, %cst_187 {dimension_numbers = #tpu.dot_dimension_numbers<[1], [0], [0], [1], [0, 0, 1, 1], [], []>} : vector<8x128xbf16>, vector<128x128xbf16>, vector<8x128xf32> -> vector<8x128xf32>
    %cst_188 = arith.constant 1.000000e+00 : f32
    %511 = vector.broadcast %cst_188 : f32 to vector<8x128xf32>
    %512 = arith.cmpf ogt, %506, %511 : vector<8x128xf32>
    %513 = arith.extui %512 : vector<8x128xi1> to vector<8x128xi32>
    %514 = arith.sitofp %513 : vector<8x128xi32> to vector<8x128xf32>
    %cst_189 = arith.constant 0.899999976 : f32
    %515 = vector.broadcast %cst_189 : f32 to vector<8x128xf32>
    %516 = arith.mulf %515, %506 : vector<8x128xf32>
    %517 = arith.addf %516, %510 : vector<8x128xf32>
    %518 = arith.subf %517, %514 : vector<8x128xf32>
    %cst_190 = arith.constant 1.000000e+00 : f32
    %519 = vector.broadcast %cst_190 : f32 to vector<8x128xf32>
    %520 = arith.cmpf ogt, %518, %519 : vector<8x128xf32>
    %521 = arith.extui %520 : vector<8x128xi1> to vector<8x128xi32>
    %522 = arith.sitofp %521 : vector<8x128xi32> to vector<8x128xf32>
    %523 = arith.select %18, %518, %506 : vector<8x128xi1>, vector<8x128xf32>
    %524 = arith.select %18, %522, %507 : vector<8x128xi1>, vector<8x128xf32>
    %525 = arith.truncf %524 : vector<8x128xf32> to vector<8x128xbf16>
    %c0_191 = arith.constant 0 : index
    %c0_192 = arith.constant 0 : index
    %526 = vector.load %arg4[%c0_191, %c0_192] : memref<128x128xbf16, #tpu.memory_space<vmem>>, vector<128x128xbf16>
    %cst_193 = arith.constant dense<0.000000e+00> : vector<8x128xf32>
    %527 = tpu.matmul %525, %526, %cst_193 {dimension_numbers = #tpu.dot_dimension_numbers<[1], [0], [0], [1], [0, 0, 1, 1], [], []>} : vector<8x128xbf16>, vector<128x128xbf16>, vector<8x128xf32> -> vector<8x128xf32>
    %cst_194 = arith.constant 1.000000e+00 : f32
    %528 = vector.broadcast %cst_194 : f32 to vector<8x128xf32>
    %529 = arith.cmpf ogt, %523, %528 : vector<8x128xf32>
    %530 = arith.extui %529 : vector<8x128xi1> to vector<8x128xi32>
    %531 = arith.sitofp %530 : vector<8x128xi32> to vector<8x128xf32>
    %cst_195 = arith.constant 0.899999976 : f32
    %532 = vector.broadcast %cst_195 : f32 to vector<8x128xf32>
    %533 = arith.mulf %532, %523 : vector<8x128xf32>
    %534 = arith.addf %533, %527 : vector<8x128xf32>
    %535 = arith.subf %534, %531 : vector<8x128xf32>
    %cst_196 = arith.constant 1.000000e+00 : f32
    %536 = vector.broadcast %cst_196 : f32 to vector<8x128xf32>
    %537 = arith.cmpf ogt, %535, %536 : vector<8x128xf32>
    %538 = arith.extui %537 : vector<8x128xi1> to vector<8x128xi32>
    %539 = arith.sitofp %538 : vector<8x128xi32> to vector<8x128xf32>
    %540 = arith.select %23, %535, %523 : vector<8x128xi1>, vector<8x128xf32>
    %541 = arith.select %23, %539, %524 : vector<8x128xi1>, vector<8x128xf32>
    %542 = arith.truncf %541 : vector<8x128xf32> to vector<8x128xbf16>
    %c0_197 = arith.constant 0 : index
    %c0_198 = arith.constant 0 : index
    %543 = vector.load %arg5[%c0_197, %c0_198] : memref<128x128xbf16, #tpu.memory_space<vmem>>, vector<128x128xbf16>
    %cst_199 = arith.constant dense<0.000000e+00> : vector<8x128xf32>
    %544 = tpu.matmul %542, %543, %cst_199 {dimension_numbers = #tpu.dot_dimension_numbers<[1], [0], [0], [1], [0, 0, 1, 1], [], []>} : vector<8x128xbf16>, vector<128x128xbf16>, vector<8x128xf32> -> vector<8x128xf32>
    %cst_200 = arith.constant 1.000000e+00 : f32
    %545 = vector.broadcast %cst_200 : f32 to vector<8x128xf32>
    %546 = arith.cmpf ogt, %540, %545 : vector<8x128xf32>
    %547 = arith.extui %546 : vector<8x128xi1> to vector<8x128xi32>
    %548 = arith.sitofp %547 : vector<8x128xi32> to vector<8x128xf32>
    %cst_201 = arith.constant 0.899999976 : f32
    %549 = vector.broadcast %cst_201 : f32 to vector<8x128xf32>
    %550 = arith.mulf %549, %540 : vector<8x128xf32>
    %551 = arith.addf %550, %544 : vector<8x128xf32>
    %552 = arith.subf %551, %548 : vector<8x128xf32>
    %cst_202 = arith.constant 1.000000e+00 : f32
    %553 = vector.broadcast %cst_202 : f32 to vector<8x128xf32>
    %554 = arith.cmpf ogt, %552, %553 : vector<8x128xf32>
    %555 = arith.extui %554 : vector<8x128xi1> to vector<8x128xi32>
    %556 = arith.sitofp %555 : vector<8x128xi32> to vector<8x128xf32>
    %557 = arith.select %28, %552, %540 : vector<8x128xi1>, vector<8x128xf32>
    %558 = arith.select %28, %556, %541 : vector<8x128xi1>, vector<8x128xf32>
    %559 = arith.index_cast %c6_i32 : i32 to index
    %c0_203 = arith.constant 0 : index
    %c0_204 = arith.constant 0 : index
    %560 = vector.load %arg6[%559, %c0_203, %c0_204] : memref<8x8x128xf32, #tpu.memory_space<vmem>>, vector<1x8x128xf32>
    %561 = vector.shape_cast %560 : vector<1x8x128xf32> to vector<8x128xf32>
    %562 = vector.shape_cast %558 : vector<8x128xf32> to vector<1x8x128xf32>
    tpu.vector_store %arg6[%559, %c0_203, %c0_204], %562 {strides = array<i32>} : memref<8x8x128xf32, #tpu.memory_space<vmem>>, vector<1x8x128xf32>,
    %c7_i32 = arith.constant 7 : i32
    %563 = arith.index_cast %c7_i32 : i32 to index
    %c0_205 = arith.constant 0 : index
    %c0_206 = arith.constant 0 : index
    %564 = vector.load %arg1[%563, %c0_205, %c0_206] : memref<8x8x128xf32, #tpu.memory_space<vmem>>, vector<1x8x128xf32>
    %565 = vector.shape_cast %564 : vector<1x8x128xf32> to vector<8x128xf32>
    %566 = arith.select %8, %565, %558 : vector<8x128xi1>, vector<8x128xf32>
    %567 = arith.truncf %566 : vector<8x128xf32> to vector<8x128xbf16>
    %c0_207 = arith.constant 0 : index
    %c0_208 = arith.constant 0 : index
    %568 = vector.load %arg2[%c0_207, %c0_208] : memref<128x128xbf16, #tpu.memory_space<vmem>>, vector<128x128xbf16>
    %cst_209 = arith.constant dense<0.000000e+00> : vector<8x128xf32>
    %569 = tpu.matmul %567, %568, %cst_209 {dimension_numbers = #tpu.dot_dimension_numbers<[1], [0], [0], [1], [0, 0, 1, 1], [], []>} : vector<8x128xbf16>, vector<128x128xbf16>, vector<8x128xf32> -> vector<8x128xf32>
    %cst_210 = arith.constant 1.000000e+00 : f32
    %570 = vector.broadcast %cst_210 : f32 to vector<8x128xf32>
    %571 = arith.cmpf ogt, %557, %570 : vector<8x128xf32>
    %572 = arith.extui %571 : vector<8x128xi1> to vector<8x128xi32>
    %573 = arith.sitofp %572 : vector<8x128xi32> to vector<8x128xf32>
    %cst_211 = arith.constant 0.899999976 : f32
    %574 = vector.broadcast %cst_211 : f32 to vector<8x128xf32>
    %575 = arith.mulf %574, %557 : vector<8x128xf32>
    %576 = arith.addf %575, %569 : vector<8x128xf32>
    %577 = arith.subf %576, %573 : vector<8x128xf32>
    %cst_212 = arith.constant 1.000000e+00 : f32
    %578 = vector.broadcast %cst_212 : f32 to vector<8x128xf32>
    %579 = arith.cmpf ogt, %577, %578 : vector<8x128xf32>
    %580 = arith.extui %579 : vector<8x128xi1> to vector<8x128xi32>
    %581 = arith.sitofp %580 : vector<8x128xi32> to vector<8x128xf32>
    %582 = arith.select %13, %577, %557 : vector<8x128xi1>, vector<8x128xf32>
    %583 = arith.select %13, %581, %566 : vector<8x128xi1>, vector<8x128xf32>
    %584 = arith.truncf %583 : vector<8x128xf32> to vector<8x128xbf16>
    %c0_213 = arith.constant 0 : index
    %c0_214 = arith.constant 0 : index
    %585 = vector.load %arg3[%c0_213, %c0_214] : memref<128x128xbf16, #tpu.memory_space<vmem>>, vector<128x128xbf16>
    %cst_215 = arith.constant dense<0.000000e+00> : vector<8x128xf32>
    %586 = tpu.matmul %584, %585, %cst_215 {dimension_numbers = #tpu.dot_dimension_numbers<[1], [0], [0], [1], [0, 0, 1, 1], [], []>} : vector<8x128xbf16>, vector<128x128xbf16>, vector<8x128xf32> -> vector<8x128xf32>
    %cst_216 = arith.constant 1.000000e+00 : f32
    %587 = vector.broadcast %cst_216 : f32 to vector<8x128xf32>
    %588 = arith.cmpf ogt, %582, %587 : vector<8x128xf32>
    %589 = arith.extui %588 : vector<8x128xi1> to vector<8x128xi32>
    %590 = arith.sitofp %589 : vector<8x128xi32> to vector<8x128xf32>
    %cst_217 = arith.constant 0.899999976 : f32
    %591 = vector.broadcast %cst_217 : f32 to vector<8x128xf32>
    %592 = arith.mulf %591, %582 : vector<8x128xf32>
    %593 = arith.addf %592, %586 : vector<8x128xf32>
    %594 = arith.subf %593, %590 : vector<8x128xf32>
    %cst_218 = arith.constant 1.000000e+00 : f32
    %595 = vector.broadcast %cst_218 : f32 to vector<8x128xf32>
    %596 = arith.cmpf ogt, %594, %595 : vector<8x128xf32>
    %597 = arith.extui %596 : vector<8x128xi1> to vector<8x128xi32>
    %598 = arith.sitofp %597 : vector<8x128xi32> to vector<8x128xf32>
    %599 = arith.select %18, %594, %582 : vector<8x128xi1>, vector<8x128xf32>
    %600 = arith.select %18, %598, %583 : vector<8x128xi1>, vector<8x128xf32>
    %601 = arith.truncf %600 : vector<8x128xf32> to vector<8x128xbf16>
    %c0_219 = arith.constant 0 : index
    %c0_220 = arith.constant 0 : index
    %602 = vector.load %arg4[%c0_219, %c0_220] : memref<128x128xbf16, #tpu.memory_space<vmem>>, vector<128x128xbf16>
    %cst_221 = arith.constant dense<0.000000e+00> : vector<8x128xf32>
    %603 = tpu.matmul %601, %602, %cst_221 {dimension_numbers = #tpu.dot_dimension_numbers<[1], [0], [0], [1], [0, 0, 1, 1], [], []>} : vector<8x128xbf16>, vector<128x128xbf16>, vector<8x128xf32> -> vector<8x128xf32>
    %cst_222 = arith.constant 1.000000e+00 : f32
    %604 = vector.broadcast %cst_222 : f32 to vector<8x128xf32>
    %605 = arith.cmpf ogt, %599, %604 : vector<8x128xf32>
    %606 = arith.extui %605 : vector<8x128xi1> to vector<8x128xi32>
    %607 = arith.sitofp %606 : vector<8x128xi32> to vector<8x128xf32>
    %cst_223 = arith.constant 0.899999976 : f32
    %608 = vector.broadcast %cst_223 : f32 to vector<8x128xf32>
    %609 = arith.mulf %608, %599 : vector<8x128xf32>
    %610 = arith.addf %609, %603 : vector<8x128xf32>
    %611 = arith.subf %610, %607 : vector<8x128xf32>
    %cst_224 = arith.constant 1.000000e+00 : f32
    %612 = vector.broadcast %cst_224 : f32 to vector<8x128xf32>
    %613 = arith.cmpf ogt, %611, %612 : vector<8x128xf32>
    %614 = arith.extui %613 : vector<8x128xi1> to vector<8x128xi32>
    %615 = arith.sitofp %614 : vector<8x128xi32> to vector<8x128xf32>
    %616 = arith.select %23, %611, %599 : vector<8x128xi1>, vector<8x128xf32>
    %617 = arith.select %23, %615, %600 : vector<8x128xi1>, vector<8x128xf32>
    %618 = arith.truncf %617 : vector<8x128xf32> to vector<8x128xbf16>
    %c0_225 = arith.constant 0 : index
    %c0_226 = arith.constant 0 : index
    %619 = vector.load %arg5[%c0_225, %c0_226] : memref<128x128xbf16, #tpu.memory_space<vmem>>, vector<128x128xbf16>
    %cst_227 = arith.constant dense<0.000000e+00> : vector<8x128xf32>
    %620 = tpu.matmul %618, %619, %cst_227 {dimension_numbers = #tpu.dot_dimension_numbers<[1], [0], [0], [1], [0, 0, 1, 1], [], []>} : vector<8x128xbf16>, vector<128x128xbf16>, vector<8x128xf32> -> vector<8x128xf32>
    %cst_228 = arith.constant 1.000000e+00 : f32
    %621 = vector.broadcast %cst_228 : f32 to vector<8x128xf32>
    %622 = arith.cmpf ogt, %616, %621 : vector<8x128xf32>
    %623 = arith.extui %622 : vector<8x128xi1> to vector<8x128xi32>
    %624 = arith.sitofp %623 : vector<8x128xi32> to vector<8x128xf32>
    %cst_229 = arith.constant 0.899999976 : f32
    %625 = vector.broadcast %cst_229 : f32 to vector<8x128xf32>
    %626 = arith.mulf %625, %616 : vector<8x128xf32>
    %627 = arith.addf %626, %620 : vector<8x128xf32>
    %628 = arith.subf %627, %624 : vector<8x128xf32>
    %cst_230 = arith.constant 1.000000e+00 : f32
    %629 = vector.broadcast %cst_230 : f32 to vector<8x128xf32>
    %630 = arith.cmpf ogt, %628, %629 : vector<8x128xf32>
    %631 = arith.extui %630 : vector<8x128xi1> to vector<8x128xi32>
    %632 = arith.sitofp %631 : vector<8x128xi32> to vector<8x128xf32>
    %633 = arith.select %28, %628, %616 : vector<8x128xi1>, vector<8x128xf32>
    %634 = arith.select %28, %632, %617 : vector<8x128xi1>, vector<8x128xf32>
    %635 = arith.index_cast %c7_i32 : i32 to index
    %c0_231 = arith.constant 0 : index
    %c0_232 = arith.constant 0 : index
    %636 = vector.load %arg6[%635, %c0_231, %c0_232] : memref<8x8x128xf32, #tpu.memory_space<vmem>>, vector<1x8x128xf32>
    %637 = vector.shape_cast %636 : vector<1x8x128xf32> to vector<8x128xf32>
    %638 = vector.shape_cast %634 : vector<8x128xf32> to vector<1x8x128xf32>
    tpu.vector_store %arg6[%635, %c0_231, %c0_232], %638 {strides = array<i32>} : memref<8x8x128xf32, #tpu.memory_space<vmem>>, vector<1x8x128xf32>,
    %c8_i32 = arith.constant 8 : i32
    %c0_233 = arith.constant 0 : index
    %c0_234 = arith.constant 0 : index
    %639 = vector.load %arg8[%c0_233, %c0_234] : memref<8x128xf32, #tpu.memory_space<vmem>>, vector<8x128xf32>
    tpu.vector_store %arg8[%c0_233, %c0_234], %633 {strides = array<i32>} : memref<8x128xf32, #tpu.memory_space<vmem>>, vector<8x128xf32>,
    %c0_235 = arith.constant 0 : index
    %c0_236 = arith.constant 0 : index
    %640 = vector.load %arg9[%c0_235, %c0_236] : memref<8x128xf32, #tpu.memory_space<vmem>>, vector<8x128xf32>
    tpu.vector_store %arg9[%c0_235, %c0_236], %634 {strides = array<i32>} : memref<8x128xf32, #tpu.memory_space<vmem>>, vector<8x128xf32>,
    %c0_237 = arith.constant 0 : index
    %c0_238 = arith.constant 0 : index
    %641 = vector.load %arg7[%c0_237, %c0_238] : memref<8x128xf32, #tpu.memory_space<vmem>>, vector<8x128xf32>
    tpu.vector_store %arg7[%c0_237, %c0_238], %633 {strides = array<i32>} : memref<8x128xf32, #tpu.memory_space<vmem>>, vector<8x128xf32>,
    return
  }
  func.func @transform_0(%arg0: i32) -> (i32, i32, i32) {
    %c0_i32 = arith.constant 0 : i32
    %c0_i32_0 = arith.constant 0 : i32
    %c0_i32_1 = arith.constant 0 : i32
    return %arg0, %c0_i32, %c0_i32_0 : i32, i32, i32
  }
  func.func @transform_1(%arg0: i32) -> (i32, i32) {
    %c0_i32 = arith.constant 0 : i32
    %c0_i32_0 = arith.constant 0 : i32
    %c0_i32_1 = arith.constant 0 : i32
    return %c0_i32, %c0_i32_0 : i32, i32
  }
  func.func @transform_2(%arg0: i32) -> (i32, i32) {
    %c0_i32 = arith.constant 0 : i32
    %c0_i32_0 = arith.constant 0 : i32
    %c0_i32_1 = arith.constant 0 : i32
    return %c0_i32, %c0_i32_0 : i32, i32
  }
  func.func @transform_3(%arg0: i32) -> (i32, i32) {
    %c0_i32 = arith.constant 0 : i32
    %c0_i32_0 = arith.constant 0 : i32
    %c0_i32_1 = arith.constant 0 : i32
    return %c0_i32, %c0_i32_0 : i32, i32
  }
  func.func @transform_4(%arg0: i32) -> (i32, i32) {
    %c0_i32 = arith.constant 0 : i32
    %c0_i32_0 = arith.constant 0 : i32
    %c0_i32_1 = arith.constant 0 : i32
    return %c0_i32, %c0_i32_0 : i32, i32
  }
  func.func @transform_5(%arg0: i32) -> (i32, i32, i32) {
    %c0_i32 = arith.constant 0 : i32
    %c0_i32_0 = arith.constant 0 : i32
    %c0_i32_1 = arith.constant 0 : i32
    return %arg0, %c0_i32, %c0_i32_0 : i32, i32, i32
  }
  func.func @transform_6(%arg0: i32) -> (i32, i32) {
    %c0_i32 = arith.constant 0 : i32
    %c0_i32_0 = arith.constant 0 : i32
    %c0_i32_1 = arith.constant 0 : i32
    return %c0_i32, %c0_i32_0 : i32, i32
  }
}

</mosaic_0001>

<bundles_post_ra>
// kernel: tpu_custom_call.1
= control target key start
LH: loop header
LB: loop body
LE: loop exit
PB: predicated region body
PF: predicated region fallthrough
CT: control target
= control target key end

     0   :  { %12 = vsyncpa [#allocation5], 0  ;;  %s6312_s0 = inlined_call_operand.hbm [shape: f32[8,8,128], index: 0, kind: input, shape index: {}]   ;;  %s6313_s1 = inlined_call_operand.hbm [shape: bf16[128,128], index: 1, kind: input, shape index: {}]   ;;  %s6314_s2 = inlined_call_operand.hbm [shape: bf16[128,128], index: 2, kind: input, shape index: {}]   ;;  %s6315_s3 = inlined_call_operand.hbm [shape: bf16[128,128], index: 3, kind: input, shape index: {}]   ;;  %s6316_s4 = inlined_call_operand.hbm [shape: bf16[128,128], index: 4, kind: input, shape index: {}]   ;;  %s6317_s5 = inlined_call_operand.hbm [shape: f32[8,8,128], index: 5, kind: output, shape index: {0}]   ;;  %s6318_s6 = inlined_call_operand.hbm [shape: f32[8,128], index: 6, kind: output, shape index: {1}]  }
   0x1   :  { %13 = vsyncpa [#allocation8], 0 }
   0x2   :  { %14 = vsyncpa [#allocation11], 0 }
   0x3   :  { %15 = vsyncpa [#allocation6], 0 }
   0x4   :  { %16 = vsyncpa [#allocation15], 0  ;;  %s5588_s21 = smov [#allocation7]   ;;  %s5424_s25 = scalar_lea.hbm %s6313_s1, 1024 }
   0x5   :  { %s34_s22 = sshll.u32 %s5588_s21, 4  ;;  %p5425_p0 = scmp.ne.s32.totalorder %s6313_s1, %s5424_s25  ;;  %s35_s22 = int_to_ptr.vmem [resolvable:$true] %s34_s22 }
   0x6   :  { %p5428_p1 = scmp.lt.u32.totalorder %s5424_s25, %s6313_s1 }
   0x8   :  { %p5430_p2 = pnand %p5428_p1, %p5425_p0 }
   0xa   :  { %5433 = shalt.err (!%p5430_p2)
}
   0xb   :  { %s5434_s30 = scalar_lea.vmem %s35_s22, 1024  ;;  %p5439_p4 = scmp.lt.s32.totalorder %s35_s22, %s35_s22 }
   0xc   :  { %p5435_p3 = scmp.ne.s32.totalorder %s35_s22, %s5434_s30  ;;  %p5440_p5 = scmp.lt.s32.totalorder %s5434_s30, %s5434_s30 }
   0xe   :  { %p5441_p6 = por %p5440_p5, %p5439_p4 }
  0x10   :  { %p5442_p7 = pnand %p5441_p6, %p5435_p3 }
  0x12   :  { %5445 = shalt.err (!%p5442_p7)
}
  0x13   :  { %s5589_s7 = smov 64   ;;  %s5590_s8 = smov 4  }
  0x14   :  { %40 = dma.hbm_to_vmem [thread:$0]  %s6313_s1, 1024, %s35_s22, [#allocation8], %s5589_s7, %s5589_s7, %s5590_s8  }
  0x15   :  { %s5591_s11 = smov [#allocation10]   ;;  %s5592_s13 = smov [#allocation4]  }
  0x16   :  { %s58_s12 = sshll.u32 %s5591_s11, 4  ;;  %s22_s14 = sshll.u32 %s5592_s13, 4  ;;  %s59_s12 = int_to_ptr.vmem [resolvable:$true] %s58_s12  ;;  %s23_s14 = int_to_ptr.vmem [resolvable:$true] %s22_s14 }
  0x17   :  { %s5446_s17 = scalar_lea.hbm %s6315_s3, 1024 }
  0x18   :  { %p5447_p8 = scmp.ne.s32.totalorder %s6315_s3, %s5446_s17  ;;  %p5450_p9 = scmp.lt.u32.totalorder %s5446_s17, %s6315_s3 }
  0x1a   :  { %p5452_p10 = pnand %p5450_p9, %p5447_p8 }
  0x1c   :  { %5455 = shalt.err (!%p5452_p10)
}
  0x1d   :  { %s5456_s1 = scalar_lea.vmem %s59_s12, 1024  ;;  %p5461_p12 = scmp.lt.s32.totalorder %s59_s12, %s59_s12 }
  0x1e   :  { %p5457_p11 = scmp.ne.s32.totalorder %s59_s12, %s5456_s1  ;;  %p5462_p13 = scmp.lt.s32.totalorder %s5456_s1, %s5456_s1 }
  0x20   :  { %p5463_p0 = por %p5462_p13, %p5461_p12 }
  0x22   :  { %p5464_p1 = pnand %p5463_p0, %p5457_p11 }
  0x24   :  { %5467 = shalt.err (!%p5464_p1)
}
  0x25   :  { %64 = dma.hbm_to_vmem [thread:$0]  %s6315_s3, 1024, %s59_s12, [#allocation11], %s5589_s7, %s5589_s7, %s5590_s8  }
  0x26   :  { %s5468_s26 = scalar_lea.hbm %s6312_s0, 1024 }
  0x27   :  { %p5469_p2 = scmp.ne.s32.totalorder %s6312_s0, %s5468_s26  ;;  %p5472_p3 = scmp.lt.u32.totalorder %s5468_s26, %s6312_s0 }
  0x29   :  { %p5474_p4 = pnand %p5472_p3, %p5469_p2 }
  0x2b   :  { %5477 = shalt.err (!%p5474_p4)
}
  0x2c   :  { %s5478_s9 = scalar_lea.vmem %s23_s14, 1024  ;;  %p5483_p6 = scmp.lt.s32.totalorder %s23_s14, %s23_s14 }
  0x2d   :  { %p5479_p5 = scmp.ne.s32.totalorder %s23_s14, %s5478_s9  ;;  %p5484_p7 = scmp.lt.s32.totalorder %s5478_s9, %s5478_s9 }
  0x2f   :  { %p5485_p8 = por %p5484_p7, %p5483_p6 }
  0x31   :  { %p5486_p9 = pnand %p5485_p8, %p5479_p5 }
  0x33   :  { %5489 = shalt.err (!%p5486_p9)
}
  0x34   :  { %s5593_s3 = smov 128   ;;  %s5594_s10 = smov 8  }
  0x35   :  { %28 = dma.hbm_to_vmem [thread:$0]  %s6312_s0, 1024, %s23_s14, [#allocation5], %s5593_s3, %s5593_s3, %s5594_s10  }
  0x36   :  { %s5595_s13 = smov [#allocation9]   ;;  %s5596_s16 = smov [#allocation12]  }
  0x37   :  { %s46_s15 = sshll.u32 %s5595_s13, 4  ;;  %s70_s17 = sshll.u32 %s5596_s16, 4  ;;  %s47_s15 = int_to_ptr.vmem [resolvable:$true] %s46_s15  ;;  %s71_s17 = int_to_ptr.vmem [resolvable:$true] %s70_s17 }
  0x38   :  { %s5490_s20 = scalar_lea.hbm %s6314_s2, 1024 }
  0x39   :  { %p5491_p10 = scmp.ne.s32.totalorder %s6314_s2, %s5490_s20  ;;  %p5494_p11 = scmp.lt.u32.totalorder %s5490_s20, %s6314_s2 }
  0x3b   :  { %p5496_p12 = pnand %p5494_p11, %p5491_p10 }
  0x3d   :  { %5499 = shalt.err (!%p5496_p12)
}
  0x3e   :  { %s5500_s0 = scalar_lea.vmem %s47_s15, 1024  ;;  %p5505_p0 = scmp.lt.s32.totalorder %s47_s15, %s47_s15 }
  0x3f   :  { %p5501_p13 = scmp.ne.s32.totalorder %s47_s15, %s5500_s0  ;;  %p5506_p1 = scmp.lt.s32.totalorder %s5500_s0, %s5500_s0 }
  0x41   :  { %p5507_p2 = por %p5506_p1, %p5505_p0 }
  0x43   :  { %p5508_p3 = pnand %p5507_p2, %p5501_p13 }
  0x45   :  { %5511 = shalt.err (!%p5508_p3)
}
  0x46   :  { %52 = dma.hbm_to_vmem [thread:$0]  %s6314_s2, 1024, %s47_s15, [#allocation8], %s5589_s7, %s5589_s7, %s5590_s8  }
  0x47   :  { %s5512_s27 = scalar_lea.hbm %s6316_s4, 1024 }
  0x48   :  { %p5513_p4 = scmp.ne.s32.totalorder %s6316_s4, %s5512_s27  ;;  %p5516_p5 = scmp.lt.u32.totalorder %s5512_s27, %s6316_s4 }
  0x4a   :  { %p5518_p6 = pnand %p5516_p5, %p5513_p4 }
  0x4c   :  { %5521 = shalt.err (!%p5518_p6)
}
  0x4d   :  { %s5522_s11 = scalar_lea.vmem %s71_s17, 1024  ;;  %p5527_p8 = scmp.lt.s32.totalorder %s71_s17, %s71_s17 }
  0x4e   :  { %p5523_p7 = scmp.ne.s32.totalorder %s71_s17, %s5522_s11  ;;  %p5528_p9 = scmp.lt.s32.totalorder %s5522_s11, %s5522_s11 }
  0x50   :  { %p5529_p10 = por %p5528_p9, %p5527_p8 }
  0x52   :  { %p5530_p11 = pnand %p5529_p10, %p5523_p7 }
  0x54   :  { %5533 = shalt.err (!%p5530_p11)
}
  0x55   :  { %76 = dma.hbm_to_vmem [thread:$0]  %s6316_s4, 1024, %s71_s17, [#allocation11], %s5589_s7, %s5589_s7, %s5590_s8  }
  0x56   :  { %5578 = dma.done.wait [#allocation5], 1024  }
  0x57   :  { %5579 = vsyncadd [#allocation5], 4294966272 }
  0x58   :  { %5580 = dma.done.wait [#allocation8], 2048  }
  0x59   :  { %5581 = vsyncadd [#allocation8], 4294965248 }
  0x5a   :  { %5582 = dma.done.wait [#allocation11], 2048  }
  0x5b   :  { %5583 = vsyncadd [#allocation11], 4294965248  ;;  %v5597_v0 = vmov 0.0   ;;  %vm5598_vm0 = vmmov 0   ;;  %v5168_v1 = vld [vmem:[#allocation7] sm:$0xff]   ;;  %v5169_v2 = vld [vmem:[#allocation7 + $0x8] sm:$0xff]   ;;  %v99_v3 = vlaneseq }
  0x5c   :  { %4515 = vmatprep.subr.bf16.mxu0 %v5597_v0  ;;  %4531 = vmatprep.mubr.msk.bf16.mxu0 %vm5598_vm0, %v5597_v0  ;;  %v5170_v4 = vld [vmem:[#allocation7 + $0x10] sm:$0xff]   ;;  %v5176_v6 = vld [vmem:[#allocation9] sm:$0xff]   ;;  %v5171_v7 = vld [vmem:[#allocation7 + $0x18] sm:$0xff]   ;;  %s5599_s4 = smov [#allocation14]   ;;  %s5600_s8 = smov [#allocation13]  }
  0x5d   :  { %4535 = vmatprep.subr.bf16.mxu1 %v5597_v0  ;;  %4551 = vmatprep.mubr.msk.bf16.mxu1 %vm5598_vm0, %v5597_v0  ;;  %v5719_v5 = vand.u32 127, %v99_v3  ;;  %v5177_v8 = vld [vmem:[#allocation9 + $0x8] sm:$0xff]   ;;  %v5172_v9 = vld [vmem:[#allocation7 + $0x20] sm:$0xff]   ;;  %v5178_v11 = vld [vmem:[#allocation9 + $0x10] sm:$0xff]   ;;  %s3889_s7 = sshll.u32 %s5599_s4, 4  ;;  %s3876_s13 = sshll.u32 %s5600_s8, 4  ;;  %s3890_s7 = int_to_ptr.vmem [resolvable:$true] %s3889_s7  ;;  %s6276_s13 = int_to_ptr.vmem [resolvable:$true] %s3876_s13 }
  0x5e   :  { %4516 = vmatpush3.bf16.msra.mxu0 %v5168_v1  ;;  %4536 = vmatpush3.bf16.msra.mxu1 %v5176_v6  ;;  %v5173_v12 = vld [vmem:[#allocation7 + $0x28] sm:$0xff]   ;;  %v5179_v13 = vld [vmem:[#allocation9 + $0x18] sm:$0xff]   ;;  %v5174_v14 = vld [vmem:[#allocation7 + $0x30] sm:$0xff]   ;;  %s5534_s15 = scalar_lea.vmem %s3890_s7, 128  ;;  %p5539_p13 = scmp.lt.s32.totalorder %s3890_s7, %s3890_s7 }
  0x5f   :  { %4517 = vmatprep.subr.bf16.mxu0 %v5597_v0  ;;  %vm101_vm1 = vcmp.lt.s32.totalorder %v5719_v5, 16  ;;  %vm102_vm2 = vcmp.eq.s32.totalorder %v5719_v5, 116  ;;  %4537 = vmatprep.subr.bf16.mxu1 %v5597_v0  ;;  %v5180_v15 = vld [vmem:[#allocation9 + $0x20] sm:$0xff]   ;;  %v5175_v16 = vld [vmem:[#allocation7 + $0x38] sm:$0xff]   ;;  %v5181_v18 = vld [vmem:[#allocation9 + $0x28] sm:$0xff]   ;;  %vm104_vm5 = vcmp.ge.s32.totalorder %v5719_v5, 16  ;;  %p5535_p12 = scmp.ne.s32.totalorder %s3890_s7, %s5534_s15  ;;  %p5540_p0 = scmp.lt.s32.totalorder %s5534_s15, %s5534_s15 }
  0x60   :  { %vm5726_vm3 = vmor %vm101_vm1, %vm102_vm2  ;;  %v118_v17 = vld [vmem:[#allocation4] sm:$0xff]  ;;  %v5182_v20 = vld [vmem:[#allocation9 + $0x30] sm:$0xff]   ;;  %vm105_vm6 = vcmp.lt.s32.totalorder %v5719_v5, 48  ;;  %vm107_vm10 = vcmp.ge.s32.totalorder %v5719_v5, 48  ;;  %vm108_vm11 = vcmp.lt.s32.totalorder %v5719_v5, 80  ;;  %vm110_vm15 = vcmp.ge.s32.totalorder %v5719_v5, 80 }
  0x61   :  { %vm4224_vm4 = vmpackc.low %vm5726_vm3, %vm5726_vm3  ;;  %v4225_v19 = vpack.c.bf16 %v118_v17, %v118_v17  ;;  %v5183_v21 = vld [vmem:[#allocation9 + $0x38] sm:$0xff]   ;;  %v5184_v22 = vld [vmem:[#allocation10] sm:$0xff]   ;;  %v119_v29 = vsel %vm5726_vm3, %v118_v17, 0.0  ;;  %vm111_vm1 = vcmp.lt.s32.totalorder %v5719_v5, 112  ;;  %p5541_p1 = por %p5540_p0, %p5539_p13 }
  0x62   :  { %4518 = vmatpush3.bf16.msra.mxu0 %v5169_v2  ;;  %4538 = vmatpush3.bf16.msra.mxu1 %v5177_v8  ;;  %v5185_v23 = vld [vmem:[#allocation10 + $0x8] sm:$0xff]   ;;  %v5186_v24 = vld [vmem:[#allocation10 + $0x10] sm:$0xff]   ;;  %v5187_v25 = vld [vmem:[#allocation10 + $0x18] sm:$0xff]  }
  0x63   :  { %4519 = vmatprep.subr.bf16.mxu0 %v5597_v0  ;;  %4539 = vmatprep.subr.bf16.mxu1 %v5597_v0  ;;  %v5188_v26 = vld [vmem:[#allocation10 + $0x20] sm:$0xff]   ;;  %v5189_v27 = vld [vmem:[#allocation10 + $0x28] sm:$0xff]   ;;  %vm5761_vm8 = vmand %vm104_vm5, %vm105_vm6  ;;  %vm113_vm6 = vcmp.ge.s32.totalorder %v5719_v5, 112  ;;  %p5542_p2 = pnand %p5541_p1, %p5535_p12 }
  0x64   :  { %v5190_v37 = vld [vmem:[#allocation10 + $0x30] sm:$0xff]   ;;  %v5191_v38 = vld [vmem:[#allocation10 + $0x38] sm:$0xff]   ;;  %v5192_v39 = vld [vmem:[#allocation12] sm:$0xff]  }
  0x65   :  { %v5193_v40 = vld [vmem:[#allocation12 + $0x8] sm:$0xff]   ;;  %v5194_v41 = vld [vmem:[#allocation12 + $0x10] sm:$0xff]   ;;  %v5195_v42 = vld [vmem:[#allocation12 + $0x18] sm:$0xff]  }
  0x66   :  { %4520 = vmatpush3.bf16.msra.mxu0 %v5170_v4  ;;  %4540 = vmatpush3.bf16.msra.mxu1 %v5178_v11  ;;  %v5196_v43 = vld [vmem:[#allocation12 + $0x20] sm:$0xff]   ;;  %v5197_v44 = vld [vmem:[#allocation12 + $0x28] sm:$0xff]   ;;  %vm5783_vm13 = vmand %vm107_vm10, %vm108_vm11 }
  0x67   :  { %4521 = vmatprep.subr.bf16.mxu0 %v5597_v0  ;;  %4541 = vmatprep.subr.bf16.mxu1 %v5597_v0  ;;  %v5198_v58 = vld [vmem:[#allocation12 + $0x30] sm:$0xff]   ;;  %v5199_v59 = vld [vmem:[#allocation12 + $0x38] sm:$0xff]   ;;  %v5200_v60 = vld [vmem:[#allocation7] sm:$0xff]  }
  0x68   :  { %v5201_v61 = vld [vmem:[#allocation7 + $0x8] sm:$0xff]   ;;  %v5202_v62 = vld [vmem:[#allocation7 + $0x10] sm:$0xff]   ;;  %v5203_v63 = vld [vmem:[#allocation7 + $0x18] sm:$0xff]  }
  0x69   :  { %v5204_v1 = vld [vmem:[#allocation7 + $0x20] sm:$0xff]   ;;  %v5205_v17 = vld [vmem:[#allocation7 + $0x28] sm:$0xff]   ;;  %v5410_v10 = vld [vmem:[#allocation10 + $0x10] sm:$0xff]  }
  0x6a   :  { %4522 = vmatpush3.bf16.msra.mxu0 %v5171_v7  ;;  %4542 = vmatpush3.bf16.msra.mxu1 %v5179_v13  ;;  %v5422_v31 = vld [vmem:[#allocation12 + $0x30] sm:$0xff]  }
  0x6b   :  { %4523 = vmatprep.subr.bf16.mxu0 %v5597_v0  ;;  %4543 = vmatprep.subr.bf16.mxu1 %v5597_v0 }
  0x6e   :  { %4524 = vmatpush3.bf16.msra.mxu0 %v5172_v9  ;;  %4544 = vmatpush3.bf16.msra.mxu1 %v5180_v15 }
  0x6f   :  { %4525 = vmatprep.subr.bf16.mxu0 %v5597_v0  ;;  %4545 = vmatprep.subr.bf16.mxu1 %v5597_v0 }
  0x72   :  { %4526 = vmatpush3.bf16.msra.mxu0 %v5173_v12  ;;  %4546 = vmatpush3.bf16.msra.mxu1 %v5181_v18  ;;  %v5206_v18 = vld [vmem:[#allocation7 + $0x30] sm:$0xff]  }
  0x73   :  { %4527 = vmatprep.subr.bf16.mxu0 %v5597_v0  ;;  %4547 = vmatprep.subr.bf16.mxu1 %v5597_v0 }
  0x76   :  { %4528 = vmatpush3.bf16.msra.mxu0 %v5174_v14  ;;  %4548 = vmatpush3.bf16.msra.mxu1 %v5182_v20  ;;  %v5208_v20 = vld [vmem:[#allocation9] sm:$0xff]  }
  0x77   :  { %4529 = vmatprep.subr.bf16.mxu0 %v5597_v0  ;;  %4549 = vmatprep.subr.bf16.mxu1 %v5597_v0 }
  0x7a   :  { %4530 = vmatpush3.bf16.msra.mxu0 %v5175_v16  ;;  %4550 = vmatpush3.bf16.msra.mxu1 %v5183_v21  ;;  %v5209_v21 = vld [vmem:[#allocation9 + $0x8] sm:$0xff]  }
  0x7b   :  { %4555 = vmatprep.subr.bf16.mxu0 %v5597_v0  ;;  %4575 = vmatprep.subr.bf16.mxu1 %v5597_v0 }
  0x7d   :  { %4532 = vmatmul.mubr.msk.bf16.vlgmr.msra.gmra.mrb[0].mxu0 %vm4224_vm4, %v4225_v19  ;;  %vm5804_vm4 = vmand %vm110_vm15, %vm111_vm1  ;;  %v5207_v19 = vld [vmem:[#allocation7 + $0x38] sm:$0xff]  }
  0x7e   :  { %4571 = vmatprep.mubr.msk.bf16.mxu0 %vm5598_vm0, %v5597_v0  ;;  %4556 = vmatpush3.bf16.msra.mxu0 %v5184_v22  ;;  %v5210_v22 = vld [vmem:[#allocation9 + $0x10] sm:$0xff]  }
  0x7f   :  { %4557 = vmatprep.subr.bf16.mxu0 %v5597_v0 }
  0x82   :  { %4558 = vmatpush3.bf16.msra.mxu0 %v5185_v23  ;;  %v5211_v23 = vld [vmem:[#allocation9 + $0x18] sm:$0xff]  }
  0x83   :  { %4559 = vmatprep.subr.bf16.mxu0 %v5597_v0 }
  0x86   :  { %4560 = vmatpush3.bf16.msra.mxu0 %v5186_v24  ;;  %v5212_v24 = vld [vmem:[#allocation9 + $0x20] sm:$0xff]  }
  0x87   :  { %4561 = vmatprep.subr.bf16.mxu0 %v5597_v0 }
  0x8a   :  { %4562 = vmatpush3.bf16.msra.mxu0 %v5187_v25  ;;  %v5213_v25 = vld [vmem:[#allocation9 + $0x28] sm:$0xff]  }
  0x8b   :  { %4563 = vmatprep.subr.bf16.mxu0 %v5597_v0 }
  0x8e   :  { %4564 = vmatpush3.bf16.msra.mxu0 %v5188_v26 }
  0x8f   :  { %4565 = vmatprep.subr.bf16.mxu0 %v5597_v0 }
  0x92   :  { %4566 = vmatpush3.bf16.msra.mxu0 %v5189_v27 }
  0x93   :  { %4567 = vmatprep.subr.bf16.mxu0 %v5597_v0 }
  0x96   :  { %4568 = vmatpush3.bf16.msra.mxu0 %v5190_v37 }
  0x97   :  { %4569 = vmatprep.subr.bf16.mxu0 %v5597_v0 }
  0x9a   :  { %4570 = vmatpush3.bf16.msra.mxu0 %v5191_v38 }
  0x9b   :  { %4595 = vmatprep.subr.bf16.mxu0 %v5597_v0 }
 0x150   :  { %v219_v28 = vpop.f32.mrb[0].mxu0 }
 0x151   :  { %vm231_vm7 = vcmp.gt.f32.partialorder %v219_v28, 1.0  ;;  %v4533_v30 = vpop.f32.mrb[1].mxu0  ;;  %v234_v45 = vsel %vm5761_vm8, %v219_v28, 0.0 }
 0x152   :  { %v3913_v32 = vsel %vm231_vm7, 1.0, %v5597_v0  ;;  %v222_v33 = vpop.f32.mrb[2].mxu0  ;;  %vm341_vm9 = vcmp.gt.f32.partialorder %v234_v45, 1.0  ;;  %v344_v46 = vmul.f32 0.9, %v234_v45  ;;  %vm114_vm7 = vcmp.lt.s32.totalorder %v5719_v5, 116 }
 0x153   :  { %v4534_v34 = vpop.f32.mrb[3].mxu0  ;;  %v235_v35 = vsel %vm5761_vm8, %v3913_v32, %v119_v29  ;;  %v3922_v50 = vsel %vm341_vm9, 1.0, %v5597_v0  ;;  %vm5827_vm10 = vmand %vm113_vm6, %vm114_vm7  ;;  %v5214_v5 = vld [vmem:[#allocation9 + $0x30] sm:$0xff]  }
 0x154   :  { %v236_v36 = vpack.c.bf16 %v235_v35, %v235_v35 }
 0x156   :  { %4552 = vmatmul.mubr.bf16.vlgmr.msra.gmra.mrb[0].mxu1 %v236_v36  ;;  %v586_v36 = vld [vmem:[#allocation4 + $0x8] sm:$0xff] }
 0x157   :  { %4591 = vmatprep.mubr.msk.bf16.mxu1 %vm5598_vm0, %v5597_v0  ;;  %4576 = vmatpush3.bf16.msra.mxu1 %v5192_v39 }
 0x158   :  { %4577 = vmatprep.subr.bf16.mxu1 %v5597_v0 }
 0x15b   :  { %4578 = vmatpush3.bf16.msra.mxu1 %v5193_v40 }
 0x15c   :  { %4579 = vmatprep.subr.bf16.mxu1 %v5597_v0 }
 0x15f   :  { %4580 = vmatpush3.bf16.msra.mxu1 %v5194_v41 }
 0x160   :  { %4581 = vmatprep.subr.bf16.mxu1 %v5597_v0 }
 0x163   :  { %4582 = vmatpush3.bf16.msra.mxu1 %v5195_v42  ;;  %v5215_v42 = vld [vmem:[#allocation9 + $0x38] sm:$0xff]  }
 0x164   :  { %4583 = vmatprep.subr.bf16.mxu1 %v5597_v0 }
 0x167   :  { %4584 = vmatpush3.bf16.msra.mxu1 %v5196_v43  ;;  %v5216_v43 = vld [vmem:[#allocation10] sm:$0xff]  }
 0x168   :  { %4585 = vmatprep.subr.bf16.mxu1 %v5597_v0 }
 0x16b   :  { %4586 = vmatpush3.bf16.msra.mxu1 %v5197_v44  ;;  %v5217_v44 = vld [vmem:[#allocation10 + $0x8] sm:$0xff]  }
 0x16c   :  { %4587 = vmatprep.subr.bf16.mxu1 %v5597_v0 }
 0x16f   :  { %4588 = vmatpush3.bf16.msra.mxu1 %v5198_v58 }
 0x170   :  { %4589 = vmatprep.subr.bf16.mxu1 %v5597_v0 }
 0x173   :  { %4590 = vmatpush3.bf16.msra.mxu1 %v5199_v59 }
 0x174   :  { %4615 = vmatprep.subr.bf16.mxu1 %v5597_v0 }
 0x229   :  { %v335_v47 = vpop.f32.mrb[0].mxu1 }
 0x22a   :  { %v345_v48 = vadd.f32 %v344_v46, %v335_v47  ;;  %v4553_v49 = vpop.f32.mrb[1].mxu1  ;;  %v5219_v46 = vld [vmem:[#allocation10 + $0x18] sm:$0xff]   ;;  %v5220_v47 = vld [vmem:[#allocation10 + $0x20] sm:$0xff]  }
 0x22b   :  { %v338_v51 = vpop.f32.mrb[2].mxu1 }
 0x22c   :  { %v346_v52 = vsub.f32 %v345_v48, %v3922_v50  ;;  %v4554_v53 = vpop.f32.mrb[3].mxu1  ;;  %v5221_v48 = vld [vmem:[#allocation10 + $0x28] sm:$0xff]  }
 0x22e   :  { %vm347_vm12 = vcmp.gt.f32.partialorder %v346_v52, 1.0  ;;  %v350_v2 = vsel %vm5783_vm13, %v346_v52, %v234_v45  ;;  %v5218_v45 = vld [vmem:[#allocation10 + $0x10] sm:$0xff]  }
 0x22f   :  { %v3923_v55 = vsel %vm347_vm12, 1.0, %v5597_v0  ;;  %vm457_vm14 = vcmp.gt.f32.partialorder %v350_v2, 1.0  ;;  %v460_v3 = vmul.f32 0.9, %v350_v2 }
 0x230   :  { %v351_v56 = vsel %vm5783_vm13, %v3923_v55, %v235_v35  ;;  %v3932_v8 = vsel %vm457_vm14, 1.0, %v5597_v0 }
 0x231   :  { %v352_v57 = vpack.c.bf16 %v351_v56, %v351_v56 }
 0x233   :  { %4572 = vmatmul.mubr.bf16.vlgmr.msra.gmra.mrb[4].mxu0 %v352_v57 }
 0x234   :  { %4611 = vmatprep.mubr.msk.bf16.mxu0 %vm5598_vm0, %v5597_v0  ;;  %4596 = vmatpush3.bf16.msra.mxu0 %v5200_v60 }
 0x235   :  { %4597 = vmatprep.subr.bf16.mxu0 %v5597_v0 }
 0x238   :  { %4598 = vmatpush3.bf16.msra.mxu0 %v5201_v61 }
 0x239   :  { %4599 = vmatprep.subr.bf16.mxu0 %v5597_v0 }
 0x23c   :  { %4600 = vmatpush3.bf16.msra.mxu0 %v5202_v62  ;;  %v5222_v62 = vld [vmem:[#allocation10 + $0x30] sm:$0xff]  }
 0x23d   :  { %4601 = vmatprep.subr.bf16.mxu0 %v5597_v0 }
 0x240   :  { %4602 = vmatpush3.bf16.msra.mxu0 %v5203_v63  ;;  %v5223_v63 = vld [vmem:[#allocation10 + $0x38] sm:$0xff]  }
 0x241   :  { %4603 = vmatprep.subr.bf16.mxu0 %v5597_v0 }
 0x244   :  { %4604 = vmatpush3.bf16.msra.mxu0 %v5204_v1  ;;  %v5224_v1 = vld [vmem:[#allocation12] sm:$0xff]  }
 0x245   :  { %4605 = vmatprep.subr.bf16.mxu0 %v5597_v0 }
 0x248   :  { %4606 = vmatpush3.bf16.msra.mxu0 %v5205_v17 }
 0x249   :  { %4607 = vmatprep.subr.bf16.mxu0 %v5597_v0 }
 0x24c   :  { %4608 = vmatpush3.bf16.msra.mxu0 %v5206_v18 }
 0x24d   :  { %4609 = vmatprep.subr.bf16.mxu0 %v5597_v0 }
 0x250   :  { %4610 = vmatpush3.bf16.msra.mxu0 %v5207_v19 }
 0x251   :  { %4635 = vmatprep.subr.bf16.mxu0 %v5597_v0 }
 0x306   :  { %v451_v4 = vpop.f32.mrb[4].mxu0 }
 0x307   :  { %v461_v6 = vadd.f32 %v460_v3, %v451_v4  ;;  %v4573_v7 = vpop.f32.mrb[5].mxu0  ;;  %v5226_v3 = vld [vmem:[#allocation12 + $0x10] sm:$0xff]   ;;  %v5227_v4 = vld [vmem:[#allocation12 + $0x18] sm:$0xff]  }
 0x308   :  { %v454_v9 = vpop.f32.mrb[6].mxu0  ;;  %v5229_v7 = vld [vmem:[#allocation12 + $0x28] sm:$0xff]  }
 0x309   :  { %v462_v11 = vsub.f32 %v461_v6, %v3932_v8  ;;  %v4574_v12 = vpop.f32.mrb[7].mxu0  ;;  %v5228_v6 = vld [vmem:[#allocation12 + $0x20] sm:$0xff]  }
 0x30b   :  { %vm463_vm2 = vcmp.gt.f32.partialorder %v462_v11, 1.0  ;;  %v466_v26 = vsel %vm5804_vm4, %v462_v11, %v350_v2  ;;  %v5225_v2 = vld [vmem:[#allocation12 + $0x8] sm:$0xff]  }
 0x30c   :  { %v3933_v14 = vsel %vm463_vm2, 1.0, %v5597_v0  ;;  %vm573_vm5 = vcmp.gt.f32.partialorder %v466_v26, 1.0  ;;  %v576_v27 = vmul.f32 0.9, %v466_v26 }
 0x30d   :  { %v467_v15 = vsel %vm5804_vm4, %v3933_v14, %v351_v56  ;;  %v3942_v32 = vsel %vm573_vm5, 1.0, %v5597_v0 }
 0x30e   :  { %v468_v16 = vpack.c.bf16 %v467_v15, %v467_v15 }
 0x310   :  { %4592 = vmatmul.mubr.bf16.vlgmr.msra.gmra.mrb[4].mxu1 %v468_v16 }
 0x311   :  { %4631 = vmatprep.mubr.msk.bf16.mxu1 %vm5598_vm0, %v5597_v0  ;;  %4616 = vmatpush3.bf16.msra.mxu1 %v5208_v20 }
 0x312   :  { %4617 = vmatprep.subr.bf16.mxu1 %v5597_v0 }
 0x315   :  { %4618 = vmatpush3.bf16.msra.mxu1 %v5209_v21 }
 0x316   :  { %4619 = vmatprep.subr.bf16.mxu1 %v5597_v0 }
 0x319   :  { %4620 = vmatpush3.bf16.msra.mxu1 %v5210_v22  ;;  %v5230_v22 = vld [vmem:[#allocation12 + $0x30] sm:$0xff]  }
 0x31a   :  { %4621 = vmatprep.subr.bf16.mxu1 %v5597_v0 }
 0x31d   :  { %4622 = vmatpush3.bf16.msra.mxu1 %v5211_v23  ;;  %v5231_v23 = vld [vmem:[#allocation12 + $0x38] sm:$0xff]  }
 0x31e   :  { %4623 = vmatprep.subr.bf16.mxu1 %v5597_v0 }
 0x321   :  { %4624 = vmatpush3.bf16.msra.mxu1 %v5212_v24  ;;  %v5232_v24 = vld [vmem:[#allocation7] sm:$0xff]  }
 0x322   :  { %4625 = vmatprep.subr.bf16.mxu1 %v5597_v0 }
 0x325   :  { %4626 = vmatpush3.bf16.msra.mxu1 %v5213_v25  ;;  %v5233_v25 = vld [vmem:[#allocation7 + $0x8] sm:$0xff]  }
 0x326   :  { %4627 = vmatprep.subr.bf16.mxu1 %v5597_v0 }
 0x329   :  { %4628 = vmatpush3.bf16.msra.mxu1 %v5214_v5 }
 0x32a   :  { %4629 = vmatprep.subr.bf16.mxu1 %v5597_v0 }
 0x32d   :  { %4630 = vmatpush3.bf16.msra.mxu1 %v5215_v42  ;;  %v5237_v42 = vld [vmem:[#allocation7 + $0x28] sm:$0xff]  }
 0x32e   :  { %4655 = vmatprep.subr.bf16.mxu1 %v5597_v0 }
 0x3e3   :  { %v567_v28 = vpop.f32.mrb[4].mxu1 }
 0x3e4   :  { %v577_v29 = vadd.f32 %v576_v27, %v567_v28  ;;  %v4593_v30 = vpop.f32.mrb[5].mxu1  ;;  %v5235_v27 = vld [vmem:[#allocation7 + $0x18] sm:$0xff]   ;;  %v5236_v28 = vld [vmem:[#allocation7 + $0x20] sm:$0xff]  }
 0x3e5   :  { %v570_v33 = vpop.f32.mrb[6].mxu1 }
 0x3e6   :  { %v578_v34 = vsub.f32 %v577_v29, %v3942_v32  ;;  %v4594_v35 = vpop.f32.mrb[7].mxu1 }
 0x3e8   :  { %vm579_vm9 = vcmp.gt.f32.partialorder %v578_v34, 1.0  ;;  %v582_v49 = vsel %vm5827_vm10, %v578_v34, %v466_v26  ;;  %v5234_v26 = vld [vmem:[#allocation7 + $0x10] sm:$0xff]  }
 0x3e9   :  { %v3943_v38 = vsel %vm579_vm9, 1.0, %v5597_v0  ;;  %vm693_vm11 = vcmp.gt.f32.partialorder %v582_v49, 1.0  ;;  %v696_v50 = vmul.f32 0.9, %v582_v49 }
 0x3ea   :  { %v583_v39 = vsel %vm5827_vm10, %v3943_v38, %v467_v15  ;;  %v3952_v55 = vsel %vm693_vm11, 1.0, %v5597_v0 }
 0x3eb   :  { %584 = vst [vmem:[#allocation13] sm:$0xff] %v583_v39  ;;  %v587_v40 = vsel %vm5726_vm3, %v586_v36, %v583_v39 }
 0x3ec   :  { %v588_v41 = vpack.c.bf16 %v587_v40, %v587_v40 }
 0x3ee   :  { %4612 = vmatmul.mubr.bf16.vlgmr.msra.gmra.mrb[8].mxu0 %v588_v41 }
 0x3ef   :  { %4651 = vmatprep.mubr.msk.bf16.mxu0 %vm5598_vm0, %v5597_v0  ;;  %4636 = vmatpush3.bf16.msra.mxu0 %v5216_v43  ;;  %v5238_v43 = vld [vmem:[#allocation7 + $0x30] sm:$0xff]  }
 0x3f0   :  { %4637 = vmatprep.subr.bf16.mxu0 %v5597_v0 }
 0x3f3   :  { %4638 = vmatpush3.bf16.msra.mxu0 %v5217_v44  ;;  %v5239_v44 = vld [vmem:[#allocation7 + $0x38] sm:$0xff]  }
 0x3f4   :  { %4639 = vmatprep.subr.bf16.mxu0 %v5597_v0 }
 0x3f7   :  { %4640 = vmatpush3.bf16.msra.mxu0 %v5218_v45  ;;  %v5240_v45 = vld [vmem:[#allocation9] sm:$0xff]  }
 0x3f8   :  { %4641 = vmatprep.subr.bf16.mxu0 %v5597_v0 }
 0x3fb   :  { %4642 = vmatpush3.bf16.msra.mxu0 %v5219_v46  ;;  %v5241_v46 = vld [vmem:[#allocation9 + $0x8] sm:$0xff]  }
 0x3fc   :  { %4643 = vmatprep.subr.bf16.mxu0 %v5597_v0 }
 0x3ff   :  { %4644 = vmatpush3.bf16.msra.mxu0 %v5220_v47  ;;  %v5242_v47 = vld [vmem:[#allocation9 + $0x10] sm:$0xff]  }
 0x400   :  { %4645 = vmatprep.subr.bf16.mxu0 %v5597_v0 }
 0x403   :  { %4646 = vmatpush3.bf16.msra.mxu0 %v5221_v48  ;;  %v5243_v48 = vld [vmem:[#allocation9 + $0x18] sm:$0xff]  }
 0x404   :  { %4647 = vmatprep.subr.bf16.mxu0 %v5597_v0 }
 0x407   :  { %4648 = vmatpush3.bf16.msra.mxu0 %v5222_v62 }
 0x408   :  { %4649 = vmatprep.subr.bf16.mxu0 %v5597_v0 }
 0x40b   :  { %4650 = vmatpush3.bf16.msra.mxu0 %v5223_v63 }
 0x40c   :  { %4675 = vmatprep.subr.bf16.mxu0 %v5597_v0 }
 0x4c1   :  { %v687_v51 = vpop.f32.mrb[8].mxu0 }
 0x4c2   :  { %v697_v52 = vadd.f32 %v696_v50, %v687_v51  ;;  %v4613_v53 = vpop.f32.mrb[9].mxu0  ;;  %v5245_v50 = vld [vmem:[#allocation9 + $0x28] sm:$0xff]  }
 0x4c3   :  { %v690_v56 = vpop.f32.mrb[10].mxu0 }
 0x4c4   :  { %v698_v57 = vsub.f32 %v697_v52, %v3952_v55  ;;  %v4614_v58 = vpop.f32.mrb[11].mxu0 }
 0x4c6   :  { %vm699_vm12 = vcmp.gt.f32.partialorder %v698_v57, 1.0  ;;  %v702_v8 = vsel %vm5761_vm8, %v698_v57, %v582_v49  ;;  %v5244_v49 = vld [vmem:[#allocation9 + $0x20] sm:$0xff]  }
 0x4c7   :  { %v3953_v59 = vsel %vm699_vm12, 1.0, %v5597_v0  ;;  %vm809_vm14 = vcmp.gt.f32.partialorder %v702_v8, 1.0  ;;  %v812_v9 = vmul.f32 0.9, %v702_v8 }
 0x4c8   :  { %v703_v60 = vsel %vm5761_vm8, %v3953_v59, %v587_v40  ;;  %v3962_v15 = vsel %vm809_vm14, 1.0, %v5597_v0 }
 0x4c9   :  { %v704_v61 = vpack.c.bf16 %v703_v60, %v703_v60 }
 0x4cb   :  { %4632 = vmatmul.mubr.bf16.vlgmr.msra.gmra.mrb[8].mxu1 %v704_v61  ;;  %v1055_v61 = vld [vmem:[#allocation4 + $0x10] sm:$0xff] }
 0x4cc   :  { %4671 = vmatprep.mubr.msk.bf16.mxu1 %vm5598_vm0, %v5597_v0  ;;  %4656 = vmatpush3.bf16.msra.mxu1 %v5224_v1 }
 0x4cd   :  { %4657 = vmatprep.subr.bf16.mxu1 %v5597_v0 }
 0x4d0   :  { %4658 = vmatpush3.bf16.msra.mxu1 %v5225_v2 }
 0x4d1   :  { %4659 = vmatprep.subr.bf16.mxu1 %v5597_v0 }
 0x4d4   :  { %4660 = vmatpush3.bf16.msra.mxu1 %v5226_v3  ;;  %v5246_v3 = vld [vmem:[#allocation9 + $0x30] sm:$0xff]  }
 0x4d5   :  { %4661 = vmatprep.subr.bf16.mxu1 %v5597_v0 }
 0x4d8   :  { %4662 = vmatpush3.bf16.msra.mxu1 %v5227_v4  ;;  %v5247_v4 = vld [vmem:[#allocation9 + $0x38] sm:$0xff]  }
 0x4d9   :  { %4663 = vmatprep.subr.bf16.mxu1 %v5597_v0 }
 0x4dc   :  { %4664 = vmatpush3.bf16.msra.mxu1 %v5228_v6  ;;  %v5248_v6 = vld [vmem:[#allocation10] sm:$0xff]  }
 0x4dd   :  { %4665 = vmatprep.subr.bf16.mxu1 %v5597_v0 }
 0x4e0   :  { %4666 = vmatpush3.bf16.msra.mxu1 %v5229_v7  ;;  %v5249_v7 = vld [vmem:[#allocation10 + $0x8] sm:$0xff]  }
 0x4e1   :  { %4667 = vmatprep.subr.bf16.mxu1 %v5597_v0 }
 0x4e4   :  { %4668 = vmatpush3.bf16.msra.mxu1 %v5230_v22 }
 0x4e5   :  { %4669 = vmatprep.subr.bf16.mxu1 %v5597_v0 }
 0x4e8   :  { %4670 = vmatpush3.bf16.msra.mxu1 %v5231_v23 }
 0x4e9   :  { %4695 = vmatprep.subr.bf16.mxu1 %v5597_v0 }
 0x59e   :  { %v803_v11 = vpop.f32.mrb[8].mxu1 }
 0x59f   :  { %v813_v12 = vadd.f32 %v812_v9, %v803_v11  ;;  %v4633_v14 = vpop.f32.mrb[9].mxu1  ;;  %v5251_v9 = vld [vmem:[#allocation10 + $0x18] sm:$0xff]   ;;  %v5252_v11 = vld [vmem:[#allocation10 + $0x20] sm:$0xff]  }
 0x5a0   :  { %v806_v16 = vpop.f32.mrb[10].mxu1 }
 0x5a1   :  { %v814_v17 = vsub.f32 %v813_v12, %v3962_v15  ;;  %v4634_v18 = vpop.f32.mrb[11].mxu1  ;;  %v5253_v12 = vld [vmem:[#allocation10 + $0x28] sm:$0xff]  }
 0x5a3   :  { %vm815_vm15 = vcmp.gt.f32.partialorder %v814_v17, 1.0  ;;  %v818_v29 = vsel %vm5783_vm13, %v814_v17, %v702_v8  ;;  %v5250_v8 = vld [vmem:[#allocation10 + $0x10] sm:$0xff]  }
 0x5a4   :  { %v3963_v19 = vsel %vm815_vm15, 1.0, %v5597_v0  ;;  %vm925_vm1 = vcmp.gt.f32.partialorder %v818_v29, 1.0  ;;  %v928_v30 = vmul.f32 0.9, %v818_v29 }
 0x5a5   :  { %v819_v20 = vsel %vm5783_vm13, %v3963_v19, %v703_v60  ;;  %v3972_v35 = vsel %vm925_vm1, 1.0, %v5597_v0 }
 0x5a6   :  { %v820_v21 = vpack.c.bf16 %v819_v20, %v819_v20 }
 0x5a8   :  { %4652 = vmatmul.mubr.bf16.vlgmr.msra.gmra.mrb[12].mxu0 %v820_v21 }
 0x5a9   :  { %4691 = vmatprep.mubr.msk.bf16.mxu0 %vm5598_vm0, %v5597_v0  ;;  %4676 = vmatpush3.bf16.msra.mxu0 %v5232_v24 }
 0x5aa   :  { %4677 = vmatprep.subr.bf16.mxu0 %v5597_v0 }
 0x5ad   :  { %4678 = vmatpush3.bf16.msra.mxu0 %v5233_v25 }
 0x5ae   :  { %4679 = vmatprep.subr.bf16.mxu0 %v5597_v0 }
 0x5b1   :  { %4680 = vmatpush3.bf16.msra.mxu0 %v5234_v26  ;;  %v5254_v26 = vld [vmem:[#allocation10 + $0x30] sm:$0xff]  }
 0x5b2   :  { %4681 = vmatprep.subr.bf16.mxu0 %v5597_v0 }
 0x5b5   :  { %4682 = vmatpush3.bf16.msra.mxu0 %v5235_v27  ;;  %v5255_v27 = vld [vmem:[#allocation10 + $0x38] sm:$0xff]  }
 0x5b6   :  { %4683 = vmatprep.subr.bf16.mxu0 %v5597_v0 }
 0x5b9   :  { %4684 = vmatpush3.bf16.msra.mxu0 %v5236_v28  ;;  %v5256_v28 = vld [vmem:[#allocation12] sm:$0xff]  }
 0x5ba   :  { %4685 = vmatprep.subr.bf16.mxu0 %v5597_v0 }
 0x5bd   :  { %4686 = vmatpush3.bf16.msra.mxu0 %v5237_v42 }
 0x5be   :  { %4687 = vmatprep.subr.bf16.mxu0 %v5597_v0 }
 0x5c1   :  { %4688 = vmatpush3.bf16.msra.mxu0 %v5238_v43 }
 0x5c2   :  { %4689 = vmatprep.subr.bf16.mxu0 %v5597_v0 }
 0x5c5   :  { %4690 = vmatpush3.bf16.msra.mxu0 %v5239_v44 }
 0x5c6   :  { %4715 = vmatprep.subr.bf16.mxu0 %v5597_v0 }
 0x67b   :  { %v919_v32 = vpop.f32.mrb[12].mxu0 }
 0x67c   :  { %v929_v33 = vadd.f32 %v928_v30, %v919_v32  ;;  %v4653_v34 = vpop.f32.mrb[13].mxu0  ;;  %v5258_v30 = vld [vmem:[#allocation12 + $0x10] sm:$0xff]   ;;  %v5259_v32 = vld [vmem:[#allocation12 + $0x18] sm:$0xff]  }
 0x67d   :  { %v922_v36 = vpop.f32.mrb[14].mxu0  ;;  %v5261_v34 = vld [vmem:[#allocation12 + $0x28] sm:$0xff]  }
 0x67e   :  { %v930_v38 = vsub.f32 %v929_v33, %v3972_v35  ;;  %v4654_v39 = vpop.f32.mrb[15].mxu0  ;;  %v5260_v33 = vld [vmem:[#allocation12 + $0x20] sm:$0xff]  }
 0x680   :  { %vm931_vm2 = vcmp.gt.f32.partialorder %v930_v38, 1.0  ;;  %v934_v51 = vsel %vm5804_vm4, %v930_v38, %v818_v29  ;;  %v5257_v29 = vld [vmem:[#allocation12 + $0x8] sm:$0xff]  }
 0x681   :  { %v3973_v40 = vsel %vm931_vm2, 1.0, %v5597_v0  ;;  %vm1041_vm5 = vcmp.gt.f32.partialorder %v934_v51, 1.0  ;;  %v1044_v52 = vmul.f32 0.9, %v934_v51 }
 0x682   :  { %v935_v41 = vsel %vm5804_vm4, %v3973_v40, %v819_v20  ;;  %v3982_v57 = vsel %vm1041_vm5, 1.0, %v5597_v0 }
 0x683   :  { %v936_v5 = vpack.c.bf16 %v935_v41, %v935_v41 }
 0x685   :  { %4672 = vmatmul.mubr.bf16.vlgmr.msra.gmra.mrb[12].mxu1 %v936_v5 }
 0x686   :  { %4711 = vmatprep.mubr.msk.bf16.mxu1 %vm5598_vm0, %v5597_v0  ;;  %4696 = vmatpush3.bf16.msra.mxu1 %v5240_v45 }
 0x687   :  { %4697 = vmatprep.subr.bf16.mxu1 %v5597_v0 }
 0x68a   :  { %4698 = vmatpush3.bf16.msra.mxu1 %v5241_v46 }
 0x68b   :  { %4699 = vmatprep.subr.bf16.mxu1 %v5597_v0 }
 0x68e   :  { %4700 = vmatpush3.bf16.msra.mxu1 %v5242_v47  ;;  %v5262_v47 = vld [vmem:[#allocation12 + $0x30] sm:$0xff]  }
 0x68f   :  { %4701 = vmatprep.subr.bf16.mxu1 %v5597_v0 }
 0x692   :  { %4702 = vmatpush3.bf16.msra.mxu1 %v5243_v48  ;;  %v5263_v48 = vld [vmem:[#allocation12 + $0x38] sm:$0xff]  }
 0x693   :  { %4703 = vmatprep.subr.bf16.mxu1 %v5597_v0 }
 0x696   :  { %4704 = vmatpush3.bf16.msra.mxu1 %v5244_v49  ;;  %v5264_v49 = vld [vmem:[#allocation7] sm:$0xff]  }
 0x697   :  { %4705 = vmatprep.subr.bf16.mxu1 %v5597_v0 }
 0x69a   :  { %4706 = vmatpush3.bf16.msra.mxu1 %v5245_v50  ;;  %v5265_v50 = vld [vmem:[#allocation7 + $0x8] sm:$0xff]  }
 0x69b   :  { %4707 = vmatprep.subr.bf16.mxu1 %v5597_v0 }
 0x69e   :  { %4708 = vmatpush3.bf16.msra.mxu1 %v5246_v3 }
 0x69f   :  { %4709 = vmatprep.subr.bf16.mxu1 %v5597_v0 }
 0x6a2   :  { %4710 = vmatpush3.bf16.msra.mxu1 %v5247_v4  ;;  %v5269_v4 = vld [vmem:[#allocation7 + $0x28] sm:$0xff]  }
 0x6a3   :  { %4735 = vmatprep.subr.bf16.mxu1 %v5597_v0 }
 0x758   :  { %v1035_v53 = vpop.f32.mrb[12].mxu1 }
 0x759   :  { %v1045_v55 = vadd.f32 %v1044_v52, %v1035_v53  ;;  %v4673_v56 = vpop.f32.mrb[13].mxu1  ;;  %v5267_v52 = vld [vmem:[#allocation7 + $0x18] sm:$0xff]   ;;  %v5268_v53 = vld [vmem:[#allocation7 + $0x20] sm:$0xff]  }
 0x75a   :  { %v1038_v58 = vpop.f32.mrb[14].mxu1 }
 0x75b   :  { %v1046_v59 = vsub.f32 %v1045_v55, %v3982_v57  ;;  %v4674_v60 = vpop.f32.mrb[15].mxu1 }
 0x75d   :  { %vm1047_vm6 = vcmp.gt.f32.partialorder %v1046_v59, 1.0  ;;  %v1050_v14 = vsel %vm5827_vm10, %v1046_v59, %v934_v51  ;;  %v5266_v51 = vld [vmem:[#allocation7 + $0x10] sm:$0xff]  }
 0x75e   :  { %v3983_v62 = vsel %vm1047_vm6, 1.0, %v5597_v0  ;;  %vm1162_vm7 = vcmp.gt.f32.partialorder %v1050_v14, 1.0  ;;  %v1165_v15 = vmul.f32 0.9, %v1050_v14 }
 0x75f   :  { %v1051_v63 = vsel %vm5827_vm10, %v3983_v62, %v935_v41  ;;  %v3992_v19 = vsel %vm1162_vm7, 1.0, %v5597_v0 }
 0x760   :  { %1053 = vst [vmem:[#allocation13 + $0x8] sm:$0xff] %v1051_v63  ;;  %v1056_v1 = vsel %vm5726_vm3, %v1055_v61, %v1051_v63 }
 0x761   :  { %v1057_v2 = vpack.c.bf16 %v1056_v1, %v1056_v1 }
 0x763   :  { %4692 = vmatmul.mubr.bf16.vlgmr.msra.gmra.mrb[16].mxu0 %v1057_v2 }
 0x764   :  { %4731 = vmatprep.mubr.msk.bf16.mxu0 %vm5598_vm0, %v5597_v0  ;;  %4716 = vmatpush3.bf16.msra.mxu0 %v5248_v6  ;;  %v5270_v6 = vld [vmem:[#allocation7 + $0x30] sm:$0xff]  }
 0x765   :  { %4717 = vmatprep.subr.bf16.mxu0 %v5597_v0 }
 0x768   :  { %4718 = vmatpush3.bf16.msra.mxu0 %v5249_v7  ;;  %v5271_v7 = vld [vmem:[#allocation7 + $0x38] sm:$0xff]  }
 0x769   :  { %4719 = vmatprep.subr.bf16.mxu0 %v5597_v0 }
 0x76c   :  { %4720 = vmatpush3.bf16.msra.mxu0 %v5250_v8  ;;  %v5272_v8 = vld [vmem:[#allocation9] sm:$0xff]  }
 0x76d   :  { %4721 = vmatprep.subr.bf16.mxu0 %v5597_v0 }
 0x770   :  { %4722 = vmatpush3.bf16.msra.mxu0 %v5251_v9  ;;  %v5273_v9 = vld [vmem:[#allocation9 + $0x8] sm:$0xff]  }
 0x771   :  { %4723 = vmatprep.subr.bf16.mxu0 %v5597_v0 }
 0x774   :  { %4724 = vmatpush3.bf16.msra.mxu0 %v5252_v11  ;;  %v5274_v11 = vld [vmem:[#allocation9 + $0x10] sm:$0xff]  }
 0x775   :  { %4725 = vmatprep.subr.bf16.mxu0 %v5597_v0 }
 0x778   :  { %4726 = vmatpush3.bf16.msra.mxu0 %v5253_v12  ;;  %v5275_v12 = vld [vmem:[#allocation9 + $0x18] sm:$0xff]  }
 0x779   :  { %4727 = vmatprep.subr.bf16.mxu0 %v5597_v0 }
 0x77c   :  { %4728 = vmatpush3.bf16.msra.mxu0 %v5254_v26 }
 0x77d   :  { %4729 = vmatprep.subr.bf16.mxu0 %v5597_v0 }
 0x780   :  { %4730 = vmatpush3.bf16.msra.mxu0 %v5255_v27 }
 0x781   :  { %4755 = vmatprep.subr.bf16.mxu0 %v5597_v0 }
 0x836   :  { %v1156_v16 = vpop.f32.mrb[16].mxu0 }
 0x837   :  { %v1166_v17 = vadd.f32 %v1165_v15, %v1156_v16  ;;  %v4693_v18 = vpop.f32.mrb[17].mxu0  ;;  %v5277_v15 = vld [vmem:[#allocation9 + $0x28] sm:$0xff]  }
 0x838   :  { %v1159_v20 = vpop.f32.mrb[18].mxu0 }
 0x839   :  { %v1167_v21 = vsub.f32 %v1166_v17, %v3992_v19  ;;  %v4694_v22 = vpop.f32.mrb[19].mxu0 }
 0x83b   :  { %vm1168_vm9 = vcmp.gt.f32.partialorder %v1167_v21, 1.0  ;;  %v1171_v35 = vsel %vm5761_vm8, %v1167_v21, %v1050_v14  ;;  %v5276_v14 = vld [vmem:[#allocation9 + $0x20] sm:$0xff]  }
 0x83c   :  { %v3993_v23 = vsel %vm1168_vm9, 1.0, %v5597_v0  ;;  %vm1278_vm11 = vcmp.gt.f32.partialorder %v1171_v35, 1.0  ;;  %v1281_v36 = vmul.f32 0.9, %v1171_v35 }
 0x83d   :  { %v1172_v24 = vsel %vm5761_vm8, %v3993_v23, %v1056_v1  ;;  %v4002_v41 = vsel %vm1278_vm11, 1.0, %v5597_v0 }
 0x83e   :  { %v1173_v25 = vpack.c.bf16 %v1172_v24, %v1172_v24 }
 0x840   :  { %4712 = vmatmul.mubr.bf16.vlgmr.msra.gmra.mrb[16].mxu1 %v1173_v25  ;;  %v1524_v25 = vld [vmem:[#allocation4 + $0x18] sm:$0xff] }
 0x841   :  { %4751 = vmatprep.mubr.msk.bf16.mxu1 %vm5598_vm0, %v5597_v0  ;;  %4736 = vmatpush3.bf16.msra.mxu1 %v5256_v28 }
 0x842   :  { %4737 = vmatprep.subr.bf16.mxu1 %v5597_v0 }
 0x845   :  { %4738 = vmatpush3.bf16.msra.mxu1 %v5257_v29 }
 0x846   :  { %4739 = vmatprep.subr.bf16.mxu1 %v5597_v0 }
 0x849   :  { %4740 = vmatpush3.bf16.msra.mxu1 %v5258_v30  ;;  %v5278_v30 = vld [vmem:[#allocation9 + $0x30] sm:$0xff]  }
 0x84a   :  { %4741 = vmatprep.subr.bf16.mxu1 %v5597_v0 }
 0x84d   :  { %4742 = vmatpush3.bf16.msra.mxu1 %v5259_v32  ;;  %v5279_v32 = vld [vmem:[#allocation9 + $0x38] sm:$0xff]  }
 0x84e   :  { %4743 = vmatprep.subr.bf16.mxu1 %v5597_v0 }
 0x851   :  { %4744 = vmatpush3.bf16.msra.mxu1 %v5260_v33  ;;  %v5280_v33 = vld [vmem:[#allocation10] sm:$0xff]  }
 0x852   :  { %4745 = vmatprep.subr.bf16.mxu1 %v5597_v0 }
 0x855   :  { %4746 = vmatpush3.bf16.msra.mxu1 %v5261_v34  ;;  %v5281_v34 = vld [vmem:[#allocation10 + $0x8] sm:$0xff]  }
 0x856   :  { %4747 = vmatprep.subr.bf16.mxu1 %v5597_v0 }
 0x859   :  { %4748 = vmatpush3.bf16.msra.mxu1 %v5262_v47 }
 0x85a   :  { %4749 = vmatprep.subr.bf16.mxu1 %v5597_v0 }
 0x85d   :  { %4750 = vmatpush3.bf16.msra.mxu1 %v5263_v48 }
 0x85e   :  { %4775 = vmatprep.subr.bf16.mxu1 %v5597_v0 }
 0x913   :  { %v1272_v38 = vpop.f32.mrb[16].mxu1 }
 0x914   :  { %v1282_v39 = vadd.f32 %v1281_v36, %v1272_v38  ;;  %v4713_v40 = vpop.f32.mrb[17].mxu1  ;;  %v5283_v36 = vld [vmem:[#allocation10 + $0x18] sm:$0xff]   ;;  %v5284_v38 = vld [vmem:[#allocation10 + $0x20] sm:$0xff]  }
 0x915   :  { %v1275_v5 = vpop.f32.mrb[18].mxu1 }
 0x916   :  { %v1283_v42 = vsub.f32 %v1282_v39, %v4002_v41  ;;  %v4714_v43 = vpop.f32.mrb[19].mxu1  ;;  %v5285_v39 = vld [vmem:[#allocation10 + $0x28] sm:$0xff]  }
 0x918   :  { %vm1284_vm12 = vcmp.gt.f32.partialorder %v1283_v42, 1.0  ;;  %v1287_v55 = vsel %vm5783_vm13, %v1283_v42, %v1171_v35  ;;  %v5282_v35 = vld [vmem:[#allocation10 + $0x10] sm:$0xff]  }
 0x919   :  { %v4003_v44 = vsel %vm1284_vm12, 1.0, %v5597_v0  ;;  %vm1394_vm14 = vcmp.gt.f32.partialorder %v1287_v55, 1.0  ;;  %v1397_v56 = vmul.f32 0.9, %v1287_v55 }
 0x91a   :  { %v1288_v45 = vsel %vm5783_vm13, %v4003_v44, %v1172_v24  ;;  %v4012_v60 = vsel %vm1394_vm14, 1.0, %v5597_v0 }
 0x91b   :  { %v1289_v46 = vpack.c.bf16 %v1288_v45, %v1288_v45 }
 0x91d   :  { %4732 = vmatmul.mubr.bf16.vlgmr.msra.gmra.mrb[20].mxu0 %v1289_v46 }
 0x91e   :  { %4771 = vmatprep.mubr.msk.bf16.mxu0 %vm5598_vm0, %v5597_v0  ;;  %4756 = vmatpush3.bf16.msra.mxu0 %v5264_v49 }
 0x91f   :  { %4757 = vmatprep.subr.bf16.mxu0 %v5597_v0 }
 0x922   :  { %4758 = vmatpush3.bf16.msra.mxu0 %v5265_v50 }
 0x923   :  { %4759 = vmatprep.subr.bf16.mxu0 %v5597_v0 }
 0x926   :  { %4760 = vmatpush3.bf16.msra.mxu0 %v5266_v51  ;;  %v5286_v51 = vld [vmem:[#allocation10 + $0x30] sm:$0xff]  }
 0x927   :  { %4761 = vmatprep.subr.bf16.mxu0 %v5597_v0 }
 0x92a   :  { %4762 = vmatpush3.bf16.msra.mxu0 %v5267_v52  ;;  %v5287_v52 = vld [vmem:[#allocation10 + $0x38] sm:$0xff]  }
 0x92b   :  { %4763 = vmatprep.subr.bf16.mxu0 %v5597_v0 }
 0x92e   :  { %4764 = vmatpush3.bf16.msra.mxu0 %v5268_v53  ;;  %v5288_v53 = vld [vmem:[#allocation12] sm:$0xff]  }
 0x92f   :  { %4765 = vmatprep.subr.bf16.mxu0 %v5597_v0 }
 0x932   :  { %4766 = vmatpush3.bf16.msra.mxu0 %v5269_v4 }
 0x933   :  { %4767 = vmatprep.subr.bf16.mxu0 %v5597_v0 }
 0x936   :  { %4768 = vmatpush3.bf16.msra.mxu0 %v5270_v6 }
 0x937   :  { %4769 = vmatprep.subr.bf16.mxu0 %v5597_v0 }
 0x93a   :  { %4770 = vmatpush3.bf16.msra.mxu0 %v5271_v7 }
 0x93b   :  { %4795 = vmatprep.subr.bf16.mxu0 %v5597_v0 }
 0x9f0   :  { %v1388_v57 = vpop.f32.mrb[20].mxu0 }
 0x9f1   :  { %v1398_v58 = vadd.f32 %v1397_v56, %v1388_v57  ;;  %v4733_v59 = vpop.f32.mrb[21].mxu0  ;;  %v5290_v56 = vld [vmem:[#allocation12 + $0x10] sm:$0xff]   ;;  %v5291_v57 = vld [vmem:[#allocation12 + $0x18] sm:$0xff]  }
 0x9f2   :  { %v1391_v61 = vpop.f32.mrb[22].mxu0  ;;  %v5293_v59 = vld [vmem:[#allocation12 + $0x28] sm:$0xff]  }
 0x9f3   :  { %v1399_v62 = vsub.f32 %v1398_v58, %v4012_v60  ;;  %v4734_v63 = vpop.f32.mrb[23].mxu0  ;;  %v5292_v58 = vld [vmem:[#allocation12 + $0x20] sm:$0xff]  }
 0x9f5   :  { %vm1400_vm15 = vcmp.gt.f32.partialorder %v1399_v62, 1.0  ;;  %v1403_v16 = vsel %vm5804_vm4, %v1399_v62, %v1287_v55  ;;  %v5289_v55 = vld [vmem:[#allocation12 + $0x8] sm:$0xff]  }
 0x9f6   :  { %v4013_v1 = vsel %vm1400_vm15, 1.0, %v5597_v0  ;;  %vm1510_vm1 = vcmp.gt.f32.partialorder %v1403_v16, 1.0  ;;  %v1513_v17 = vmul.f32 0.9, %v1403_v16 }
 0x9f7   :  { %v1404_v2 = vsel %vm5804_vm4, %v4013_v1, %v1288_v45  ;;  %v4022_v21 = vsel %vm1510_vm1, 1.0, %v5597_v0 }
 0x9f8   :  { %v1405_v3 = vpack.c.bf16 %v1404_v2, %v1404_v2 }
 0x9fa   :  { %4752 = vmatmul.mubr.bf16.vlgmr.msra.gmra.mrb[20].mxu1 %v1405_v3 }
 0x9fb   :  { %4791 = vmatprep.mubr.msk.bf16.mxu1 %vm5598_vm0, %v5597_v0  ;;  %4776 = vmatpush3.bf16.msra.mxu1 %v5272_v8 }
 0x9fc   :  { %4777 = vmatprep.subr.bf16.mxu1 %v5597_v0 }
 0x9ff   :  { %4778 = vmatpush3.bf16.msra.mxu1 %v5273_v9 }
 0xa00   :  { %4779 = vmatprep.subr.bf16.mxu1 %v5597_v0 }
 0xa03   :  { %4780 = vmatpush3.bf16.msra.mxu1 %v5274_v11  ;;  %v5294_v11 = vld [vmem:[#allocation12 + $0x30] sm:$0xff]  }
 0xa04   :  { %4781 = vmatprep.subr.bf16.mxu1 %v5597_v0 }
 0xa07   :  { %4782 = vmatpush3.bf16.msra.mxu1 %v5275_v12  ;;  %v5295_v12 = vld [vmem:[#allocation12 + $0x38] sm:$0xff]  }
 0xa08   :  { %4783 = vmatprep.subr.bf16.mxu1 %v5597_v0 }
 0xa0b   :  { %4784 = vmatpush3.bf16.msra.mxu1 %v5276_v14  ;;  %v5296_v14 = vld [vmem:[#allocation7] sm:$0xff]  }
 0xa0c   :  { %4785 = vmatprep.subr.bf16.mxu1 %v5597_v0 }
 0xa0f   :  { %4786 = vmatpush3.bf16.msra.mxu1 %v5277_v15  ;;  %v5297_v15 = vld [vmem:[#allocation7 + $0x8] sm:$0xff]  }
 0xa10   :  { %4787 = vmatprep.subr.bf16.mxu1 %v5597_v0 }
 0xa13   :  { %4788 = vmatpush3.bf16.msra.mxu1 %v5278_v30 }
 0xa14   :  { %4789 = vmatprep.subr.bf16.mxu1 %v5597_v0 }
 0xa17   :  { %4790 = vmatpush3.bf16.msra.mxu1 %v5279_v32  ;;  %v5301_v32 = vld [vmem:[#allocation7 + $0x28] sm:$0xff]  }
 0xa18   :  { %4815 = vmatprep.subr.bf16.mxu1 %v5597_v0 }
 0xacd   :  { %v1504_v18 = vpop.f32.mrb[20].mxu1 }
 0xace   :  { %v1514_v19 = vadd.f32 %v1513_v17, %v1504_v18  ;;  %v4753_v20 = vpop.f32.mrb[21].mxu1  ;;  %v5299_v17 = vld [vmem:[#allocation7 + $0x18] sm:$0xff]   ;;  %v5300_v18 = vld [vmem:[#allocation7 + $0x20] sm:$0xff]  }
 0xacf   :  { %v1507_v22 = vpop.f32.mrb[22].mxu1 }
 0xad0   :  { %v1515_v23 = vsub.f32 %v1514_v19, %v4022_v21  ;;  %v4754_v24 = vpop.f32.mrb[23].mxu1 }
 0xad2   :  { %vm1516_vm2 = vcmp.gt.f32.partialorder %v1515_v23, 1.0  ;;  %v1519_v40 = vsel %vm5827_vm10, %v1515_v23, %v1403_v16  ;;  %v5298_v16 = vld [vmem:[#allocation7 + $0x10] sm:$0xff]  }
 0xad3   :  { %v4023_v26 = vsel %vm1516_vm2, 1.0, %v5597_v0  ;;  %vm1631_vm5 = vcmp.gt.f32.partialorder %v1519_v40, 1.0  ;;  %v1634_v41 = vmul.f32 0.9, %v1519_v40 }
 0xad4   :  { %v1520_v27 = vsel %vm5827_vm10, %v4023_v26, %v1404_v2  ;;  %v4032_v44 = vsel %vm1631_vm5, 1.0, %v5597_v0 }
 0xad5   :  { %1522 = vst [vmem:[#allocation13 + $0x10] sm:$0xff] %v1520_v27  ;;  %v1525_v28 = vsel %vm5726_vm3, %v1524_v25, %v1520_v27 }
 0xad6   :  { %v1526_v29 = vpack.c.bf16 %v1525_v28, %v1525_v28 }
 0xad8   :  { %4772 = vmatmul.mubr.bf16.vlgmr.msra.gmra.mrb[24].mxu0 %v1526_v29 }
 0xad9   :  { %4811 = vmatprep.mubr.msk.bf16.mxu0 %vm5598_vm0, %v5597_v0  ;;  %4796 = vmatpush3.bf16.msra.mxu0 %v5280_v33  ;;  %v5302_v33 = vld [vmem:[#allocation7 + $0x30] sm:$0xff]  }
 0xada   :  { %4797 = vmatprep.subr.bf16.mxu0 %v5597_v0 }
 0xadd   :  { %4798 = vmatpush3.bf16.msra.mxu0 %v5281_v34  ;;  %v5303_v34 = vld [vmem:[#allocation7 + $0x38] sm:$0xff]  }
 0xade   :  { %4799 = vmatprep.subr.bf16.mxu0 %v5597_v0 }
 0xae1   :  { %4800 = vmatpush3.bf16.msra.mxu0 %v5282_v35  ;;  %v5304_v35 = vld [vmem:[#allocation9] sm:$0xff]  }
 0xae2   :  { %4801 = vmatprep.subr.bf16.mxu0 %v5597_v0 }
 0xae5   :  { %4802 = vmatpush3.bf16.msra.mxu0 %v5283_v36  ;;  %v5305_v36 = vld [vmem:[#allocation9 + $0x8] sm:$0xff]  }
 0xae6   :  { %4803 = vmatprep.subr.bf16.mxu0 %v5597_v0 }
 0xae9   :  { %4804 = vmatpush3.bf16.msra.mxu0 %v5284_v38  ;;  %v5306_v38 = vld [vmem:[#allocation9 + $0x10] sm:$0xff]  }
 0xaea   :  { %4805 = vmatprep.subr.bf16.mxu0 %v5597_v0 }
 0xaed   :  { %4806 = vmatpush3.bf16.msra.mxu0 %v5285_v39  ;;  %v5307_v39 = vld [vmem:[#allocation9 + $0x18] sm:$0xff]  }
 0xaee   :  { %4807 = vmatprep.subr.bf16.mxu0 %v5597_v0 }
 0xaf1   :  { %4808 = vmatpush3.bf16.msra.mxu0 %v5286_v51 }
 0xaf2   :  { %4809 = vmatprep.subr.bf16.mxu0 %v5597_v0 }
 0xaf5   :  { %4810 = vmatpush3.bf16.msra.mxu0 %v5287_v52 }
 0xaf6   :  { %4835 = vmatprep.subr.bf16.mxu0 %v5597_v0 }
 0xbab   :  { %v1625_v5 = vpop.f32.mrb[24].mxu0 }
 0xbac   :  { %v1635_v42 = vadd.f32 %v1634_v41, %v1625_v5  ;;  %v4773_v43 = vpop.f32.mrb[25].mxu0  ;;  %v5309_v41 = vld [vmem:[#allocation9 + $0x28] sm:$0xff]  }
 0xbad   :  { %v1628_v45 = vpop.f32.mrb[26].mxu0 }
 0xbae   :  { %v1636_v46 = vsub.f32 %v1635_v42, %v4032_v44  ;;  %v4774_v47 = vpop.f32.mrb[27].mxu0 }
 0xbb0   :  { %vm1637_vm6 = vcmp.gt.f32.partialorder %v1636_v46, 1.0  ;;  %v1640_v60 = vsel %vm5761_vm8, %v1636_v46, %v1519_v40  ;;  %v5308_v40 = vld [vmem:[#allocation9 + $0x20] sm:$0xff]  }
 0xbb1   :  { %v4033_v48 = vsel %vm1637_vm6, 1.0, %v5597_v0  ;;  %vm1747_vm7 = vcmp.gt.f32.partialorder %v1640_v60, 1.0  ;;  %v1750_v61 = vmul.f32 0.9, %v1640_v60 }
 0xbb2   :  { %v1641_v49 = vsel %vm5761_vm8, %v4033_v48, %v1525_v28  ;;  %v4042_v2 = vsel %vm1747_vm7, 1.0, %v5597_v0 }
 0xbb3   :  { %v1642_v50 = vpack.c.bf16 %v1641_v49, %v1641_v49 }
 0xbb5   :  { %4792 = vmatmul.mubr.bf16.vlgmr.msra.gmra.mrb[24].mxu1 %v1642_v50  ;;  %v1993_v50 = vld [vmem:[#allocation4 + $0x20] sm:$0xff] }
 0xbb6   :  { %4831 = vmatprep.mubr.msk.bf16.mxu1 %vm5598_vm0, %v5597_v0  ;;  %4816 = vmatpush3.bf16.msra.mxu1 %v5288_v53 }
 0xbb7   :  { %4817 = vmatprep.subr.bf16.mxu1 %v5597_v0 }
 0xbba   :  { %4818 = vmatpush3.bf16.msra.mxu1 %v5289_v55 }
 0xbbb   :  { %4819 = vmatprep.subr.bf16.mxu1 %v5597_v0 }
 0xbbe   :  { %4820 = vmatpush3.bf16.msra.mxu1 %v5290_v56  ;;  %v5310_v56 = vld [vmem:[#allocation9 + $0x30] sm:$0xff]  }
 0xbbf   :  { %4821 = vmatprep.subr.bf16.mxu1 %v5597_v0 }
 0xbc2   :  { %4822 = vmatpush3.bf16.msra.mxu1 %v5291_v57  ;;  %v5311_v57 = vld [vmem:[#allocation9 + $0x38] sm:$0xff]  }
 0xbc3   :  { %4823 = vmatprep.subr.bf16.mxu1 %v5597_v0 }
 0xbc6   :  { %4824 = vmatpush3.bf16.msra.mxu1 %v5292_v58  ;;  %v5312_v58 = vld [vmem:[#allocation10] sm:$0xff]  }
 0xbc7   :  { %4825 = vmatprep.subr.bf16.mxu1 %v5597_v0 }
 0xbca   :  { %4826 = vmatpush3.bf16.msra.mxu1 %v5293_v59  ;;  %v5313_v59 = vld [vmem:[#allocation10 + $0x8] sm:$0xff]  }
 0xbcb   :  { %4827 = vmatprep.subr.bf16.mxu1 %v5597_v0 }
 0xbce   :  { %4828 = vmatpush3.bf16.msra.mxu1 %v5294_v11 }
 0xbcf   :  { %4829 = vmatprep.subr.bf16.mxu1 %v5597_v0 }
 0xbd2   :  { %4830 = vmatpush3.bf16.msra.mxu1 %v5295_v12 }
 0xbd3   :  { %4855 = vmatprep.subr.bf16.mxu1 %v5597_v0 }
 0xc88   :  { %v1741_v62 = vpop.f32.mrb[24].mxu1 }
 0xc89   :  { %v1751_v63 = vadd.f32 %v1750_v61, %v1741_v62  ;;  %v4793_v1 = vpop.f32.mrb[25].mxu1  ;;  %v5315_v61 = vld [vmem:[#allocation10 + $0x18] sm:$0xff]   ;;  %v5316_v62 = vld [vmem:[#allocation10 + $0x20] sm:$0xff]  }
 0xc8a   :  { %v1744_v3 = vpop.f32.mrb[26].mxu1 }
 0xc8b   :  { %v1752_v4 = vsub.f32 %v1751_v63, %v4042_v2  ;;  %v4794_v6 = vpop.f32.mrb[27].mxu1  ;;  %v5317_v63 = vld [vmem:[#allocation10 + $0x28] sm:$0xff]  }
 0xc8d   :  { %vm1753_vm9 = vcmp.gt.f32.partialorder %v1752_v4, 1.0  ;;  %v1756_v19 = vsel %vm5783_vm13, %v1752_v4, %v1640_v60  ;;  %v5314_v60 = vld [vmem:[#allocation10 + $0x10] sm:$0xff]  }
 0xc8e   :  { %v4043_v7 = vsel %vm1753_vm9, 1.0, %v5597_v0  ;;  %vm1863_vm11 = vcmp.gt.f32.partialorder %v1756_v19, 1.0  ;;  %v1866_v20 = vmul.f32 0.9, %v1756_v19 }
 0xc8f   :  { %v1757_v8 = vsel %vm5783_vm13, %v4043_v7, %v1641_v49  ;;  %v4052_v24 = vsel %vm1863_vm11, 1.0, %v5597_v0 }
 0xc90   :  { %v1758_v9 = vpack.c.bf16 %v1757_v8, %v1757_v8 }
 0xc92   :  { %4812 = vmatmul.mubr.bf16.vlgmr.msra.gmra.mrb[28].mxu0 %v1758_v9 }
 0xc93   :  { %4851 = vmatprep.mubr.msk.bf16.mxu0 %vm5598_vm0, %v5597_v0  ;;  %4836 = vmatpush3.bf16.msra.mxu0 %v5296_v14 }
 0xc94   :  { %4837 = vmatprep.subr.bf16.mxu0 %v5597_v0 }
 0xc97   :  { %4838 = vmatpush3.bf16.msra.mxu0 %v5297_v15 }
 0xc98   :  { %4839 = vmatprep.subr.bf16.mxu0 %v5597_v0 }
 0xc9b   :  { %4840 = vmatpush3.bf16.msra.mxu0 %v5298_v16  ;;  %v5318_v16 = vld [vmem:[#allocation10 + $0x30] sm:$0xff]  }
 0xc9c   :  { %4841 = vmatprep.subr.bf16.mxu0 %v5597_v0 }
 0xc9f   :  { %4842 = vmatpush3.bf16.msra.mxu0 %v5299_v17  ;;  %v5319_v17 = vld [vmem:[#allocation10 + $0x38] sm:$0xff]  }
 0xca0   :  { %4843 = vmatprep.subr.bf16.mxu0 %v5597_v0 }
 0xca3   :  { %4844 = vmatpush3.bf16.msra.mxu0 %v5300_v18  ;;  %v5320_v18 = vld [vmem:[#allocation12] sm:$0xff]  }
 0xca4   :  { %4845 = vmatprep.subr.bf16.mxu0 %v5597_v0 }
 0xca7   :  { %4846 = vmatpush3.bf16.msra.mxu0 %v5301_v32 }
 0xca8   :  { %4847 = vmatprep.subr.bf16.mxu0 %v5597_v0 }
 0xcab   :  { %4848 = vmatpush3.bf16.msra.mxu0 %v5302_v33 }
 0xcac   :  { %4849 = vmatprep.subr.bf16.mxu0 %v5597_v0 }
 0xcaf   :  { %4850 = vmatpush3.bf16.msra.mxu0 %v5303_v34 }
 0xcb0   :  { %4875 = vmatprep.subr.bf16.mxu0 %v5597_v0 }
 0xd65   :  { %v1857_v21 = vpop.f32.mrb[28].mxu0 }
 0xd66   :  { %v1867_v22 = vadd.f32 %v1866_v20, %v1857_v21  ;;  %v4813_v23 = vpop.f32.mrb[29].mxu0  ;;  %v5322_v20 = vld [vmem:[#allocation12 + $0x10] sm:$0xff]   ;;  %v5323_v21 = vld [vmem:[#allocation12 + $0x18] sm:$0xff]  }
 0xd67   :  { %v1860_v25 = vpop.f32.mrb[30].mxu0  ;;  %v5325_v23 = vld [vmem:[#allocation12 + $0x28] sm:$0xff]  }
 0xd68   :  { %v1868_v26 = vsub.f32 %v1867_v22, %v4052_v24  ;;  %v4814_v27 = vpop.f32.mrb[31].mxu0  ;;  %v5324_v22 = vld [vmem:[#allocation12 + $0x20] sm:$0xff]  }
 0xd6a   :  { %vm1869_vm12 = vcmp.gt.f32.partialorder %v1868_v26, 1.0  ;;  %v1872_v5 = vsel %vm5804_vm4, %v1868_v26, %v1756_v19  ;;  %v5321_v19 = vld [vmem:[#allocation12 + $0x8] sm:$0xff]  }
 0xd6b   :  { %v4053_v28 = vsel %vm1869_vm12, 1.0, %v5597_v0  ;;  %vm1979_vm14 = vcmp.gt.f32.partialorder %v1872_v5, 1.0  ;;  %v1982_v42 = vmul.f32 0.9, %v1872_v5 }
 0xd6c   :  { %v1873_v29 = vsel %vm5804_vm4, %v4053_v28, %v1757_v8  ;;  %v4062_v46 = vsel %vm1979_vm14, 1.0, %v5597_v0 }
 0xd6d   :  { %v1874_v30 = vpack.c.bf16 %v1873_v29, %v1873_v29 }
 0xd6f   :  { %4832 = vmatmul.mubr.bf16.vlgmr.msra.gmra.mrb[28].mxu1 %v1874_v30 }
 0xd70   :  { %4871 = vmatprep.mubr.msk.bf16.mxu1 %vm5598_vm0, %v5597_v0  ;;  %4856 = vmatpush3.bf16.msra.mxu1 %v5304_v35 }
 0xd71   :  { %4857 = vmatprep.subr.bf16.mxu1 %v5597_v0 }
 0xd74   :  { %4858 = vmatpush3.bf16.msra.mxu1 %v5305_v36 }
 0xd75   :  { %4859 = vmatprep.subr.bf16.mxu1 %v5597_v0 }
 0xd78   :  { %4860 = vmatpush3.bf16.msra.mxu1 %v5306_v38  ;;  %v5326_v38 = vld [vmem:[#allocation12 + $0x30] sm:$0xff]  }
 0xd79   :  { %4861 = vmatprep.subr.bf16.mxu1 %v5597_v0 }
 0xd7c   :  { %4862 = vmatpush3.bf16.msra.mxu1 %v5307_v39  ;;  %v5327_v39 = vld [vmem:[#allocation12 + $0x38] sm:$0xff]  }
 0xd7d   :  { %4863 = vmatprep.subr.bf16.mxu1 %v5597_v0 }
 0xd80   :  { %4864 = vmatpush3.bf16.msra.mxu1 %v5308_v40  ;;  %v5328_v40 = vld [vmem:[#allocation7] sm:$0xff]  }
 0xd81   :  { %4865 = vmatprep.subr.bf16.mxu1 %v5597_v0 }
 0xd84   :  { %4866 = vmatpush3.bf16.msra.mxu1 %v5309_v41  ;;  %v5329_v41 = vld [vmem:[#allocation7 + $0x8] sm:$0xff]  }
 0xd85   :  { %4867 = vmatprep.subr.bf16.mxu1 %v5597_v0 }
 0xd88   :  { %4868 = vmatpush3.bf16.msra.mxu1 %v5310_v56 }
 0xd89   :  { %4869 = vmatprep.subr.bf16.mxu1 %v5597_v0 }
 0xd8c   :  { %4870 = vmatpush3.bf16.msra.mxu1 %v5311_v57  ;;  %v5333_v57 = vld [vmem:[#allocation7 + $0x28] sm:$0xff]  }
 0xd8d   :  { %4895 = vmatprep.subr.bf16.mxu1 %v5597_v0 }
 0xe42   :  { %v1973_v43 = vpop.f32.mrb[28].mxu1 }
 0xe43   :  { %v1983_v44 = vadd.f32 %v1982_v42, %v1973_v43  ;;  %v4833_v45 = vpop.f32.mrb[29].mxu1  ;;  %v5331_v42 = vld [vmem:[#allocation7 + $0x18] sm:$0xff]   ;;  %v5332_v43 = vld [vmem:[#allocation7 + $0x20] sm:$0xff]  }
 0xe44   :  { %v1976_v47 = vpop.f32.mrb[30].mxu1 }
 0xe45   :  { %v1984_v48 = vsub.f32 %v1983_v44, %v4062_v46  ;;  %v4834_v49 = vpop.f32.mrb[31].mxu1 }
 0xe47   :  { %vm1985_vm15 = vcmp.gt.f32.partialorder %v1984_v48, 1.0  ;;  %v1988_v1 = vsel %vm5827_vm10, %v1984_v48, %v1872_v5  ;;  %v5330_v5 = vld [vmem:[#allocation7 + $0x10] sm:$0xff]  }
 0xe48   :  { %v4063_v51 = vsel %vm1985_vm15, 1.0, %v5597_v0  ;;  %vm2100_vm1 = vcmp.gt.f32.partialorder %v1988_v1, 1.0  ;;  %v2103_v2 = vmul.f32 0.9, %v1988_v1 }
 0xe49   :  { %v1989_v52 = vsel %vm5827_vm10, %v4063_v51, %v1873_v29  ;;  %v4072_v7 = vsel %vm2100_vm1, 1.0, %v5597_v0 }
 0xe4a   :  { %1991 = vst [vmem:[#allocation13 + $0x18] sm:$0xff] %v1989_v52  ;;  %v1994_v53 = vsel %vm5726_vm3, %v1993_v50, %v1989_v52 }
 0xe4b   :  { %v1995_v55 = vpack.c.bf16 %v1994_v53, %v1994_v53 }
 0xe4d   :  { %4852 = vmatmul.mubr.bf16.vlgmr.msra.gmra.mrb[32].mxu0 %v1995_v55 }
 0xe4e   :  { %4891 = vmatprep.mubr.msk.bf16.mxu0 %vm5598_vm0, %v5597_v0  ;;  %4876 = vmatpush3.bf16.msra.mxu0 %v5312_v58  ;;  %v5334_v58 = vld [vmem:[#allocation7 + $0x30] sm:$0xff]  }
 0xe4f   :  { %4877 = vmatprep.subr.bf16.mxu0 %v5597_v0 }
 0xe52   :  { %4878 = vmatpush3.bf16.msra.mxu0 %v5313_v59  ;;  %v5335_v59 = vld [vmem:[#allocation7 + $0x38] sm:$0xff]  }
 0xe53   :  { %4879 = vmatprep.subr.bf16.mxu0 %v5597_v0 }
 0xe56   :  { %4880 = vmatpush3.bf16.msra.mxu0 %v5314_v60  ;;  %v5336_v60 = vld [vmem:[#allocation9] sm:$0xff]  }
 0xe57   :  { %4881 = vmatprep.subr.bf16.mxu0 %v5597_v0 }
 0xe5a   :  { %4882 = vmatpush3.bf16.msra.mxu0 %v5315_v61  ;;  %v5337_v61 = vld [vmem:[#allocation9 + $0x8] sm:$0xff]  }
 0xe5b   :  { %4883 = vmatprep.subr.bf16.mxu0 %v5597_v0 }
 0xe5e   :  { %4884 = vmatpush3.bf16.msra.mxu0 %v5316_v62  ;;  %v5338_v62 = vld [vmem:[#allocation9 + $0x10] sm:$0xff]  }
 0xe5f   :  { %4885 = vmatprep.subr.bf16.mxu0 %v5597_v0 }
 0xe62   :  { %4886 = vmatpush3.bf16.msra.mxu0 %v5317_v63  ;;  %v5339_v63 = vld [vmem:[#allocation9 + $0x18] sm:$0xff]  }
 0xe63   :  { %4887 = vmatprep.subr.bf16.mxu0 %v5597_v0 }
 0xe66   :  { %4888 = vmatpush3.bf16.msra.mxu0 %v5318_v16 }
 0xe67   :  { %4889 = vmatprep.subr.bf16.mxu0 %v5597_v0 }
 0xe6a   :  { %4890 = vmatpush3.bf16.msra.mxu0 %v5319_v17 }
 0xe6b   :  { %4915 = vmatprep.subr.bf16.mxu0 %v5597_v0 }
 0xf20   :  { %v2094_v3 = vpop.f32.mrb[32].mxu0 }
 0xf21   :  { %v2104_v4 = vadd.f32 %v2103_v2, %v2094_v3  ;;  %v4853_v6 = vpop.f32.mrb[33].mxu0  ;;  %v5341_v2 = vld [vmem:[#allocation9 + $0x28] sm:$0xff]  }
 0xf22   :  { %v2097_v8 = vpop.f32.mrb[34].mxu0 }
 0xf23   :  { %v2105_v9 = vsub.f32 %v2104_v4, %v4072_v7  ;;  %v4854_v11 = vpop.f32.mrb[35].mxu0 }
 0xf25   :  { %vm2106_vm2 = vcmp.gt.f32.partialorder %v2105_v9, 1.0  ;;  %v2109_v24 = vsel %vm5761_vm8, %v2105_v9, %v1988_v1  ;;  %v5340_v1 = vld [vmem:[#allocation9 + $0x20] sm:$0xff]  }
 0xf26   :  { %v4073_v12 = vsel %vm2106_vm2, 1.0, %v5597_v0  ;;  %vm2216_vm5 = vcmp.gt.f32.partialorder %v2109_v24, 1.0  ;;  %v2219_v25 = vmul.f32 0.9, %v2109_v24 }
 0xf27   :  { %v2110_v14 = vsel %vm5761_vm8, %v4073_v12, %v1994_v53  ;;  %v4082_v29 = vsel %vm2216_vm5, 1.0, %v5597_v0 }
 0xf28   :  { %v2111_v15 = vpack.c.bf16 %v2110_v14, %v2110_v14 }
 0xf2a   :  { %4872 = vmatmul.mubr.bf16.vlgmr.msra.gmra.mrb[32].mxu1 %v2111_v15  ;;  %v2462_v15 = vld [vmem:[#allocation4 + $0x28] sm:$0xff] }
 0xf2b   :  { %4911 = vmatprep.mubr.msk.bf16.mxu1 %vm5598_vm0, %v5597_v0  ;;  %4896 = vmatpush3.bf16.msra.mxu1 %v5320_v18 }
 0xf2c   :  { %4897 = vmatprep.subr.bf16.mxu1 %v5597_v0 }
 0xf2f   :  { %4898 = vmatpush3.bf16.msra.mxu1 %v5321_v19 }
 0xf30   :  { %4899 = vmatprep.subr.bf16.mxu1 %v5597_v0 }
 0xf33   :  { %4900 = vmatpush3.bf16.msra.mxu1 %v5322_v20  ;;  %v5342_v20 = vld [vmem:[#allocation9 + $0x30] sm:$0xff]  }
 0xf34   :  { %4901 = vmatprep.subr.bf16.mxu1 %v5597_v0 }
 0xf37   :  { %4902 = vmatpush3.bf16.msra.mxu1 %v5323_v21  ;;  %v5343_v21 = vld [vmem:[#allocation9 + $0x38] sm:$0xff]  }
 0xf38   :  { %4903 = vmatprep.subr.bf16.mxu1 %v5597_v0 }
 0xf3b   :  { %4904 = vmatpush3.bf16.msra.mxu1 %v5324_v22  ;;  %v5344_v22 = vld [vmem:[#allocation10] sm:$0xff]  }
 0xf3c   :  { %4905 = vmatprep.subr.bf16.mxu1 %v5597_v0 }
 0xf3f   :  { %4906 = vmatpush3.bf16.msra.mxu1 %v5325_v23  ;;  %v5345_v23 = vld [vmem:[#allocation10 + $0x8] sm:$0xff]  }
 0xf40   :  { %4907 = vmatprep.subr.bf16.mxu1 %v5597_v0 }
 0xf43   :  { %4908 = vmatpush3.bf16.msra.mxu1 %v5326_v38 }
 0xf44   :  { %4909 = vmatprep.subr.bf16.mxu1 %v5597_v0 }
 0xf47   :  { %4910 = vmatpush3.bf16.msra.mxu1 %v5327_v39 }
 0xf48   :  { %4935 = vmatprep.subr.bf16.mxu1 %v5597_v0 }
 0xffd   :  { %v2210_v26 = vpop.f32.mrb[32].mxu1 }
 0xffe   :  { %v2220_v27 = vadd.f32 %v2219_v25, %v2210_v26  ;;  %v4873_v28 = vpop.f32.mrb[33].mxu1  ;;  %v5347_v25 = vld [vmem:[#allocation10 + $0x18] sm:$0xff]   ;;  %v5348_v26 = vld [vmem:[#allocation10 + $0x20] sm:$0xff]  }
 0xfff   :  { %v2213_v30 = vpop.f32.mrb[34].mxu1 }
0x1000   :  { %v2221_v32 = vsub.f32 %v2220_v27, %v4082_v29  ;;  %v4874_v33 = vpop.f32.mrb[35].mxu1  ;;  %v5349_v27 = vld [vmem:[#allocation10 + $0x28] sm:$0xff]  }
0x1002   :  { %vm2222_vm6 = vcmp.gt.f32.partialorder %v2221_v32, 1.0  ;;  %v2225_v44 = vsel %vm5783_vm13, %v2221_v32, %v2109_v24  ;;  %v5346_v24 = vld [vmem:[#allocation10 + $0x10] sm:$0xff]  }
0x1003   :  { %v4083_v34 = vsel %vm2222_vm6, 1.0, %v5597_v0  ;;  %vm2332_vm7 = vcmp.gt.f32.partialorder %v2225_v44, 1.0  ;;  %v2335_v45 = vmul.f32 0.9, %v2225_v44 }
0x1004   :  { %v2226_v35 = vsel %vm5783_vm13, %v4083_v34, %v2110_v14  ;;  %v4092_v49 = vsel %vm2332_vm7, 1.0, %v5597_v0 }
0x1005   :  { %v2227_v36 = vpack.c.bf16 %v2226_v35, %v2226_v35 }
0x1007   :  { %4892 = vmatmul.mubr.bf16.vlgmr.msra.gmra.mrb[36].mxu0 %v2227_v36 }
0x1008   :  { %4931 = vmatprep.mubr.msk.bf16.mxu0 %vm5598_vm0, %v5597_v0  ;;  %4916 = vmatpush3.bf16.msra.mxu0 %v5328_v40 }
0x1009   :  { %4917 = vmatprep.subr.bf16.mxu0 %v5597_v0 }
0x100c   :  { %4918 = vmatpush3.bf16.msra.mxu0 %v5329_v41 }
0x100d   :  { %4919 = vmatprep.subr.bf16.mxu0 %v5597_v0 }
0x1010   :  { %4920 = vmatpush3.bf16.msra.mxu0 %v5330_v5  ;;  %v5350_v5 = vld [vmem:[#allocation10 + $0x30] sm:$0xff]  }
0x1011   :  { %4921 = vmatprep.subr.bf16.mxu0 %v5597_v0 }
0x1014   :  { %4922 = vmatpush3.bf16.msra.mxu0 %v5331_v42  ;;  %v5351_v42 = vld [vmem:[#allocation10 + $0x38] sm:$0xff]  }
0x1015   :  { %4923 = vmatprep.subr.bf16.mxu0 %v5597_v0 }
0x1018   :  { %4924 = vmatpush3.bf16.msra.mxu0 %v5332_v43  ;;  %v5352_v43 = vld [vmem:[#allocation12] sm:$0xff]  }
0x1019   :  { %4925 = vmatprep.subr.bf16.mxu0 %v5597_v0 }
0x101c   :  { %4926 = vmatpush3.bf16.msra.mxu0 %v5333_v57 }
0x101d   :  { %4927 = vmatprep.subr.bf16.mxu0 %v5597_v0 }
0x1020   :  { %4928 = vmatpush3.bf16.msra.mxu0 %v5334_v58 }
0x1021   :  { %4929 = vmatprep.subr.bf16.mxu0 %v5597_v0 }
0x1024   :  { %4930 = vmatpush3.bf16.msra.mxu0 %v5335_v59 }
0x1025   :  { %4955 = vmatprep.subr.bf16.mxu0 %v5597_v0 }
0x10da   :  { %v2326_v46 = vpop.f32.mrb[36].mxu0 }
0x10db   :  { %v2336_v47 = vadd.f32 %v2335_v45, %v2326_v46  ;;  %v4893_v48 = vpop.f32.mrb[37].mxu0  ;;  %v5354_v45 = vld [vmem:[#allocation12 + $0x10] sm:$0xff]   ;;  %v5355_v46 = vld [vmem:[#allocation12 + $0x18] sm:$0xff]  }
0x10dc   :  { %v2329_v50 = vpop.f32.mrb[38].mxu0  ;;  %v5357_v48 = vld [vmem:[#allocation12 + $0x28] sm:$0xff]  }
0x10dd   :  { %v2337_v51 = vsub.f32 %v2336_v47, %v4092_v49  ;;  %v4894_v52 = vpop.f32.mrb[39].mxu0  ;;  %v5356_v47 = vld [vmem:[#allocation12 + $0x20] sm:$0xff]  }
0x10df   :  { %vm2338_vm9 = vcmp.gt.f32.partialorder %v2337_v51, 1.0  ;;  %v2341_v3 = vsel %vm5804_vm4, %v2337_v51, %v2225_v44  ;;  %v5353_v44 = vld [vmem:[#allocation12 + $0x8] sm:$0xff]  }
0x10e0   :  { %v4093_v53 = vsel %vm2338_vm9, 1.0, %v5597_v0  ;;  %vm2448_vm11 = vcmp.gt.f32.partialorder %v2341_v3, 1.0  ;;  %v2451_v4 = vmul.f32 0.9, %v2341_v3 }
0x10e1   :  { %v2342_v55 = vsel %vm5804_vm4, %v4093_v53, %v2226_v35  ;;  %v4102_v9 = vsel %vm2448_vm11, 1.0, %v5597_v0 }
0x10e2   :  { %v2343_v56 = vpack.c.bf16 %v2342_v55, %v2342_v55 }
0x10e4   :  { %4912 = vmatmul.mubr.bf16.vlgmr.msra.gmra.mrb[36].mxu1 %v2343_v56 }
0x10e5   :  { %4951 = vmatprep.mubr.msk.bf16.mxu1 %vm5598_vm0, %v5597_v0  ;;  %4936 = vmatpush3.bf16.msra.mxu1 %v5336_v60 }
0x10e6   :  { %4937 = vmatprep.subr.bf16.mxu1 %v5597_v0 }
0x10e9   :  { %4938 = vmatpush3.bf16.msra.mxu1 %v5337_v61 }
0x10ea   :  { %4939 = vmatprep.subr.bf16.mxu1 %v5597_v0 }
0x10ed   :  { %4940 = vmatpush3.bf16.msra.mxu1 %v5338_v62  ;;  %v5358_v62 = vld [vmem:[#allocation12 + $0x30] sm:$0xff]  }
0x10ee   :  { %4941 = vmatprep.subr.bf16.mxu1 %v5597_v0 }
0x10f1   :  { %4942 = vmatpush3.bf16.msra.mxu1 %v5339_v63  ;;  %v5359_v63 = vld [vmem:[#allocation12 + $0x38] sm:$0xff]  }
0x10f2   :  { %4943 = vmatprep.subr.bf16.mxu1 %v5597_v0 }
0x10f5   :  { %4944 = vmatpush3.bf16.msra.mxu1 %v5340_v1  ;;  %v5360_v1 = vld [vmem:[#allocation7] sm:$0xff]  }
0x10f6   :  { %4945 = vmatprep.subr.bf16.mxu1 %v5597_v0 }
0x10f9   :  { %4946 = vmatpush3.bf16.msra.mxu1 %v5341_v2  ;;  %v5361_v2 = vld [vmem:[#allocation7 + $0x8] sm:$0xff]  }
0x10fa   :  { %4947 = vmatprep.subr.bf16.mxu1 %v5597_v0 }
0x10fd   :  { %4948 = vmatpush3.bf16.msra.mxu1 %v5342_v20 }
0x10fe   :  { %4949 = vmatprep.subr.bf16.mxu1 %v5597_v0 }
0x1101   :  { %4950 = vmatpush3.bf16.msra.mxu1 %v5343_v21  ;;  %v5365_v21 = vld [vmem:[#allocation7 + $0x28] sm:$0xff]  }
0x1102   :  { %4975 = vmatprep.subr.bf16.mxu1 %v5597_v0 }
0x11b7   :  { %v2442_v6 = vpop.f32.mrb[36].mxu1 }
0x11b8   :  { %v2452_v7 = vadd.f32 %v2451_v4, %v2442_v6  ;;  %v4913_v8 = vpop.f32.mrb[37].mxu1  ;;  %v5363_v4 = vld [vmem:[#allocation7 + $0x18] sm:$0xff]   ;;  %v5364_v6 = vld [vmem:[#allocation7 + $0x20] sm:$0xff]  }
0x11b9   :  { %v2445_v11 = vpop.f32.mrb[38].mxu1 }
0x11ba   :  { %v2453_v12 = vsub.f32 %v2452_v7, %v4102_v9  ;;  %v4914_v14 = vpop.f32.mrb[39].mxu1 }
0x11bc   :  { %vm2454_vm12 = vcmp.gt.f32.partialorder %v2453_v12, 1.0  ;;  %v2457_v28 = vsel %vm5827_vm10, %v2453_v12, %v2341_v3  ;;  %v5362_v3 = vld [vmem:[#allocation7 + $0x10] sm:$0xff]  }
0x11bd   :  { %v4103_v16 = vsel %vm2454_vm12, 1.0, %v5597_v0  ;;  %vm2569_vm14 = vcmp.gt.f32.partialorder %v2457_v28, 1.0  ;;  %v2572_v29 = vmul.f32 0.9, %v2457_v28 }
0x11be   :  { %v2458_v17 = vsel %vm5827_vm10, %v4103_v16, %v2342_v55  ;;  %v4112_v34 = vsel %vm2569_vm14, 1.0, %v5597_v0 }
0x11bf   :  { %2460 = vst [vmem:[#allocation13 + $0x20] sm:$0xff] %v2458_v17  ;;  %v2463_v18 = vsel %vm5726_vm3, %v2462_v15, %v2458_v17 }
0x11c0   :  { %v2464_v19 = vpack.c.bf16 %v2463_v18, %v2463_v18 }
0x11c2   :  { %4932 = vmatmul.mubr.bf16.vlgmr.msra.gmra.mrb[40].mxu0 %v2464_v19 }
0x11c3   :  { %4971 = vmatprep.mubr.msk.bf16.mxu0 %vm5598_vm0, %v5597_v0  ;;  %4956 = vmatpush3.bf16.msra.mxu0 %v5344_v22  ;;  %v5366_v22 = vld [vmem:[#allocation7 + $0x30] sm:$0xff]  }
0x11c4   :  { %4957 = vmatprep.subr.bf16.mxu0 %v5597_v0 }
0x11c7   :  { %4958 = vmatpush3.bf16.msra.mxu0 %v5345_v23  ;;  %v5367_v23 = vld [vmem:[#allocation7 + $0x38] sm:$0xff]  }
0x11c8   :  { %4959 = vmatprep.subr.bf16.mxu0 %v5597_v0 }
0x11cb   :  { %4960 = vmatpush3.bf16.msra.mxu0 %v5346_v24  ;;  %v5368_v24 = vld [vmem:[#allocation9] sm:$0xff]  }
0x11cc   :  { %4961 = vmatprep.subr.bf16.mxu0 %v5597_v0 }
0x11cf   :  { %4962 = vmatpush3.bf16.msra.mxu0 %v5347_v25  ;;  %v5369_v25 = vld [vmem:[#allocation9 + $0x8] sm:$0xff]  }
0x11d0   :  { %4963 = vmatprep.subr.bf16.mxu0 %v5597_v0 }
0x11d3   :  { %4964 = vmatpush3.bf16.msra.mxu0 %v5348_v26  ;;  %v5370_v26 = vld [vmem:[#allocation9 + $0x10] sm:$0xff]  }
0x11d4   :  { %4965 = vmatprep.subr.bf16.mxu0 %v5597_v0 }
0x11d7   :  { %4966 = vmatpush3.bf16.msra.mxu0 %v5349_v27  ;;  %v5371_v27 = vld [vmem:[#allocation9 + $0x18] sm:$0xff]  }
0x11d8   :  { %4967 = vmatprep.subr.bf16.mxu0 %v5597_v0 }
0x11db   :  { %4968 = vmatpush3.bf16.msra.mxu0 %v5350_v5 }
0x11dc   :  { %4969 = vmatprep.subr.bf16.mxu0 %v5597_v0 }
0x11df   :  { %4970 = vmatpush3.bf16.msra.mxu0 %v5351_v42 }
0x11e0   :  { %4995 = vmatprep.subr.bf16.mxu0 %v5597_v0 }
0x1295   :  { %v2563_v30 = vpop.f32.mrb[40].mxu0 }
0x1296   :  { %v2573_v32 = vadd.f32 %v2572_v29, %v2563_v30  ;;  %v4933_v33 = vpop.f32.mrb[41].mxu0  ;;  %v5373_v29 = vld [vmem:[#allocation9 + $0x28] sm:$0xff]  }
0x1297   :  { %v2566_v35 = vpop.f32.mrb[42].mxu0 }
0x1298   :  { %v2574_v36 = vsub.f32 %v2573_v32, %v4112_v34  ;;  %v4934_v38 = vpop.f32.mrb[43].mxu0 }
0x129a   :  { %vm2575_vm15 = vcmp.gt.f32.partialorder %v2574_v36, 1.0  ;;  %v2578_v49 = vsel %vm5761_vm8, %v2574_v36, %v2457_v28  ;;  %v5372_v28 = vld [vmem:[#allocation9 + $0x20] sm:$0xff]  }
0x129b   :  { %v4113_v39 = vsel %vm2575_vm15, 1.0, %v5597_v0  ;;  %vm2685_vm1 = vcmp.gt.f32.partialorder %v2578_v49, 1.0  ;;  %v2688_v50 = vmul.f32 0.9, %v2578_v49 }
0x129c   :  { %v2579_v40 = vsel %vm5761_vm8, %v4113_v39, %v2463_v18  ;;  %v4122_v55 = vsel %vm2685_vm1, 1.0, %v5597_v0 }
0x129d   :  { %v2580_v41 = vpack.c.bf16 %v2579_v40, %v2579_v40 }
0x129f   :  { %4952 = vmatmul.mubr.bf16.vlgmr.msra.gmra.mrb[40].mxu1 %v2580_v41  ;;  %v2931_v41 = vld [vmem:[#allocation4 + $0x30] sm:$0xff] }
0x12a0   :  { %4991 = vmatprep.mubr.msk.bf16.mxu1 %vm5598_vm0, %v5597_v0  ;;  %4976 = vmatpush3.bf16.msra.mxu1 %v5352_v43 }
0x12a1   :  { %4977 = vmatprep.subr.bf16.mxu1 %v5597_v0 }
0x12a4   :  { %4978 = vmatpush3.bf16.msra.mxu1 %v5353_v44 }
0x12a5   :  { %4979 = vmatprep.subr.bf16.mxu1 %v5597_v0 }
0x12a8   :  { %4980 = vmatpush3.bf16.msra.mxu1 %v5354_v45  ;;  %v5374_v45 = vld [vmem:[#allocation9 + $0x30] sm:$0xff]  }
0x12a9   :  { %4981 = vmatprep.subr.bf16.mxu1 %v5597_v0 }
0x12ac   :  { %4982 = vmatpush3.bf16.msra.mxu1 %v5355_v46  ;;  %v5375_v46 = vld [vmem:[#allocation9 + $0x38] sm:$0xff]  }
0x12ad   :  { %4983 = vmatprep.subr.bf16.mxu1 %v5597_v0 }
0x12b0   :  { %4984 = vmatpush3.bf16.msra.mxu1 %v5356_v47  ;;  %v5376_v47 = vld [vmem:[#allocation10] sm:$0xff]  }
0x12b1   :  { %4985 = vmatprep.subr.bf16.mxu1 %v5597_v0 }
0x12b4   :  { %4986 = vmatpush3.bf16.msra.mxu1 %v5357_v48  ;;  %v5377_v48 = vld [vmem:[#allocation10 + $0x8] sm:$0xff]  }
0x12b5   :  { %4987 = vmatprep.subr.bf16.mxu1 %v5597_v0 }
0x12b8   :  { %4988 = vmatpush3.bf16.msra.mxu1 %v5358_v62 }
0x12b9   :  { %4989 = vmatprep.subr.bf16.mxu1 %v5597_v0 }
0x12bc   :  { %4990 = vmatpush3.bf16.msra.mxu1 %v5359_v63 }
0x12bd   :  { %5015 = vmatprep.subr.bf16.mxu1 %v5597_v0 }
0x1372   :  { %v2679_v51 = vpop.f32.mrb[40].mxu1 }
0x1373   :  { %v2689_v52 = vadd.f32 %v2688_v50, %v2679_v51  ;;  %v4953_v53 = vpop.f32.mrb[41].mxu1  ;;  %v5379_v50 = vld [vmem:[#allocation10 + $0x18] sm:$0xff]   ;;  %v5380_v51 = vld [vmem:[#allocation10 + $0x20] sm:$0xff]  }
0x1374   :  { %v2682_v56 = vpop.f32.mrb[42].mxu1 }
0x1375   :  { %v2690_v57 = vsub.f32 %v2689_v52, %v4122_v55  ;;  %v4954_v58 = vpop.f32.mrb[43].mxu1  ;;  %v5381_v52 = vld [vmem:[#allocation10 + $0x28] sm:$0xff]  }
0x1377   :  { %vm2691_vm2 = vcmp.gt.f32.partialorder %v2690_v57, 1.0  ;;  %v2694_v7 = vsel %vm5783_vm13, %v2690_v57, %v2578_v49  ;;  %v5378_v49 = vld [vmem:[#allocation10 + $0x10] sm:$0xff]  }
0x1378   :  { %v4123_v59 = vsel %vm2691_vm2, 1.0, %v5597_v0  ;;  %vm2801_vm5 = vcmp.gt.f32.partialorder %v2694_v7, 1.0  ;;  %v2804_v8 = vmul.f32 0.9, %v2694_v7 }
0x1379   :  { %v2695_v60 = vsel %vm5783_vm13, %v4123_v59, %v2579_v40  ;;  %v4132_v14 = vsel %vm2801_vm5, 1.0, %v5597_v0 }
0x137a   :  { %v2696_v61 = vpack.c.bf16 %v2695_v60, %v2695_v60 }
0x137c   :  { %4972 = vmatmul.mubr.bf16.vlgmr.msra.gmra.mrb[44].mxu0 %v2696_v61 }
0x137d   :  { %5011 = vmatprep.mubr.msk.bf16.mxu0 %vm5598_vm0, %v5597_v0  ;;  %4996 = vmatpush3.bf16.msra.mxu0 %v5360_v1 }
0x137e   :  { %4997 = vmatprep.subr.bf16.mxu0 %v5597_v0 }
0x1381   :  { %4998 = vmatpush3.bf16.msra.mxu0 %v5361_v2 }
0x1382   :  { %4999 = vmatprep.subr.bf16.mxu0 %v5597_v0 }
0x1385   :  { %5000 = vmatpush3.bf16.msra.mxu0 %v5362_v3  ;;  %v5382_v3 = vld [vmem:[#allocation10 + $0x30] sm:$0xff]  }
0x1386   :  { %5001 = vmatprep.subr.bf16.mxu0 %v5597_v0 }
0x1389   :  { %5002 = vmatpush3.bf16.msra.mxu0 %v5363_v4  ;;  %v5383_v4 = vld [vmem:[#allocation10 + $0x38] sm:$0xff]  }
0x138a   :  { %5003 = vmatprep.subr.bf16.mxu0 %v5597_v0 }
0x138d   :  { %5004 = vmatpush3.bf16.msra.mxu0 %v5364_v6  ;;  %v5384_v6 = vld [vmem:[#allocation12] sm:$0xff]  }
0x138e   :  { %5005 = vmatprep.subr.bf16.mxu0 %v5597_v0 }
0x1391   :  { %5006 = vmatpush3.bf16.msra.mxu0 %v5365_v21 }
0x1392   :  { %5007 = vmatprep.subr.bf16.mxu0 %v5597_v0 }
0x1395   :  { %5008 = vmatpush3.bf16.msra.mxu0 %v5366_v22 }
0x1396   :  { %5009 = vmatprep.subr.bf16.mxu0 %v5597_v0 }
0x1399   :  { %5010 = vmatpush3.bf16.msra.mxu0 %v5367_v23 }
0x139a   :  { %5035 = vmatprep.subr.bf16.mxu0 %v5597_v0 }
0x144f   :  { %v2795_v9 = vpop.f32.mrb[44].mxu0 }
0x1450   :  { %v2805_v11 = vadd.f32 %v2804_v8, %v2795_v9  ;;  %v4973_v12 = vpop.f32.mrb[45].mxu0  ;;  %v5386_v8 = vld [vmem:[#allocation12 + $0x10] sm:$0xff]   ;;  %v5387_v9 = vld [vmem:[#allocation12 + $0x18] sm:$0xff]  }
0x1451   :  { %v2798_v15 = vpop.f32.mrb[46].mxu0  ;;  %v5389_v12 = vld [vmem:[#allocation12 + $0x28] sm:$0xff]  }
0x1452   :  { %v2806_v16 = vsub.f32 %v2805_v11, %v4132_v14  ;;  %v4974_v17 = vpop.f32.mrb[47].mxu0  ;;  %v5388_v11 = vld [vmem:[#allocation12 + $0x20] sm:$0xff]  }
0x1454   :  { %vm2807_vm6 = vcmp.gt.f32.partialorder %v2806_v16, 1.0  ;;  %v2810_v30 = vsel %vm5804_vm4, %v2806_v16, %v2694_v7  ;;  %v5385_v7 = vld [vmem:[#allocation12 + $0x8] sm:$0xff]  }
0x1455   :  { %v4133_v18 = vsel %vm2807_vm6, 1.0, %v5597_v0  ;;  %vm2917_vm7 = vcmp.gt.f32.partialorder %v2810_v30, 1.0  ;;  %v2920_v32 = vmul.f32 0.9, %v2810_v30 }
0x1456   :  { %v2811_v19 = vsel %vm5804_vm4, %v4133_v18, %v2695_v60  ;;  %v4142_v36 = vsel %vm2917_vm7, 1.0, %v5597_v0 }
0x1457   :  { %v2812_v20 = vpack.c.bf16 %v2811_v19, %v2811_v19 }
0x1459   :  { %4992 = vmatmul.mubr.bf16.vlgmr.msra.gmra.mrb[44].mxu1 %v2812_v20 }
0x145a   :  { %5031 = vmatprep.mubr.msk.bf16.mxu1 %vm5598_vm0, %v5597_v0  ;;  %5016 = vmatpush3.bf16.msra.mxu1 %v5368_v24 }
0x145b   :  { %5017 = vmatprep.subr.bf16.mxu1 %v5597_v0 }
0x145e   :  { %5018 = vmatpush3.bf16.msra.mxu1 %v5369_v25 }
0x145f   :  { %5019 = vmatprep.subr.bf16.mxu1 %v5597_v0 }
0x1462   :  { %5020 = vmatpush3.bf16.msra.mxu1 %v5370_v26  ;;  %v5390_v26 = vld [vmem:[#allocation12 + $0x30] sm:$0xff]  }
0x1463   :  { %5021 = vmatprep.subr.bf16.mxu1 %v5597_v0 }
0x1466   :  { %5022 = vmatpush3.bf16.msra.mxu1 %v5371_v27  ;;  %v5391_v27 = vld [vmem:[#allocation12 + $0x38] sm:$0xff]  }
0x1467   :  { %5023 = vmatprep.subr.bf16.mxu1 %v5597_v0 }
0x146a   :  { %5024 = vmatpush3.bf16.msra.mxu1 %v5372_v28  ;;  %v5392_v28 = vld [vmem:[#allocation7] sm:$0xff]  }
0x146b   :  { %5025 = vmatprep.subr.bf16.mxu1 %v5597_v0 }
0x146e   :  { %5026 = vmatpush3.bf16.msra.mxu1 %v5373_v29  ;;  %v5393_v29 = vld [vmem:[#allocation7 + $0x8] sm:$0xff]  }
0x146f   :  { %5027 = vmatprep.subr.bf16.mxu1 %v5597_v0 }
0x1472   :  { %5028 = vmatpush3.bf16.msra.mxu1 %v5374_v45 }
0x1473   :  { %5029 = vmatprep.subr.bf16.mxu1 %v5597_v0 }
0x1476   :  { %5030 = vmatpush3.bf16.msra.mxu1 %v5375_v46  ;;  %v5397_v46 = vld [vmem:[#allocation7 + $0x28] sm:$0xff]  }
0x1477   :  { %5055 = vmatprep.subr.bf16.mxu1 %v5597_v0 }
0x152c   :  { %v2911_v33 = vpop.f32.mrb[44].mxu1 }
0x152d   :  { %v2921_v34 = vadd.f32 %v2920_v32, %v2911_v33  ;;  %v4993_v35 = vpop.f32.mrb[45].mxu1  ;;  %v5395_v32 = vld [vmem:[#allocation7 + $0x18] sm:$0xff]   ;;  %v5396_v33 = vld [vmem:[#allocation7 + $0x20] sm:$0xff]  }
0x152e   :  { %v2914_v38 = vpop.f32.mrb[46].mxu1 }
0x152f   :  { %v2922_v39 = vsub.f32 %v2921_v34, %v4142_v36  ;;  %v4994_v40 = vpop.f32.mrb[47].mxu1 }
0x1531   :  { %vm2923_vm9 = vcmp.gt.f32.partialorder %v2922_v39, 1.0  ;;  %v2926_v53 = vsel %vm5827_vm10, %v2922_v39, %v2810_v30  ;;  %v5394_v30 = vld [vmem:[#allocation7 + $0x10] sm:$0xff]  }
0x1532   :  { %v4143_v5 = vsel %vm2923_vm9, 1.0, %v5597_v0  ;;  %vm3038_vm11 = vcmp.gt.f32.partialorder %v2926_v53, 1.0  ;;  %v3041_v55 = vmul.f32 0.9, %v2926_v53 }
0x1533   :  { %v2927_v42 = vsel %vm5827_vm10, %v4143_v5, %v2811_v19  ;;  %v4152_v59 = vsel %vm3038_vm11, 1.0, %v5597_v0 }
0x1534   :  { %2929 = vst [vmem:[#allocation13 + $0x28] sm:$0xff] %v2927_v42  ;;  %v2932_v43 = vsel %vm5726_vm3, %v2931_v41, %v2927_v42 }
0x1535   :  { %v2933_v44 = vpack.c.bf16 %v2932_v43, %v2932_v43 }
0x1537   :  { %5012 = vmatmul.mubr.bf16.vlgmr.msra.gmra.mrb[48].mxu0 %v2933_v44 }
0x1538   :  { %5051 = vmatprep.mubr.msk.bf16.mxu0 %vm5598_vm0, %v5597_v0  ;;  %5036 = vmatpush3.bf16.msra.mxu0 %v5376_v47  ;;  %v5398_v47 = vld [vmem:[#allocation7 + $0x30] sm:$0xff]  }
0x1539   :  { %5037 = vmatprep.subr.bf16.mxu0 %v5597_v0 }
0x153c   :  { %5038 = vmatpush3.bf16.msra.mxu0 %v5377_v48  ;;  %v5399_v48 = vld [vmem:[#allocation7 + $0x38] sm:$0xff]  }
0x153d   :  { %5039 = vmatprep.subr.bf16.mxu0 %v5597_v0 }
0x1540   :  { %5040 = vmatpush3.bf16.msra.mxu0 %v5378_v49  ;;  %v5400_v49 = vld [vmem:[#allocation9] sm:$0xff]  }
0x1541   :  { %5041 = vmatprep.subr.bf16.mxu0 %v5597_v0 }
0x1544   :  { %5042 = vmatpush3.bf16.msra.mxu0 %v5379_v50  ;;  %v5401_v50 = vld [vmem:[#allocation9 + $0x8] sm:$0xff]  }
0x1545   :  { %5043 = vmatprep.subr.bf16.mxu0 %v5597_v0 }
0x1548   :  { %5044 = vmatpush3.bf16.msra.mxu0 %v5380_v51  ;;  %v5402_v51 = vld [vmem:[#allocation9 + $0x10] sm:$0xff]  }
0x1549   :  { %5045 = vmatprep.subr.bf16.mxu0 %v5597_v0 }
0x154c   :  { %5046 = vmatpush3.bf16.msra.mxu0 %v5381_v52  ;;  %v5403_v52 = vld [vmem:[#allocation9 + $0x18] sm:$0xff]  }
0x154d   :  { %5047 = vmatprep.subr.bf16.mxu0 %v5597_v0 }
0x1550   :  { %5048 = vmatpush3.bf16.msra.mxu0 %v5382_v3 }
0x1551   :  { %5049 = vmatprep.subr.bf16.mxu0 %v5597_v0 }
0x1554   :  { %5050 = vmatpush3.bf16.msra.mxu0 %v5383_v4 }
0x1555   :  { %5075 = vmatprep.subr.bf16.mxu0 %v5597_v0 }
0x160a   :  { %v3032_v56 = vpop.f32.mrb[48].mxu0 }
0x160b   :  { %v3042_v57 = vadd.f32 %v3041_v55, %v3032_v56  ;;  %v5013_v58 = vpop.f32.mrb[49].mxu0  ;;  %v5405_v55 = vld [vmem:[#allocation9 + $0x28] sm:$0xff]  }
0x160c   :  { %v3035_v60 = vpop.f32.mrb[50].mxu0 }
0x160d   :  { %v3043_v61 = vsub.f32 %v3042_v57, %v4152_v59  ;;  %v5014_v62 = vpop.f32.mrb[51].mxu0 }
0x160f   :  { %vm3044_vm12 = vcmp.gt.f32.partialorder %v3043_v61, 1.0  ;;  %v3047_v14 = vsel %vm5761_vm8, %v3043_v61, %v2926_v53  ;;  %v5404_v53 = vld [vmem:[#allocation9 + $0x20] sm:$0xff]  }
0x1610   :  { %v4153_v63 = vsel %vm3044_vm12, 1.0, %v5597_v0  ;;  %vm3154_vm14 = vcmp.gt.f32.partialorder %v3047_v14, 1.0  ;;  %v3157_v15 = vmul.f32 0.9, %v3047_v14 }
0x1611   :  { %v3048_v1 = vsel %vm5761_vm8, %v4153_v63, %v2932_v43  ;;  %v4162_v19 = vsel %vm3154_vm14, 1.0, %v5597_v0 }
0x1612   :  { %v3049_v2 = vpack.c.bf16 %v3048_v1, %v3048_v1 }
0x1614   :  { %5032 = vmatmul.mubr.bf16.vlgmr.msra.gmra.mrb[48].mxu1 %v3049_v2  ;;  %v3400_v2 = vld [vmem:[#allocation4 + $0x38] sm:$0xff] }
0x1615   :  { %5071 = vmatprep.mubr.msk.bf16.mxu1 %vm5598_vm0, %v5597_v0  ;;  %5056 = vmatpush3.bf16.msra.mxu1 %v5384_v6 }
0x1616   :  { %5057 = vmatprep.subr.bf16.mxu1 %v5597_v0 }
0x1619   :  { %5058 = vmatpush3.bf16.msra.mxu1 %v5385_v7 }
0x161a   :  { %5059 = vmatprep.subr.bf16.mxu1 %v5597_v0 }
0x161d   :  { %5060 = vmatpush3.bf16.msra.mxu1 %v5386_v8  ;;  %v5406_v8 = vld [vmem:[#allocation9 + $0x30] sm:$0xff]  }
0x161e   :  { %5061 = vmatprep.subr.bf16.mxu1 %v5597_v0 }
0x1621   :  { %5062 = vmatpush3.bf16.msra.mxu1 %v5387_v9  ;;  %v5407_v9 = vld [vmem:[#allocation9 + $0x38] sm:$0xff]  }
0x1622   :  { %5063 = vmatprep.subr.bf16.mxu1 %v5597_v0 }
0x1625   :  { %5064 = vmatpush3.bf16.msra.mxu1 %v5388_v11  ;;  %v5408_v11 = vld [vmem:[#allocation10] sm:$0xff]  }
0x1626   :  { %5065 = vmatprep.subr.bf16.mxu1 %v5597_v0 }
0x1629   :  { %5066 = vmatpush3.bf16.msra.mxu1 %v5389_v12  ;;  %v5409_v12 = vld [vmem:[#allocation10 + $0x8] sm:$0xff]  }
0x162a   :  { %5067 = vmatprep.subr.bf16.mxu1 %v5597_v0 }
0x162d   :  { %5068 = vmatpush3.bf16.msra.mxu1 %v5390_v26 }
0x162e   :  { %5069 = vmatprep.subr.bf16.mxu1 %v5597_v0 }
0x1631   :  { %5070 = vmatpush3.bf16.msra.mxu1 %v5391_v27 }
0x1632   :  { %5095 = vmatprep.subr.bf16.mxu1 %v5597_v0 }
0x16e7   :  { %v3148_v16 = vpop.f32.mrb[48].mxu1 }
0x16e8   :  { %v3158_v17 = vadd.f32 %v3157_v15, %v3148_v16  ;;  %v5033_v18 = vpop.f32.mrb[49].mxu1  ;;  %v5412_v15 = vld [vmem:[#allocation10 + $0x20] sm:$0xff]   ;;  %v5413_v16 = vld [vmem:[#allocation10 + $0x28] sm:$0xff]  }
0x16e9   :  { %v3151_v20 = vpop.f32.mrb[50].mxu1 }
0x16ea   :  { %v3159_v21 = vsub.f32 %v3158_v17, %v4162_v19  ;;  %v5034_v22 = vpop.f32.mrb[51].mxu1 }
0x16ec   :  { %vm3160_vm15 = vcmp.gt.f32.partialorder %v3159_v21, 1.0  ;;  %v3163_v34 = vsel %vm5783_vm13, %v3159_v21, %v3047_v14  ;;  %v5411_v14 = vld [vmem:[#allocation10 + $0x18] sm:$0xff]  }
0x16ed   :  { %v4163_v23 = vsel %vm3160_vm15, 1.0, %v5597_v0  ;;  %vm3270_vm1 = vcmp.gt.f32.partialorder %v3163_v34, 1.0  ;;  %v3273_v35 = vmul.f32 0.9, %v3163_v34 }
0x16ee   :  { %v3164_v24 = vsel %vm5783_vm13, %v4163_v23, %v3048_v1  ;;  %v4172_v40 = vsel %vm3270_vm1, 1.0, %v5597_v0 }
0x16ef   :  { %v3165_v25 = vpack.c.bf16 %v3164_v24, %v3164_v24 }
0x16f1   :  { %5052 = vmatmul.mubr.bf16.vlgmr.msra.gmra.mrb[52].mxu0 %v3165_v25 }
0x16f2   :  { %5091 = vmatprep.mubr.msk.bf16.mxu0 %vm5598_vm0, %v5597_v0  ;;  %5076 = vmatpush3.bf16.msra.mxu0 %v5392_v28 }
0x16f3   :  { %5077 = vmatprep.subr.bf16.mxu0 %v5597_v0 }
0x16f6   :  { %5078 = vmatpush3.bf16.msra.mxu0 %v5393_v29  ;;  %v5414_v29 = vld [vmem:[#allocation10 + $0x30] sm:$0xff]  }
0x16f7   :  { %5079 = vmatprep.subr.bf16.mxu0 %v5597_v0 }
0x16fa   :  { %5080 = vmatpush3.bf16.msra.mxu0 %v5394_v30  ;;  %v5415_v30 = vld [vmem:[#allocation10 + $0x38] sm:$0xff]  }
0x16fb   :  { %5081 = vmatprep.subr.bf16.mxu0 %v5597_v0 }
0x16fe   :  { %5082 = vmatpush3.bf16.msra.mxu0 %v5395_v32  ;;  %v5416_v32 = vld [vmem:[#allocation12] sm:$0xff]  }
0x16ff   :  { %5083 = vmatprep.subr.bf16.mxu0 %v5597_v0 }
0x1702   :  { %5084 = vmatpush3.bf16.msra.mxu0 %v5396_v33  ;;  %v5417_v33 = vld [vmem:[#allocation12 + $0x8] sm:$0xff]  }
0x1703   :  { %5085 = vmatprep.subr.bf16.mxu0 %v5597_v0 }
0x1706   :  { %5086 = vmatpush3.bf16.msra.mxu0 %v5397_v46 }
0x1707   :  { %5087 = vmatprep.subr.bf16.mxu0 %v5597_v0 }
0x170a   :  { %5088 = vmatpush3.bf16.msra.mxu0 %v5398_v47 }
0x170b   :  { %5089 = vmatprep.subr.bf16.mxu0 %v5597_v0 }
0x170e   :  { %5090 = vmatpush3.bf16.msra.mxu0 %v5399_v48 }
0x170f   :  { %5115 = vmatprep.subr.bf16.mxu0 %v5597_v0 }
0x17c4   :  { %v3264_v36 = vpop.f32.mrb[52].mxu0 }
0x17c5   :  { %v3274_v38 = vadd.f32 %v3273_v35, %v3264_v36  ;;  %v5053_v39 = vpop.f32.mrb[53].mxu0  ;;  %v5419_v35 = vld [vmem:[#allocation12 + $0x18] sm:$0xff]   ;;  %v5420_v36 = vld [vmem:[#allocation12 + $0x20] sm:$0xff]  }
0x17c6   :  { %v3267_v41 = vpop.f32.mrb[54].mxu0 }
0x17c7   :  { %v3275_v5 = vsub.f32 %v3274_v38, %v4172_v40  ;;  %v5054_v42 = vpop.f32.mrb[55].mxu0  ;;  %v5421_v38 = vld [vmem:[#allocation12 + $0x28] sm:$0xff]  }
0x17c9   :  { %vm3276_vm2 = vcmp.gt.f32.partialorder %v3275_v5, 1.0  ;;  %v3279_v56 = vsel %vm5804_vm4, %v3275_v5, %v3163_v34  ;;  %v5418_v34 = vld [vmem:[#allocation12 + $0x10] sm:$0xff]  }
0x17ca   :  { %v4173_v43 = vsel %vm3276_vm2, 1.0, %v5597_v0  ;;  %vm3386_vm5 = vcmp.gt.f32.partialorder %v3279_v56, 1.0  ;;  %v3389_v57 = vmul.f32 0.9, %v3279_v56 }
0x17cb   :  { %v3280_v44 = vsel %vm5804_vm4, %v4173_v43, %v3164_v24  ;;  %v4182_v61 = vsel %vm3386_vm5, 1.0, %v5597_v0 }
0x17cc   :  { %v3281_v45 = vpack.c.bf16 %v3280_v44, %v3280_v44 }
0x17ce   :  { %5072 = vmatmul.mubr.bf16.vlgmr.msra.gmra.mrb[52].mxu1 %v3281_v45 }
0x17cf   :  { %5111 = vmatprep.mubr.msk.bf16.mxu1 %vm5598_vm0, %v5597_v0  ;;  %5096 = vmatpush3.bf16.msra.mxu1 %v5400_v49 }
0x17d0   :  { %5097 = vmatprep.subr.bf16.mxu1 %v5597_v0 }
0x17d3   :  { %5098 = vmatpush3.bf16.msra.mxu1 %v5401_v50  ;;  %v5423_v50 = vld [vmem:[#allocation12 + $0x38] sm:$0xff]  }
0x17d4   :  { %5099 = vmatprep.subr.bf16.mxu1 %v5597_v0 }
0x17d7   :  { %5100 = vmatpush3.bf16.msra.mxu1 %v5402_v51 }
0x17d8   :  { %5101 = vmatprep.subr.bf16.mxu1 %v5597_v0 }
0x17db   :  { %5102 = vmatpush3.bf16.msra.mxu1 %v5403_v52 }
0x17dc   :  { %5103 = vmatprep.subr.bf16.mxu1 %v5597_v0 }
0x17df   :  { %5104 = vmatpush3.bf16.msra.mxu1 %v5404_v53 }
0x17e0   :  { %5105 = vmatprep.subr.bf16.mxu1 %v5597_v0 }
0x17e3   :  { %5106 = vmatpush3.bf16.msra.mxu1 %v5405_v55 }
0x17e4   :  { %5107 = vmatprep.subr.bf16.mxu1 %v5597_v0 }
0x17e7   :  { %5108 = vmatpush3.bf16.msra.mxu1 %v5406_v8 }
0x17e8   :  { %5109 = vmatprep.subr.bf16.mxu1 %v5597_v0 }
0x17eb   :  { %5110 = vmatpush3.bf16.msra.mxu1 %v5407_v9 }
0x17ec   :  { %5135 = vmatprep.subr.bf16.mxu1 %v5597_v0 }
0x18a1   :  { %v3380_v58 = vpop.f32.mrb[52].mxu1 }
0x18a2   :  { %v3390_v59 = vadd.f32 %v3389_v57, %v3380_v58  ;;  %v5073_v60 = vpop.f32.mrb[53].mxu1 }
0x18a3   :  { %v3383_v62 = vpop.f32.mrb[54].mxu1 }
0x18a4   :  { %v3391_v63 = vsub.f32 %v3390_v59, %v4182_v61  ;;  %v5074_v1 = vpop.f32.mrb[55].mxu1 }
0x18a6   :  { %vm3392_vm6 = vcmp.gt.f32.partialorder %v3391_v63, 1.0  ;;  %v3395_v17 = vsel %vm5827_vm10, %v3391_v63, %v3279_v56 }
0x18a7   :  { %v4183_v3 = vsel %vm3392_vm6, 1.0, %v5597_v0  ;;  %v3510_v18 = vmul.f32 0.9, %v3395_v17 }
0x18a8   :  { %v3396_v4 = vsel %vm5827_vm10, %v4183_v3, %v3280_v44 }
0x18a9   :  { %3398 = vst [vmem:[#allocation13 + $0x30] sm:$0xff] %v3396_v4  ;;  %v3401_v6 = vsel %vm5726_vm3, %v3400_v2, %v3396_v4  ;;  %vm3507_vm3 = vcmp.gt.f32.partialorder %v3395_v17, 1.0 }
0x18aa   :  { %v3402_v7 = vpack.c.bf16 %v3401_v6, %v3401_v6  ;;  %v4192_v22 = vsel %vm3507_vm3, 1.0, %v5597_v0 }
0x18ac   :  { %5092 = vmatmul.mubr.bf16.vlgmr.msra.gmra.mrb[56].mxu0 %v3402_v7 }
0x18ad   :  { %5131 = vmatprep.mubr.msk.bf16.mxu0 %vm5598_vm0, %v5597_v0  ;;  %5116 = vmatpush3.bf16.msra.mxu0 %v5408_v11 }
0x18ae   :  { %5117 = vmatprep.subr.bf16.mxu0 %v5597_v0 }
0x18b1   :  { %5118 = vmatpush3.bf16.msra.mxu0 %v5409_v12 }
0x18b2   :  { %5119 = vmatprep.subr.bf16.mxu0 %v5597_v0 }
0x18b5   :  { %5120 = vmatpush3.bf16.msra.mxu0 %v5410_v10 }
0x18b6   :  { %5121 = vmatprep.subr.bf16.mxu0 %v5597_v0 }
0x18b9   :  { %5122 = vmatpush3.bf16.msra.mxu0 %v5411_v14 }
0x18ba   :  { %5123 = vmatprep.subr.bf16.mxu0 %v5597_v0 }
0x18bd   :  { %5124 = vmatpush3.bf16.msra.mxu0 %v5412_v15 }
0x18be   :  { %5125 = vmatprep.subr.bf16.mxu0 %v5597_v0 }
0x18c1   :  { %5126 = vmatpush3.bf16.msra.mxu0 %v5413_v16 }
0x18c2   :  { %5127 = vmatprep.subr.bf16.mxu0 %v5597_v0 }
0x18c5   :  { %5128 = vmatpush3.bf16.msra.mxu0 %v5414_v29 }
0x18c6   :  { %5129 = vmatprep.subr.bf16.mxu0 %v5597_v0 }
0x18c9   :  { %5130 = vmatpush3.bf16.msra.mxu0 %v5415_v30 }
0x197f   :  { %v3501_v19 = vpop.f32.mrb[56].mxu0 }
0x1980   :  { %v3511_v20 = vadd.f32 %v3510_v18, %v3501_v19  ;;  %v5093_v21 = vpop.f32.mrb[57].mxu0 }
0x1981   :  { %v3504_v23 = vpop.f32.mrb[58].mxu0 }
0x1982   :  { %v3512_v24 = vsub.f32 %v3511_v20, %v4192_v22  ;;  %v5094_v25 = vpop.f32.mrb[59].mxu0 }
0x1984   :  { %vm3513_vm7 = vcmp.gt.f32.partialorder %v3512_v24, 1.0  ;;  %v3516_v39 = vsel %vm5761_vm8, %v3512_v24, %v3395_v17 }
0x1985   :  { %v4193_v26 = vsel %vm3513_vm7, 1.0, %v5597_v0  ;;  %v3626_v40 = vmul.f32 0.9, %v3516_v39 }
0x1986   :  { %v3517_v27 = vsel %vm5761_vm8, %v4193_v26, %v3401_v6 }
0x1987   :  { %v3518_v28 = vpack.c.bf16 %v3517_v27, %v3517_v27 }
0x1989   :  { %5112 = vmatmul.mubr.bf16.vlgmr.msra.gmra.mrb[56].mxu1 %v3518_v28 }
0x198a   :  { %5151 = vmatprep.mubr.msk.bf16.mxu1 %vm5598_vm0, %v5597_v0  ;;  %5136 = vmatpush3.bf16.msra.mxu1 %v5416_v32  ;;  %vm3623_vm0 = vcmp.gt.f32.partialorder %v3516_v39, 1.0 }
0x198b   :  { %5137 = vmatprep.subr.bf16.mxu1 %v5597_v0  ;;  %v4202_v43 = vsel %vm3623_vm0, 1.0, %v5597_v0 }
0x198e   :  { %5138 = vmatpush3.bf16.msra.mxu1 %v5417_v33 }
0x198f   :  { %5139 = vmatprep.subr.bf16.mxu1 %v5597_v0 }
0x1992   :  { %5140 = vmatpush3.bf16.msra.mxu1 %v5418_v34 }
0x1993   :  { %5141 = vmatprep.subr.bf16.mxu1 %v5597_v0 }
0x1996   :  { %5142 = vmatpush3.bf16.msra.mxu1 %v5419_v35 }
0x1997   :  { %5143 = vmatprep.subr.bf16.mxu1 %v5597_v0 }
0x199a   :  { %5144 = vmatpush3.bf16.msra.mxu1 %v5420_v36 }
0x199b   :  { %5145 = vmatprep.subr.bf16.mxu1 %v5597_v0 }
0x199e   :  { %5146 = vmatpush3.bf16.msra.mxu1 %v5421_v38 }
0x199f   :  { %5147 = vmatprep.subr.bf16.mxu1 %v5597_v0 }
0x19a2   :  { %5148 = vmatpush3.bf16.msra.mxu1 %v5422_v31 }
0x19a3   :  { %5149 = vmatprep.subr.bf16.mxu1 %v5597_v0 }
0x19a6   :  { %5150 = vmatpush3.bf16.msra.mxu1 %v5423_v50 }
0x1a5c   :  { %v3617_v41 = vpop.f32.mrb[56].mxu1 }
0x1a5d   :  { %v3627_v5 = vadd.f32 %v3626_v40, %v3617_v41  ;;  %v5113_v42 = vpop.f32.mrb[57].mxu1 }
0x1a5e   :  { %v3620_v44 = vpop.f32.mrb[58].mxu1 }
0x1a5f   :  { %v3628_v45 = vsub.f32 %v3627_v5, %v4202_v43  ;;  %v5114_v46 = vpop.f32.mrb[59].mxu1 }
0x1a61   :  { %vm3629_vm9 = vcmp.gt.f32.partialorder %v3628_v45, 1.0  ;;  %v3632_v51 = vsel %vm5783_vm13, %v3628_v45, %v3516_v39 }
0x1a62   :  { %v4203_v47 = vsel %vm3629_vm9, 1.0, %v5597_v0  ;;  %vm3739_vm8 = vcmp.gt.f32.partialorder %v3632_v51, 1.0  ;;  %v3742_v52 = vmul.f32 0.9, %v3632_v51 }
0x1a63   :  { %v3633_v48 = vsel %vm5783_vm13, %v4203_v47, %v3517_v27  ;;  %v4212_v57 = vsel %vm3739_vm8, 1.0, %v5597_v0 }
0x1a64   :  { %v3634_v49 = vpack.c.bf16 %v3633_v48, %v3633_v48 }
0x1a66   :  { %5132 = vmatmul.mubr.bf16.vlgmr.msra.gmra.mrb[60].mxu0 %v3634_v49 }
0x1b39   :  { %v3733_v53 = vpop.f32.mrb[60].mxu0 }
0x1b3a   :  { %v3743_v55 = vadd.f32 %v3742_v52, %v3733_v53  ;;  %v5133_v56 = vpop.f32.mrb[61].mxu0 }
0x1b3b   :  { %v3736_v58 = vpop.f32.mrb[62].mxu0 }
0x1b3c   :  { %v3744_v59 = vsub.f32 %v3743_v55, %v4212_v57  ;;  %v5134_v60 = vpop.f32.mrb[63].mxu0 }
0x1b3e   :  { %vm3745_vm11 = vcmp.gt.f32.partialorder %v3744_v59, 1.0  ;;  %v3748_v54 = vsel %vm5804_vm4, %v3744_v59, %v3632_v51 }
0x1b3f   :  { %v4213_v61 = vsel %vm3745_vm11, 1.0, %v5597_v0  ;;  %vm3855_vm13 = vcmp.gt.f32.partialorder %v3748_v54, 1.0  ;;  %v3858_v1 = vmul.f32 0.9, %v3748_v54 }
0x1b40   :  { %v3749_v62 = vsel %vm5804_vm4, %v4213_v61, %v3633_v48  ;;  %v4222_v6 = vsel %vm3855_vm13, 1.0, %v5597_v0 }
0x1b41   :  { %v3750_v63 = vpack.c.bf16 %v3749_v62, %v3749_v62 }
0x1b43   :  { %5152 = vmatmul.mubr.bf16.vlgmr.msra.gmra.mrb[60].mxu1 %v3750_v63 }
0x1c16   :  { %v3849_v2 = vpop.f32.mrb[60].mxu1 }
0x1c17   :  { %v3859_v3 = vadd.f32 %v3858_v1, %v3849_v2  ;;  %v5153_v4 = vpop.f32.mrb[61].mxu1 }
0x1c18   :  { %v3852_v7 = vpop.f32.mrb[62].mxu1 }
0x1c19   :  { %v3860_v8 = vsub.f32 %v3859_v3, %v4222_v6  ;;  %v5154_v9 = vpop.f32.mrb[63].mxu1 }
0x1c1b   :  { %vm3861_vm12 = vcmp.gt.f32.partialorder %v3860_v8, 1.0  ;;  %v3864_v13 = vsel %vm5827_vm10, %v3860_v8, %v3748_v54 }
0x1c1c   :  { %v4223_v11 = vsel %vm3861_vm12, 1.0, %v5597_v0  ;;  %3870 = vst [vmem:[#allocation14] sm:$0xff] %v3864_v13 }
0x1c1d   :  { %v3865_v12 = vsel %vm5827_vm10, %v4223_v11, %v3749_v62 }
0x1c1e   :  { %5545 = shalt.err (!%p5542_p2)
}
0x1c1f   :  { %s5546_s18 = scalar_lea.hbm %s6318_s6, 128 }
0x1c20   :  { %p5547_p3 = scmp.ne.s32.totalorder %s6318_s6, %s5546_s18  ;;  %p5550_p4 = scmp.lt.u32.totalorder %s5546_s18, %s6318_s6 }
0x1c22   :  { %p5552_p5 = pnand %p5550_p4, %p5547_p3 }
0x1c24   :  { %5555 = shalt.err (!%p5552_p5)
}
0x1c25   :  { %3892 = dma.vmem_to_hbm [thread:$0]  %s3890_s7, 128, %s6318_s6, [#allocation15]   ;;  %3867 = vst [vmem:[#allocation13 + $0x38] sm:$0xff] %v3865_v12 }
0x1c26   :  { %s5556_s0 = scalar_lea.vmem %s6276_s13, 1024  ;;  %p5561_p7 = scmp.lt.s32.totalorder %s6276_s13, %s6276_s13 }
0x1c27   :  { %p5557_p6 = scmp.ne.s32.totalorder %s6276_s13, %s5556_s0  ;;  %p5562_p8 = scmp.lt.s32.totalorder %s5556_s0, %s5556_s0 }
0x1c29   :  { %p5563_p9 = por %p5562_p8, %p5561_p7 }
0x1c2b   :  { %p5564_p10 = pnand %p5563_p9, %p5557_p6 }
0x1c2d   :  { %5567 = shalt.err (!%p5564_p10)
}
0x1c2e   :  { %s5568_s25 = scalar_lea.hbm %s6317_s5, 1024 }
0x1c2f   :  { %p5569_p11 = scmp.ne.s32.totalorder %s6317_s5, %s5568_s25  ;;  %p5572_p12 = scmp.lt.u32.totalorder %s5568_s25, %s6317_s5 }
0x1c31   :  { %p5574_p13 = pnand %p5572_p12, %p5569_p11 }
0x1c33   :  { %5577 = shalt.err (!%p5574_p13)
}
0x1c34   :  { %3882 = dma.vmem_to_hbm [thread:$0]  %s6276_s13, 1024, %s6317_s5, [#allocation6], %s5593_s3, %s5593_s3, %s5594_s10  }
0x1c35   :  { %5584 = dma.done.wait [#allocation6], 1024  }
0x1c36   :  { %5585 = vsyncadd [#allocation6], 4294966272 }
0x1c37   :  { %5586 = dma.done.wait [#allocation15], 128  }
0x1c38   :  { %5587 = vsyncadd [#allocation15], 4294967168 }
0x1c39   :  { %3899 = vsyncpa [#allocation5], 1 }
0x1c3a   :  { %3900 = vsyncpa [#allocation8], 1 }
0x1c3b   :  { %3901 = vsyncpa [#allocation11], 1 }
0x1c3c   :  { %3902 = vsyncpa [#allocation6], 1 }
0x1c3d   :  { %3903 = vsyncpa [#allocation15], 1 }

</bundles_post_ra>
